<compile_context>
chip_gen: v6e
topology: v6e:2x2x1
jax: 0.10.0
libtpu: 0.0.40
codegen_flags: <defaults>
</compile_context>

<pallas_src>
import functools
import math

import jax
import jax.numpy as jnp
from jax.experimental import pallas as pl
from jax.experimental.pallas import tpu as pltpu

MASK_VALUE = -1e30
VMEM_LIMIT = 32 * 1024 * 1024  # above v5e's 16 MiB scoped default, safe on all


# ---------------------------------------------------------------------------
# Kernel 1: fused QKV projection + RoPE, gridded over batch.
# ---------------------------------------------------------------------------
def qkv_rope_kernel(x_ref, wqkv_ref, cos_ref, sin_ref, q_ref, k_ref, v_ref,
                    *, num_heads, num_kv_groups, head_dim, d_out):
    x = x_ref[0].astype(jnp.bfloat16)                       # (T, d_in)
    # one fused projection matmul (bf16 x bf16 -> f32 accumulate)
    qkv = jnp.dot(x, wqkv_ref[...], preferred_element_type=jnp.float32)

    cos = cos_ref[...]                                      # (T, hd) f32
    sin = sin_ref[...]                                      # signed-sin table

    def rope(xh):                                           # (T, hd) f32
        # rotate-half via XLU roll; sign flip already folded into `sin`
        return xh * cos + pltpu.roll(xh, shift=head_dim // 2, axis=1) * sin

    # Per-head RoPE + layout writes only (lane-aligned 128-wide slices).
    # The attention matmuls themselves are batched over heads by the flash
    # kernel's grid, not by this loop.
    for h in range(num_heads):
        qh = qkv[:, h * head_dim:(h + 1) * head_dim]
        q_ref[0, h] = rope(qh).astype(jnp.bfloat16)

    k_off = d_out
    v_off = d_out + num_kv_groups * head_dim
    for g in range(num_kv_groups):                          # RoPE once per KV group
        kg = qkv[:, k_off + g * head_dim:k_off + (g + 1) * head_dim]
        k_ref[0, g] = rope(kg).astype(jnp.bfloat16)
        vg = qkv[:, v_off + g * head_dim:v_off + (g + 1) * head_dim]
        v_ref[0, g] = vg.astype(jnp.bfloat16)


# ---------------------------------------------------------------------------
# Kernel 2: causal flash attention, grid = (B, H, q_tiles, kv_tiles).
# ---------------------------------------------------------------------------
def flash_attn_kernel(q_ref, k_ref, v_ref, ctx_ref, m_sc, l_sc, acc_sc,
                      *, scale, block_q, block_k):
    qi = pl.program_id(2)
    ki = pl.program_id(3)

    @pl.when(ki == 0)
    def _():
        m_sc[...] = jnp.full(m_sc.shape, MASK_VALUE, jnp.float32)
        l_sc[...] = jnp.zeros(l_sc.shape, jnp.float32)
        acc_sc[...] = jnp.zeros(acc_sc.shape, jnp.float32)

    # Skip kv tiles that lie entirely above the causal diagonal.
    @pl.when(ki * block_k <= qi * block_q + (block_q - 1))
    def _():
        q = q_ref[0, 0]                                     # (bq, hd) bf16
        k = k_ref[0, 0]                                     # (bk, hd) bf16
        v = v_ref[0, 0]                                     # (bk, hd) bf16

        s = jnp.einsum('qd,kd->qk', q, k,
                       preferred_element_type=jnp.float32) * scale
        row = qi * block_q + jax.lax.broadcasted_iota(
            jnp.int32, (block_q, block_k), 0)
        col = ki * block_k + jax.lax.broadcasted_iota(
            jnp.int32, (block_q, block_k), 1)
        s = jnp.where(col <= row, s, MASK_VALUE)            # finite, NaN-safe

        m_prev = m_sc[...]
        m_new = jnp.maximum(m_prev, jnp.max(s, axis=-1, keepdims=True))
        alpha = jnp.exp(m_prev - m_new)
        p = jnp.exp(s - m_new)
        l_sc[...] = alpha * l_sc[...] + jnp.sum(p, axis=-1, keepdims=True)
        acc_sc[...] = alpha * acc_sc[...] + jnp.dot(
            p.astype(jnp.bfloat16), v, preferred_element_type=jnp.float32)
        m_sc[...] = m_new

    @pl.when(ki == pl.num_programs(3) - 1)
    def _():
        inv_l = pl.reciprocal(l_sc[...], approx=True)       # EUP slot
        ctx_ref[0] = (acc_sc[...] * inv_l).astype(ctx_ref.dtype)


# ---------------------------------------------------------------------------
# Kernel 3: output projection, grid = (B, q_tiles).
# ---------------------------------------------------------------------------
def out_proj_kernel(ctx_ref, wo_ref, o_ref):
    o_ref[0] = jnp.dot(ctx_ref[0], wo_ref[...],
                       preferred_element_type=jnp.float32)


# ---------------------------------------------------------------------------
# Wrapper
# ---------------------------------------------------------------------------
def grouped_query_attention(x, wqkv, wo, cos, sin_signed, *, num_heads,
                            num_kv_groups, block_q=128, block_k=128):
    B, T, d_in = x.shape
    d_out = wo.shape[0]
    head_dim = d_out // num_heads
    group_size = num_heads // num_kv_groups
    nq = T // block_q
    nk = T // block_k
    scale = 1.0 / math.sqrt(head_dim)

    # ---- fused QKV projection + RoPE --------------------------------------
    q, k, v = pl.pallas_call(
        functools.partial(qkv_rope_kernel, num_heads=num_heads,
                          num_kv_groups=num_kv_groups, head_dim=head_dim,
                          d_out=d_out),
        grid=(B,),
        in_specs=[
            pl.BlockSpec((1, T, d_in), lambda b: (b, 0, 0)),
            pl.BlockSpec(wqkv.shape, lambda b: (0, 0)),
            pl.BlockSpec(cos.shape, lambda b: (0, 0)),
            pl.BlockSpec(sin_signed.shape, lambda b: (0, 0)),
        ],
        out_specs=(
            pl.BlockSpec((1, num_heads, T, head_dim), lambda b: (b, 0, 0, 0)),
            pl.BlockSpec((1, num_kv_groups, T, head_dim), lambda b: (b, 0, 0, 0)),
            pl.BlockSpec((1, num_kv_groups, T, head_dim), lambda b: (b, 0, 0, 0)),
        ),
        out_shape=(
            jax.ShapeDtypeStruct((B, num_heads, T, head_dim), jnp.bfloat16),
            jax.ShapeDtypeStruct((B, num_kv_groups, T, head_dim), jnp.bfloat16),
            jax.ShapeDtypeStruct((B, num_kv_groups, T, head_dim), jnp.bfloat16),
        ),
        compiler_params=pltpu.CompilerParams(
            dimension_semantics=("parallel",),
            vmem_limit_bytes=VMEM_LIMIT),
    )(x, wqkv, cos, sin_signed)

    # ---- flash attention (GQA via index_map: head -> kv group) ------------
    ctx = pl.pallas_call(
        functools.partial(flash_attn_kernel, scale=scale,
                          block_q=block_q, block_k=block_k),
        grid=(B, num_heads, nq, nk),
        in_specs=[
            pl.BlockSpec((1, 1, block_q, head_dim),
                         lambda b, h, qi, ki: (b, h, qi, 0)),
            pl.BlockSpec((1, 1, block_k, head_dim),
                         lambda b, h, qi, ki: (b, h // group_size, ki, 0)),
            pl.BlockSpec((1, 1, block_k, head_dim),
                         lambda b, h, qi, ki: (b, h // group_size, ki, 0)),
        ],
        out_specs=pl.BlockSpec((1, block_q, head_dim),
                               lambda b, h, qi, ki: (b, qi, h)),
        out_shape=jax.ShapeDtypeStruct((B, T, d_out), jnp.bfloat16),
        scratch_shapes=[
            pltpu.VMEM((block_q, 1), jnp.float32),          # running max
            pltpu.VMEM((block_q, 1), jnp.float32),          # running sum
            pltpu.VMEM((block_q, head_dim), jnp.float32),   # accumulator
        ],
        compiler_params=pltpu.CompilerParams(
            dimension_semantics=("parallel", "parallel", "parallel", "arbitrary"),
            vmem_limit_bytes=VMEM_LIMIT),
    )(q, k, v)

    # ---- single output-projection matmul ----------------------------------
    out = pl.pallas_call(
        out_proj_kernel,
        grid=(B, nq),
        in_specs=[
            pl.BlockSpec((1, block_q, d_out), lambda b, qi: (b, qi, 0)),
            pl.BlockSpec(wo.shape, lambda b, qi: (0, 0)),
        ],
        out_specs=pl.BlockSpec((1, block_q, d_out), lambda b, qi: (b, qi, 0)),
        out_shape=jax.ShapeDtypeStruct((B, T, d_out), jnp.float32),
        compiler_params=pltpu.CompilerParams(
            dimension_semantics=("parallel", "parallel"),
            vmem_limit_bytes=VMEM_LIMIT),
    )(ctx, wo)
    return out


# ---------------------------------------------------------------------------
# RoPE tables (freq_config=None path of precompute_rope_params)
# ---------------------------------------------------------------------------
def precompute_rope(head_dim, theta_base=10000.0, context_length=8192):
    inv_freq = 1.0 / theta_base ** (
        jnp.arange(0, head_dim // 2, dtype=jnp.float32) / (head_dim // 2))
    positions = jnp.arange(context_length, dtype=jnp.float32)
    angles = positions[:, None] * inv_freq[None, :]
    angles = jnp.concatenate([angles, angles], axis=1)
    return jnp.cos(angles), jnp.sin(angles)


# ---------------------------------------------------------------------------
# main
# ---------------------------------------------------------------------------
if __name__ == "__main__":
    # Small but lane-aligned config (head_dim = 128, dims multiples of 128).
    B, T = 2, 256
    D_IN, D_OUT = 512, 512
    NUM_HEADS, NUM_KV_GROUPS = 4, 2
    HEAD_DIM = D_OUT // NUM_HEADS                           # 128

    key = jax.random.PRNGKey(0)
    kx, kq, kk, kv, ko = jax.random.split(key, 5)

    x = jax.random.normal(kx, (B, T, D_IN), jnp.float32)

    # nn.Linear(d_in, d, bias=False) computes x @ W.T; we store (d_in, d)
    # weights directly, concatenated into one fused QKV weight, in bf16.
    wq = jax.random.normal(kq, (D_IN, D_OUT), jnp.float32) * 0.02
    wk = jax.random.normal(kk, (D_IN, NUM_KV_GROUPS * HEAD_DIM), jnp.float32) * 0.02
    wv = jax.random.normal(kv, (D_IN, NUM_KV_GROUPS * HEAD_DIM), jnp.float32) * 0.02
    wqkv = jnp.concatenate([wq, wk, wv], axis=1).astype(jnp.bfloat16)
    wo = (jax.random.normal(ko, (D_OUT, D_OUT), jnp.float32) * 0.02).astype(jnp.bfloat16)

    cos_full, sin_full = precompute_rope(HEAD_DIM, 10000.0, 8192)
    cos = cos_full[:T]                                      # (T, head_dim)
    # Fold rotate-half's sign into the sin table:
    #   cat(-x2, x1) * sin == roll(x, hd/2) * cat(-sin_half, sin_half)
    sign = jnp.concatenate([-jnp.ones(HEAD_DIM // 2, jnp.float32),
                            jnp.ones(HEAD_DIM // 2, jnp.float32)])
    sin_signed = sin_full[:T] * sign[None, :]

    out = grouped_query_attention(x, wqkv, wo, cos, sin_signed,
                                  num_heads=NUM_HEADS,
                                  num_kv_groups=NUM_KV_GROUPS)
    jax.block_until_ready(out)
    assert out.shape == (B, T, D_OUT)
    print("KERNEL_OK")
</pallas_src>

<mosaic_0001>
module attributes {stable_mosaic.version = 11 : i64} {
  func.func @qkv_rope_kernel(%arg0: i32, %arg1: memref<1x256x512xf32, #tpu.memory_space<vmem>>, %arg2: memref<512x1024xbf16, #tpu.memory_space<vmem>>, %arg3: memref<256x128xf32, #tpu.memory_space<vmem>>, %arg4: memref<256x128xf32, #tpu.memory_space<vmem>>, %arg5: memref<1x4x256x128xbf16, #tpu.memory_space<vmem>>, %arg6: memref<1x2x256x128xbf16, #tpu.memory_space<vmem>>, %arg7: memref<1x2x256x128xbf16, #tpu.memory_space<vmem>>) attributes {dimension_semantics = [#tpu.dimension_semantics<parallel>], iteration_bounds = array<i64: 2>, scalar_prefetch = 0 : i64, scratch_operands = 0 : i64, tpu.core_type = #tpu.core_type<tc>, window_params = [{transform_indices = @transform_0, window_bounds = array<i64: 1, 256, 512>}, {pipeline_mode = #tpu.pipeline_mode<synchronous>, transform_indices = @transform_1, window_bounds = array<i64: 512, 1024>}, {pipeline_mode = #tpu.pipeline_mode<synchronous>, transform_indices = @transform_2, window_bounds = array<i64: 256, 128>}, {pipeline_mode = #tpu.pipeline_mode<synchronous>, transform_indices = @transform_3, window_bounds = array<i64: 256, 128>}, {transform_indices = @transform_4, window_bounds = array<i64: 1, 4, 256, 128>}, {transform_indices = @transform_5, window_bounds = array<i64: 1, 2, 256, 128>}, {transform_indices = @transform_6, window_bounds = array<i64: 1, 2, 256, 128>}]} {
    %c0 = arith.constant 0 : index
    %c0_0 = arith.constant 0 : index
    %c0_1 = arith.constant 0 : index
    %0 = vector.load %arg1[%c0, %c0_0, %c0_1] : memref<1x256x512xf32, #tpu.memory_space<vmem>>, vector<1x256x512xf32>
    %1 = vector.shape_cast %0 : vector<1x256x512xf32> to vector<256x512xf32>
    %2 = arith.truncf %1 : vector<256x512xf32> to vector<256x512xbf16>
    %c0_2 = arith.constant 0 : index
    %c0_3 = arith.constant 0 : index
    %3 = vector.load %arg2[%c0_2, %c0_3] : memref<512x1024xbf16, #tpu.memory_space<vmem>>, vector<512x1024xbf16>
    %cst = arith.constant dense<0.000000e+00> : vector<256x1024xf32>
    %4 = tpu.matmul %2, %3, %cst {dimension_numbers = #tpu.dot_dimension_numbers<[1], [0], [0], [1], [0, 0, 1, 1], [], []>} : vector<256x512xbf16>, vector<512x1024xbf16>, vector<256x1024xf32> -> vector<256x1024xf32>
    %c0_4 = arith.constant 0 : index
    %c0_5 = arith.constant 0 : index
    %5 = vector.load %arg3[%c0_4, %c0_5] : memref<256x128xf32, #tpu.memory_space<vmem>>, vector<256x128xf32>
    %c0_6 = arith.constant 0 : index
    %c0_7 = arith.constant 0 : index
    %6 = vector.load %arg4[%c0_6, %c0_7] : memref<256x128xf32, #tpu.memory_space<vmem>>, vector<256x128xf32>
    %7 = vector.extract_strided_slice %4 {offsets = [0, 0], sizes = [256, 128], strides = [1, 1]} : vector<256x1024xf32> to vector<256x128xf32>
    %8 = arith.mulf %7, %5 : vector<256x128xf32>
    %c64_i32 = arith.constant 64 : i32
    %9 = tpu.dynamic_rotate %7 by %c64_i32 dim 1 : vector<256x128xf32>, i32 -> vector<256x128xf32>
    %10 = arith.mulf %9, %6 : vector<256x128xf32>
    %11 = arith.addf %8, %10 : vector<256x128xf32>
    %12 = arith.truncf %11 : vector<256x128xf32> to vector<256x128xbf16>
    %c0_8 = arith.constant 0 : index
    %c0_9 = arith.constant 0 : index
    %c0_10 = arith.constant 0 : index
    %c0_11 = arith.constant 0 : index
    %13 = vector.load %arg5[%c0_8, %c0_9, %c0_10, %c0_11] : memref<1x4x256x128xbf16, #tpu.memory_space<vmem>>, vector<1x1x256x128xbf16>
    %14 = vector.shape_cast %13 : vector<1x1x256x128xbf16> to vector<256x128xbf16>
    %15 = vector.shape_cast %12 : vector<256x128xbf16> to vector<1x1x256x128xbf16>
    tpu.vector_store %arg5[%c0_8, %c0_9, %c0_10, %c0_11], %15 {strides = array<i32>} : memref<1x4x256x128xbf16, #tpu.memory_space<vmem>>, vector<1x1x256x128xbf16>,
    %16 = vector.extract_strided_slice %4 {offsets = [0, 128], sizes = [256, 128], strides = [1, 1]} : vector<256x1024xf32> to vector<256x128xf32>
    %17 = arith.mulf %16, %5 : vector<256x128xf32>
    %c64_i32_12 = arith.constant 64 : i32
    %18 = tpu.dynamic_rotate %16 by %c64_i32_12 dim 1 : vector<256x128xf32>, i32 -> vector<256x128xf32>
    %19 = arith.mulf %18, %6 : vector<256x128xf32>
    %20 = arith.addf %17, %19 : vector<256x128xf32>
    %21 = arith.truncf %20 : vector<256x128xf32> to vector<256x128xbf16>
    %c0_13 = arith.constant 0 : index
    %c1 = arith.constant 1 : index
    %c0_14 = arith.constant 0 : index
    %c0_15 = arith.constant 0 : index
    %22 = vector.load %arg5[%c0_13, %c1, %c0_14, %c0_15] : memref<1x4x256x128xbf16, #tpu.memory_space<vmem>>, vector<1x1x256x128xbf16>
    %23 = vector.shape_cast %22 : vector<1x1x256x128xbf16> to vector<256x128xbf16>
    %24 = vector.shape_cast %21 : vector<256x128xbf16> to vector<1x1x256x128xbf16>
    tpu.vector_store %arg5[%c0_13, %c1, %c0_14, %c0_15], %24 {strides = array<i32>} : memref<1x4x256x128xbf16, #tpu.memory_space<vmem>>, vector<1x1x256x128xbf16>,
    %25 = vector.extract_strided_slice %4 {offsets = [0, 256], sizes = [256, 128], strides = [1, 1]} : vector<256x1024xf32> to vector<256x128xf32>
    %26 = arith.mulf %25, %5 : vector<256x128xf32>
    %c64_i32_16 = arith.constant 64 : i32
    %27 = tpu.dynamic_rotate %25 by %c64_i32_16 dim 1 : vector<256x128xf32>, i32 -> vector<256x128xf32>
    %28 = arith.mulf %27, %6 : vector<256x128xf32>
    %29 = arith.addf %26, %28 : vector<256x128xf32>
    %30 = arith.truncf %29 : vector<256x128xf32> to vector<256x128xbf16>
    %c0_17 = arith.constant 0 : index
    %c2 = arith.constant 2 : index
    %c0_18 = arith.constant 0 : index
    %c0_19 = arith.constant 0 : index
    %31 = vector.load %arg5[%c0_17, %c2, %c0_18, %c0_19] : memref<1x4x256x128xbf16, #tpu.memory_space<vmem>>, vector<1x1x256x128xbf16>
    %32 = vector.shape_cast %31 : vector<1x1x256x128xbf16> to vector<256x128xbf16>
    %33 = vector.shape_cast %30 : vector<256x128xbf16> to vector<1x1x256x128xbf16>
    tpu.vector_store %arg5[%c0_17, %c2, %c0_18, %c0_19], %33 {strides = array<i32>} : memref<1x4x256x128xbf16, #tpu.memory_space<vmem>>, vector<1x1x256x128xbf16>,
    %34 = vector.extract_strided_slice %4 {offsets = [0, 384], sizes = [256, 128], strides = [1, 1]} : vector<256x1024xf32> to vector<256x128xf32>
    %35 = arith.mulf %34, %5 : vector<256x128xf32>
    %c64_i32_20 = arith.constant 64 : i32
    %36 = tpu.dynamic_rotate %34 by %c64_i32_20 dim 1 : vector<256x128xf32>, i32 -> vector<256x128xf32>
    %37 = arith.mulf %36, %6 : vector<256x128xf32>
    %38 = arith.addf %35, %37 : vector<256x128xf32>
    %39 = arith.truncf %38 : vector<256x128xf32> to vector<256x128xbf16>
    %c0_21 = arith.constant 0 : index
    %c3 = arith.constant 3 : index
    %c0_22 = arith.constant 0 : index
    %c0_23 = arith.constant 0 : index
    %40 = vector.load %arg5[%c0_21, %c3, %c0_22, %c0_23] : memref<1x4x256x128xbf16, #tpu.memory_space<vmem>>, vector<1x1x256x128xbf16>
    %41 = vector.shape_cast %40 : vector<1x1x256x128xbf16> to vector<256x128xbf16>
    %42 = vector.shape_cast %39 : vector<256x128xbf16> to vector<1x1x256x128xbf16>
    tpu.vector_store %arg5[%c0_21, %c3, %c0_22, %c0_23], %42 {strides = array<i32>} : memref<1x4x256x128xbf16, #tpu.memory_space<vmem>>, vector<1x1x256x128xbf16>,
    %43 = vector.extract_strided_slice %4 {offsets = [0, 512], sizes = [256, 128], strides = [1, 1]} : vector<256x1024xf32> to vector<256x128xf32>
    %44 = arith.mulf %43, %5 : vector<256x128xf32>
    %c64_i32_24 = arith.constant 64 : i32
    %45 = tpu.dynamic_rotate %43 by %c64_i32_24 dim 1 : vector<256x128xf32>, i32 -> vector<256x128xf32>
    %46 = arith.mulf %45, %6 : vector<256x128xf32>
    %47 = arith.addf %44, %46 : vector<256x128xf32>
    %48 = arith.truncf %47 : vector<256x128xf32> to vector<256x128xbf16>
    %c0_25 = arith.constant 0 : index
    %c0_26 = arith.constant 0 : index
    %c0_27 = arith.constant 0 : index
    %c0_28 = arith.constant 0 : index
    %49 = vector.load %arg6[%c0_25, %c0_26, %c0_27, %c0_28] : memref<1x2x256x128xbf16, #tpu.memory_space<vmem>>, vector<1x1x256x128xbf16>
    %50 = vector.shape_cast %49 : vector<1x1x256x128xbf16> to vector<256x128xbf16>
    %51 = vector.shape_cast %48 : vector<256x128xbf16> to vector<1x1x256x128xbf16>
    tpu.vector_store %arg6[%c0_25, %c0_26, %c0_27, %c0_28], %51 {strides = array<i32>} : memref<1x2x256x128xbf16, #tpu.memory_space<vmem>>, vector<1x1x256x128xbf16>,
    %52 = vector.extract_strided_slice %4 {offsets = [0, 768], sizes = [256, 128], strides = [1, 1]} : vector<256x1024xf32> to vector<256x128xf32>
    %53 = arith.truncf %52 : vector<256x128xf32> to vector<256x128xbf16>
    %c0_29 = arith.constant 0 : index
    %c0_30 = arith.constant 0 : index
    %c0_31 = arith.constant 0 : index
    %c0_32 = arith.constant 0 : index
    %54 = vector.load %arg7[%c0_29, %c0_30, %c0_31, %c0_32] : memref<1x2x256x128xbf16, #tpu.memory_space<vmem>>, vector<1x1x256x128xbf16>
    %55 = vector.shape_cast %54 : vector<1x1x256x128xbf16> to vector<256x128xbf16>
    %56 = vector.shape_cast %53 : vector<256x128xbf16> to vector<1x1x256x128xbf16>
    tpu.vector_store %arg7[%c0_29, %c0_30, %c0_31, %c0_32], %56 {strides = array<i32>} : memref<1x2x256x128xbf16, #tpu.memory_space<vmem>>, vector<1x1x256x128xbf16>,
    %57 = vector.extract_strided_slice %4 {offsets = [0, 640], sizes = [256, 128], strides = [1, 1]} : vector<256x1024xf32> to vector<256x128xf32>
    %58 = arith.mulf %57, %5 : vector<256x128xf32>
    %c64_i32_33 = arith.constant 64 : i32
    %59 = tpu.dynamic_rotate %57 by %c64_i32_33 dim 1 : vector<256x128xf32>, i32 -> vector<256x128xf32>
    %60 = arith.mulf %59, %6 : vector<256x128xf32>
    %61 = arith.addf %58, %60 : vector<256x128xf32>
    %62 = arith.truncf %61 : vector<256x128xf32> to vector<256x128xbf16>
    %c0_34 = arith.constant 0 : index
    %c1_35 = arith.constant 1 : index
    %c0_36 = arith.constant 0 : index
    %c0_37 = arith.constant 0 : index
    %63 = vector.load %arg6[%c0_34, %c1_35, %c0_36, %c0_37] : memref<1x2x256x128xbf16, #tpu.memory_space<vmem>>, vector<1x1x256x128xbf16>
    %64 = vector.shape_cast %63 : vector<1x1x256x128xbf16> to vector<256x128xbf16>
    %65 = vector.shape_cast %62 : vector<256x128xbf16> to vector<1x1x256x128xbf16>
    tpu.vector_store %arg6[%c0_34, %c1_35, %c0_36, %c0_37], %65 {strides = array<i32>} : memref<1x2x256x128xbf16, #tpu.memory_space<vmem>>, vector<1x1x256x128xbf16>,
    %66 = vector.extract_strided_slice %4 {offsets = [0, 896], sizes = [256, 128], strides = [1, 1]} : vector<256x1024xf32> to vector<256x128xf32>
    %67 = arith.truncf %66 : vector<256x128xf32> to vector<256x128xbf16>
    %c0_38 = arith.constant 0 : index
    %c1_39 = arith.constant 1 : index
    %c0_40 = arith.constant 0 : index
    %c0_41 = arith.constant 0 : index
    %68 = vector.load %arg7[%c0_38, %c1_39, %c0_40, %c0_41] : memref<1x2x256x128xbf16, #tpu.memory_space<vmem>>, vector<1x1x256x128xbf16>
    %69 = vector.shape_cast %68 : vector<1x1x256x128xbf16> to vector<256x128xbf16>
    %70 = vector.shape_cast %67 : vector<256x128xbf16> to vector<1x1x256x128xbf16>
    tpu.vector_store %arg7[%c0_38, %c1_39, %c0_40, %c0_41], %70 {strides = array<i32>} : memref<1x2x256x128xbf16, #tpu.memory_space<vmem>>, vector<1x1x256x128xbf16>,
    return
  }
  func.func @transform_0(%arg0: i32) -> (i32, i32, i32) {
    %c0_i32 = arith.constant 0 : i32
    %c0_i32_0 = arith.constant 0 : i32
    %c0_i32_1 = arith.constant 0 : i32
    return %arg0, %c0_i32, %c0_i32_0 : i32, i32, i32
  }
  func.func @transform_1(%arg0: i32) -> (i32, i32) {
    %c0_i32 = arith.constant 0 : i32
    %c0_i32_0 = arith.constant 0 : i32
    %c0_i32_1 = arith.constant 0 : i32
    return %c0_i32, %c0_i32_0 : i32, i32
  }
  func.func @transform_2(%arg0: i32) -> (i32, i32) {
    %c0_i32 = arith.constant 0 : i32
    %c0_i32_0 = arith.constant 0 : i32
    %c0_i32_1 = arith.constant 0 : i32
    return %c0_i32, %c0_i32_0 : i32, i32
  }
  func.func @transform_3(%arg0: i32) -> (i32, i32) {
    %c0_i32 = arith.constant 0 : i32
    %c0_i32_0 = arith.constant 0 : i32
    %c0_i32_1 = arith.constant 0 : i32
    return %c0_i32, %c0_i32_0 : i32, i32
  }
  func.func @transform_4(%arg0: i32) -> (i32, i32, i32, i32) {
    %c0_i32 = arith.constant 0 : i32
    %c0_i32_0 = arith.constant 0 : i32
    %c0_i32_1 = arith.constant 0 : i32
    %c0_i32_2 = arith.constant 0 : i32
    return %arg0, %c0_i32, %c0_i32_0, %c0_i32_1 : i32, i32, i32, i32
  }
  func.func @transform_5(%arg0: i32) -> (i32, i32, i32, i32) {
    %c0_i32 = arith.constant 0 : i32
    %c0_i32_0 = arith.constant 0 : i32
    %c0_i32_1 = arith.constant 0 : i32
    %c0_i32_2 = arith.constant 0 : i32
    return %arg0, %c0_i32, %c0_i32_0, %c0_i32_1 : i32, i32, i32, i32
  }
  func.func @transform_6(%arg0: i32) -> (i32, i32, i32, i32) {
    %c0_i32 = arith.constant 0 : i32
    %c0_i32_0 = arith.constant 0 : i32
    %c0_i32_1 = arith.constant 0 : i32
    %c0_i32_2 = arith.constant 0 : i32
    return %arg0, %c0_i32, %c0_i32_0, %c0_i32_1 : i32, i32, i32, i32
  }
}

</mosaic_0001>

<bundles_post_ra>
// kernel: tpu_custom_call.1
= control target key start
LH: loop header
LB: loop body
LE: loop exit
PB: predicated region body
PF: predicated region fallthrough
CT: control target
= control target key end

     0   :  { %12 = vsyncpa [#allocation3], 0  ;;  %s10366_s0 = inlined_call_operand.hbm [shape: f32[2,256,512], index: 0, kind: input, shape index: {}]   ;;  %s10367_s1 = inlined_call_operand.hbm [shape: bf16[512,1024], index: 1, kind: input, shape index: {}]   ;;  %s10368_s2 = inlined_call_operand.hbm [shape: f32[256,128], index: 2, kind: input, shape index: {}]   ;;  %s10369_s3 = inlined_call_operand.hbm [shape: f32[256,128], index: 3, kind: input, shape index: {}]   ;;  %s10370_s4 = inlined_call_operand.hbm [shape: bf16[2,4,256,128], index: 4, kind: output, shape index: {0}]   ;;  %s10371_s5 = inlined_call_operand.hbm [shape: bf16[2,2,256,128], index: 5, kind: output, shape index: {1}]   ;;  %s10372_s6 = inlined_call_operand.hbm [shape: bf16[2,2,256,128], index: 6, kind: output, shape index: {2}]  }
   0x1   :  { %14 = vsyncpa [#allocation3 + $0x1], 0 }
   0x2   :  { %15 = vsyncpa [#allocation6], 0 }
   0x3   :  { %16 = vsyncpa [#allocation9], 0 }
   0x4   :  { %17 = vsyncpa [#allocation4], 0 }
   0x5   :  { %19 = vsyncpa [#allocation4 + $0x1], 0 }
   0x6   :  { %20 = vsyncpa [#allocation12], 0 }
   0x7   :  { %22 = vsyncpa [#allocation12 + $0x1], 0  ;;  %s8362_s21 = smov 0   ;;  %s8364_s22 = smov 0  }
   0x8   :  { %s8366_s23 = smov 0   ;;  %s8368_s24 = smov 0  }
   0x9 LB: > { %s8383_s25 = sadd.s32 4294967295, %s8312_s24   ;;  %s10373_s26 = sadd.s32 4294967294, %s8312_s24   ;;  %s8312_s24 = sphi %s8368_s24, %s10938_s24   ;;  %s8308_s23 = sphi %s8366_s23, %s10937_s23   ;;  %s8304_s22 = sphi %s8364_s22, %s10936_s22   ;;  %s8300_s21 = sphi %s8362_s21, %s10935_s21  }
   0xa   : > { %p48_p0 = scmp.ne.s32.totalorder %s8304_s22, %s8300_s21  ;;  %p10374_p1 = scmp.eq.s32.totalorder %s8383_s25, 0 }
   0xb   : > { %p135_p2 = scmp.eq.s32.totalorder %s8383_s25, 1  ;;  %p141_p3 = scmp.eq.s32.totalorder %s10373_s26, 1 }
   0xc   : > { %p8394_p4 = por %p10374_p1, %p48_p0  ;;  %p6133_p5 = scmp.ge.s32.totalorder %s8312_s24, 1 }
   0xd   : > { %p8399_p6 = por %p141_p3, %p48_p0  ;;  %p200_p7 = scmp.lt.s32.totalorder %s8312_s24, 3 }
   0xe   : > { %s10563_s27 = scalar_select %p8394_p4, 1, 0 }
   0xf   : > { %s10564_s28 = scalar_select %p8399_p6, 1, 0 }
  0x10   : > { %p8404_p8 = pnand %p6133_p5, %p200_p7  ;;  %s8314_s30 = smov [#allocation5]  }
  0x11   : > { %s212_s7 = sshll.u32 %s8314_s30, 4  ;;  %s8315_s9 = smov [#allocation7]   ;;  %s213_s7 = int_to_ptr.vmem [resolvable:$true] %s212_s7 }
  0x12   : > { %s10565_s29 = scalar_select %p8404_p8, 1, 0 }
  0x13   : > { %p7877_p9 = pneg %p8404_p8  ;;  %s225_s10 = sshll.u32 %s8315_s9, 4  ;;  %s226_s10 = int_to_ptr.vmem [resolvable:$true] %s225_s10 }
  0x14   : > { %s8089_s11 = scalar_lea.vmem %s213_s7, 32768  ;;  %p8097_p5 = scmp.lt.s32.totalorder %s213_s7, %s213_s7 }
  0x15   : > { %p8413_p11 = pnand %p7877_p9, %p10374_p1  ;;  %p8090_p13 = scmp.ne.s32.totalorder %s213_s7, %s8089_s11 }
  0x16   : > { %p8098_p7 = scmp.lt.s32.totalorder %s8089_s11, %s8089_s11 }
  0x17   : > { %p8080_p12 = pneg %p8413_p11 }
  0x18   : > { %p8099_p10 = por %p8098_p7, %p8097_p5 }
  0x19   : > { %p8092_p0 = pnand %p8090_p13, %p8080_p12 }
  0x1b   : > { %p8093_p3 = pneg %p8092_p0 }
  0x1d   : > { %p8100_p9 = pnand %p8099_p10, %p8093_p3 }
  0x1f   : > { %8103 = shalt.err (!%p8100_p9)
}
  0x20   : > { %s10375_s12 = smov 512   ;;  %s10376_s13 = smov 32  }
  0x21   : > { %7880 = dma.hbm_to_vmem [thread:$0]  (!%p8413_p11), %s10367_s1, 32768, %s213_s7, [#allocation6], %s10375_s12, %s10375_s12, %s10376_s13  }
  0x22   : > { %s8115_s16 = scalar_lea.vmem %s226_s10, 4096  ;;  %p8123_p10 = scmp.lt.s32.totalorder %s226_s10, %s226_s10 }
  0x23   : > { %p8116_p13 = scmp.ne.s32.totalorder %s226_s10, %s8115_s16  ;;  %p8124_p3 = scmp.lt.s32.totalorder %s8115_s16, %s8115_s16 }
  0x25   : > { %p8118_p0 = pnand %p8116_p13, %p8080_p12  ;;  %p8125_p7 = por %p8124_p3, %p8123_p10 }
  0x27   : > { %p8119_p5 = pneg %p8118_p0 }
  0x29   : > { %p8126_p9 = pnand %p8125_p7, %p8119_p5 }
  0x2b   : > { %8129 = shalt.err (!%p8126_p9)
}
  0x2c   : > { %s8318_s17 = smov 128   ;;  %s8319_s18 = smov 8  }
  0x2d   : > { %7883 = dma.hbm_to_vmem [thread:$0]  (!%p8413_p11), %s10368_s2, 4096, %s226_s10, [#allocation6], %s8318_s17, %s8318_s17, %s8319_s18  }
  0x2e   : > { %s8320_s30 = smov [#allocation8]   ;;  %s8439_s9 = sadd.s32 1, %s8312_s24  }
  0x2f   : > { %s238_s7 = sshll.u32 %s8320_s30, 4  ;;  %s239_s7 = int_to_ptr.vmem [resolvable:$true] %s238_s7 }
  0x30   : > { %s8141_s11 = scalar_lea.vmem %s239_s7, 4096  ;;  %p8149_p10 = scmp.lt.s32.totalorder %s239_s7, %s239_s7 }
  0x31   : > { %p8142_p13 = scmp.ne.s32.totalorder %s239_s7, %s8141_s11  ;;  %p8150_p3 = scmp.lt.s32.totalorder %s8141_s11, %s8141_s11 }
  0x33   : > { %p8144_p0 = pnand %p8142_p13, %p8080_p12  ;;  %p8151_p7 = por %p8150_p3, %p8149_p10 }
  0x35   : > { %p8145_p5 = pneg %p8144_p0 }
  0x37   : > { %p8152_p9 = pnand %p8151_p7, %p8145_p5 }
  0x39   : > { %8155 = shalt.err (!%p8152_p9)
}
  0x3a   : > { %7886 = dma.hbm_to_vmem [thread:$0]  (!%p8413_p11), %s10369_s3, 4096, %s239_s7, [#allocation9], %s8318_s17, %s8318_s17, %s8319_s18  }
  0x3b   : > { %s32_s15 = ssub.s32 %s8312_s24, %s8439_s9  ;;  %s35_s16 = sadd.s32 1, %s8308_s23 }
  0x3c   : > { %p33_p12 = scmp.eq.s32.totalorder %s32_s15, 0  ;;  %p42_p13 = scmp.ne.s32.totalorder %s8308_s23, %s8304_s22 }
  0x3d   : > { %p43_p0 = scmp.eq.s32.totalorder %s8312_s24, 0  ;;  %p7904_p5 = scmp.lt.s32.totalorder %s8312_s24, 2 }
  0x3e   : > { %s8457_s8 = scalar_select %p33_p12, %s8308_s23, %s35_s16  }
  0x3f   : > { %p44_p10 = por %p43_p0, %p42_p13  ;;  %p8461_p3 = por %p135_p2, %p42_p13 }
  0x40   : > { %s252_s20 = sand.u32 1, %s8308_s23   ;;  %s6832_s30 = sshll.u32 %s8312_s24, 14 }
  0x41   : > { %s10567_s19 = scalar_select %p8461_p3, 1, 0 }
  0x42   : > { %s6138_s11 = sshll.u32 %s252_s20, 10  ;;  %s8470_s17 = scalar_lea.hbm %s10366_s0, %s6832_s30 }
  0x43   : > { %s256_s18 = scalar_lea.vmem [#allocation2], %s6138_s11  ;;  %p8472_p11 = pnand %p7904_p5, %p44_p10 }
  0x44   : > { %s263_s7 = sshll.u32 %s256_s18, 4  ;;  %s8478_s16 = scalar_lea.sflag [#allocation3], %s252_s20  ;;  %s8476_s7 = int_to_ptr.vmem [resolvable:$true] %s263_s7 }
  0x45   : > { %s8156_s26 = scalar_lea.hbm %s8470_s17, 16384  ;;  %p8158_p7 = pneg %p8472_p11 }
  0x46   : > { %p8157_p2 = scmp.ne.s32.totalorder %s8470_s17, %s8156_s26  ;;  %s8161_s11 = scalar_lea.hbm %s10366_s0, 32768 }
  0x47   : > { %p8162_p13 = scmp.lt.s32.totalorder %s8470_s17, %s10366_s0  ;;  %p8163_p0 = scmp.lt.s32.totalorder %s8161_s11, %s8156_s26 }
  0x48   : > { %p8159_p9 = pnand %p8158_p7, %p8157_p2 }
  0x49   : > { %p8164_p5 = por %p8163_p0, %p8162_p13 }
  0x4a   : > { %p8160_p12 = pneg %p8159_p9 }
  0x4c   : > { %p8165_p10 = pnand %p8164_p5, %p8160_p12 }
  0x4e   : > { %8168 = shalt.err (!%p8165_p10)
}
  0x4f   : > { %s8169_s20 = scalar_lea.vmem %s8476_s7, 16384  ;;  %s8321_s12 = smov [#allocation2]  }
  0x50   : > { %p8170_p1 = scmp.ne.s32.totalorder %s8476_s7, %s8169_s20  ;;  %s8174_s13 = sshll.u32 %s8321_s12, 4  ;;  %s8175_s13 = int_to_ptr.vmem [resolvable:$false] %s8174_s13 }
  0x51   : > { %s8176_s30 = scalar_lea.vmem %s8175_s13, 32768  ;;  %p8177_p9 = scmp.lt.s32.totalorder %s8476_s7, %s8175_s13 }
  0x52   : > { %p8172_p6 = pnand %p8170_p1, %p8158_p7  ;;  %p8178_p3 = scmp.lt.s32.totalorder %s8176_s30, %s8169_s20 }
  0x54   : > { %p8173_p2 = pneg %p8172_p6  ;;  %p8179_p4 = por %p8178_p3, %p8177_p9 }
  0x56   : > { %p8180_p8 = pnand %p8179_p4, %p8173_p2 }
  0x58   : > { %8183 = shalt.err (!%p8180_p8)
}
  0x59   : > { %s10569_s26 = smov 32   ;;  %s10570_s14 = smov 512  }
  0x5a   : > { %7890 = dma.hbm_to_vmem [thread:$0]  (!%p8472_p11), %s8470_s17, 16384, %s8476_s7, %s8478_s16, %s10570_s14, %s10570_s14, %s10569_s26  }
  0x5b   : > { %p10571_p1 = scmp.ne.s32.totalorder %s10565_s29, 0 }
  0x5d   : > { %275 = sbr.rel (%p10571_p1) target bundleno = 928 (0x3a0), region = 36 }
  0x62   : > { %s8505_s12 = sand.u32 1, %s8304_s22   ;;  %p10572_p4 = scmp.ne.s32.totalorder %s10563_s27, 0 }
  0x63   : > { %s6142_s13 = sshll.u32 %s8505_s12, 10  ;;  %s278_s11 = scalar_lea.sflag [#allocation3], %s8505_s12 }
  0x64   : > { %s8509_s10 = scalar_lea.vmem [#allocation2], %s6142_s13 }
  0x65   : > { %8279 = dma.done.wait (%p10572_p4), %s278_s11, 16384  }
  0x66   : > { %8281 = vsyncadd (%p10572_p4), %s278_s11, 4294950912  ;;  %p10573_p6 = scmp.eq.s32.totalorder %s8383_s25, 0 }
  0x68   : > { %8283 = dma.done.wait (%p10573_p6), [#allocation6], 36864   ;;  %p10574_p8 = pmov %p10573_p6 }
  0x69   : > { %p10575_p3 = pmov %p10573_p6 }
  0x6a   : > { %8285 = vsyncadd (%p10574_p8), [#allocation6], 4294930432 }
  0x6b   : > { %8287 = dma.done.wait (%p10575_p3), [#allocation9], 4096   ;;  %p10576_p11 = pmov %p10575_p3 }
  0x6c   : > { %v580_v0 = vld [vmem:[#allocation5 + $0x1c0] sm:$0xff]  ;;  %v333_v54 = vld [vmem:[%s8509_s10 + $0x8] sm:$0xff]  ;;  %v335_v59 = vld [vmem:[%s8509_s10 + $0x18] sm:$0xff]  ;;  %s8322_s27 = smov 64   ;;  %s6146_s29 = sshll.u32 %s8505_s12, 9 }
  0x6d   : > { %8289 = vsyncadd (%p10576_p11), [#allocation9], 4294963200  ;;  %v584_v1 = vld [vmem:[#allocation5 + $0x1e0] sm:$0xff]  ;;  %v337_v55 = vld [vmem:[%s8509_s10 + $0x28] sm:$0xff]  ;;  %s9294_s17 = scalar_lea.vmem [#allocation10], %s6146_s29  ;;  %s10557_s7 = sshll.u32 %s8505_s12, 8 }
  0x6e   : > { %v708_v2 = vld [vmem:[#allocation5 + $0x5c0] sm:$0xff]  ;;  %v6206_v3 = vcombine.high %v580_v0, %v584_v1  ;;  %v6205_v5 = vcombine.low %v580_v0, %v584_v1  ;;  %v8525_v58 = vpack.c.bf16 %v337_v55, %v333_v54  ;;  %v339_v60 = vld [vmem:[%s8509_s10 + $0x38] sm:$0xff]  ;;  %s10103_s15 = scalar_lea.vmem [#allocation11], %s10557_s7  ;;  %s7089_s16 = sshll.u32 %s8383_s25, 13 }
  0x6f   : > { %v712_v4 = vld [vmem:[#allocation5 + $0x5e0] sm:$0xff]  ;;  %v8529_v63 = vpack.c.bf16 %v339_v60, %v335_v59  ;;  %s10117_s30 = scalar_lea.hbm %s10370_s4, %s7089_s16  ;;  %s5937_s26 = sshll.u32 %s9294_s17, 4  ;;  %s10120_s26 = int_to_ptr.vmem [resolvable:$true] %s5937_s26 }
  0x70   : > { %v572_v6 = vld [vmem:[#allocation5 + $0x180] sm:$0xff]  ;;  %v6334_v8 = vcombine.high %v708_v2, %v712_v4  ;;  %v6333_v9 = vcombine.low %v708_v2, %v712_v4  ;;  %2060 = vmatprep.subr.bf16.mxu0 %v6206_v3  ;;  %10577 = vst [vmem:[#allocation19_spill] sm:$0xff] %v8525_v58  ;;  %2092 = vmatprep.mubr.bf16.mxu0 %v8525_v58  ;;  %s5914_s14 = scalar_lea.sflag [#allocation4], %s8505_s12  ;;  %s8184_s13 = scalar_lea.vmem %s10120_s26, 8192 }
  0x71   : > { %v576_v7 = vld [vmem:[#allocation5 + $0x1a0] sm:$0xff]  ;;  %2061 = vmatpush1.bf16.msra.mxu0 %v6205_v5  ;;  %10578 = vst [vmem:[#allocation20_spill] sm:$0xff] %v8529_v63  ;;  %2285 = vmatprep.mubr.bf16.mxu1 %v8529_v63  ;;  %p8185_p7 = scmp.ne.s32.totalorder %s10120_s26, %s8184_s13  ;;  %p10904_p12 = scmp.ne.s32.totalorder %s10567_s19, 0 }
  0x72   : > { %v6198_v10 = vcombine.high %v572_v6, %v576_v7  ;;  %v700_v11 = vld [vmem:[#allocation5 + $0x580] sm:$0xff]  ;;  %2253 = vmatprep.subr.bf16.mxu1 %v6334_v8  ;;  %v6197_v18 = vcombine.low %v572_v6, %v576_v7  ;;  %s8323_s11 = smov [#allocation10]  }
  0x73   : > { %v704_v12 = vld [vmem:[#allocation5 + $0x5a0] sm:$0xff]  ;;  %2254 = vmatpush1.bf16.msra.mxu1 %v6333_v9  ;;  %p8186_p13 = pnand %p8185_p7, %p10904_p12 }
  0x74   : > { %v564_v13 = vld [vmem:[#allocation5 + $0x140] sm:$0xff]  ;;  %v6326_v14 = vcombine.high %v700_v11, %v704_v12  ;;  %2062 = vmatprep.subr.bf16.mxu0 %v6198_v10  ;;  %v6325_v19 = vcombine.low %v700_v11, %v704_v12 }
  0x75   : > { %v568_v15 = vld [vmem:[#allocation5 + $0x160] sm:$0xff]  ;;  %2063 = vmatpush1.bf16.msra.mxu0 %v6197_v18  ;;  %p8187_p0 = pneg %p8186_p13 }
  0x76   : > { %v692_v16 = vld [vmem:[#allocation5 + $0x540] sm:$0xff]  ;;  %v6190_v20 = vcombine.high %v564_v13, %v568_v15  ;;  %2255 = vmatprep.subr.bf16.mxu1 %v6326_v14  ;;  %v6189_v26 = vcombine.low %v564_v13, %v568_v15 }
  0x77   : > { %v696_v17 = vld [vmem:[#allocation5 + $0x560] sm:$0xff]  ;;  %2256 = vmatpush1.bf16.msra.mxu1 %v6325_v19 }
  0x78   : > { %v6318_v21 = vcombine.high %v692_v16, %v696_v17  ;;  %v556_v22 = vld [vmem:[#allocation5 + $0x100] sm:$0xff]  ;;  %2064 = vmatprep.subr.bf16.mxu0 %v6190_v20  ;;  %v6317_v27 = vcombine.low %v692_v16, %v696_v17 }
  0x79   : > { %v560_v23 = vld [vmem:[#allocation5 + $0x120] sm:$0xff]  ;;  %2065 = vmatpush1.bf16.msra.mxu0 %v6189_v26 }
  0x7a   : > { %v684_v24 = vld [vmem:[#allocation5 + $0x500] sm:$0xff]  ;;  %v6182_v28 = vcombine.high %v556_v22, %v560_v23  ;;  %2257 = vmatprep.subr.bf16.mxu1 %v6318_v21  ;;  %v6181_v34 = vcombine.low %v556_v22, %v560_v23 }
  0x7b   : > { %v688_v25 = vld [vmem:[#allocation5 + $0x520] sm:$0xff]  ;;  %2258 = vmatpush1.bf16.msra.mxu1 %v6317_v27 }
  0x7c   : > { %v6310_v29 = vcombine.high %v684_v24, %v688_v25  ;;  %v548_v30 = vld [vmem:[#allocation5 + $0xc0] sm:$0xff]  ;;  %2066 = vmatprep.subr.bf16.mxu0 %v6182_v28  ;;  %v6309_v35 = vcombine.low %v684_v24, %v688_v25 }
  0x7d   : > { %v552_v31 = vld [vmem:[#allocation5 + $0xe0] sm:$0xff]  ;;  %2067 = vmatpush1.bf16.msra.mxu0 %v6181_v34 }
  0x7e   : > { %v676_v32 = vld [vmem:[#allocation5 + $0x4c0] sm:$0xff]  ;;  %v6174_v36 = vcombine.high %v548_v30, %v552_v31  ;;  %2259 = vmatprep.subr.bf16.mxu1 %v6310_v29  ;;  %v6173_v42 = vcombine.low %v548_v30, %v552_v31 }
  0x7f   : > { %v680_v33 = vld [vmem:[#allocation5 + $0x4e0] sm:$0xff]  ;;  %2260 = vmatpush1.bf16.msra.mxu1 %v6309_v35 }
  0x80   : > { %v6302_v37 = vcombine.high %v676_v32, %v680_v33  ;;  %v540_v38 = vld [vmem:[#allocation5 + $0x80] sm:$0xff]  ;;  %2068 = vmatprep.subr.bf16.mxu0 %v6174_v36  ;;  %v6301_v43 = vcombine.low %v676_v32, %v680_v33 }
  0x81   : > { %v544_v39 = vld [vmem:[#allocation5 + $0xa0] sm:$0xff]  ;;  %2069 = vmatpush1.bf16.msra.mxu0 %v6173_v42 }
  0x82   : > { %v668_v40 = vld [vmem:[#allocation5 + $0x480] sm:$0xff]  ;;  %v6166_v44 = vcombine.high %v540_v38, %v544_v39  ;;  %2261 = vmatprep.subr.bf16.mxu1 %v6302_v37  ;;  %v6165_v50 = vcombine.low %v540_v38, %v544_v39 }
  0x83   : > { %v672_v41 = vld [vmem:[#allocation5 + $0x4a0] sm:$0xff]  ;;  %2262 = vmatpush1.bf16.msra.mxu1 %v6301_v43 }
  0x84   : > { %v6294_v45 = vcombine.high %v668_v40, %v672_v41  ;;  %v532_v46 = vld [vmem:[#allocation5 + $0x40] sm:$0xff]  ;;  %2070 = vmatprep.subr.bf16.mxu0 %v6166_v44  ;;  %v6293_v51 = vcombine.low %v668_v40, %v672_v41 }
  0x85   : > { %v536_v47 = vld [vmem:[#allocation5 + $0x60] sm:$0xff]  ;;  %2071 = vmatpush1.bf16.msra.mxu0 %v6165_v50 }
  0x86   : > { %v660_v48 = vld [vmem:[#allocation5 + $0x440] sm:$0xff]  ;;  %v6158_v52 = vcombine.high %v532_v46, %v536_v47  ;;  %2263 = vmatprep.subr.bf16.mxu1 %v6294_v45  ;;  %v6157_v0 = vcombine.low %v532_v46, %v536_v47 }
  0x87   : > { %v664_v49 = vld [vmem:[#allocation5 + $0x460] sm:$0xff]  ;;  %2264 = vmatpush1.bf16.msra.mxu1 %v6293_v51 }
  0x88   : > { %v524_v53 = vld [vmem:[#allocation5] sm:$0xff]  ;;  %v6286_v56 = vcombine.high %v660_v48, %v664_v49  ;;  %2072 = vmatprep.subr.bf16.mxu0 %v6158_v52  ;;  %v6285_v1 = vcombine.low %v660_v48, %v664_v49 }
  0x89   : > { %v528_v57 = vld [vmem:[#allocation5 + $0x20] sm:$0xff]  ;;  %2073 = vmatpush1.bf16.msra.mxu0 %v6157_v0 }
  0x8a   : > { %v652_v61 = vld [vmem:[#allocation5 + $0x400] sm:$0xff]  ;;  %v6150_v2 = vcombine.high %v524_v53, %v528_v57  ;;  %2265 = vmatprep.subr.bf16.mxu1 %v6286_v56  ;;  %v6149_v8 = vcombine.low %v524_v53, %v528_v57 }
  0x8b   : > { %v656_v62 = vld [vmem:[#allocation5 + $0x420] sm:$0xff]  ;;  %2266 = vmatpush1.bf16.msra.mxu1 %v6285_v1 }
  0x8c   : > { %v6278_v3 = vcombine.high %v652_v61, %v656_v62  ;;  %v644_v4 = vld [vmem:[#allocation5 + $0x3c0] sm:$0xff]  ;;  %2074 = vmatprep.subr.bf16.mxu0 %v6150_v2  ;;  %v6277_v9 = vcombine.low %v652_v61, %v656_v62 }
  0x8d   : > { %v648_v5 = vld [vmem:[#allocation5 + $0x3e0] sm:$0xff]  ;;  %2075 = vmatpush1.bf16.msra.mxu0 %v6149_v8  ;;  %v709_v8 = vld [vmem:[#allocation5 + $0x5c8] sm:$0xff] }
  0x8e   : > { %v772_v6 = vld [vmem:[#allocation5 + $0x7c0] sm:$0xff]  ;;  %v6270_v10 = vcombine.high %v644_v4, %v648_v5  ;;  %2267 = vmatprep.subr.bf16.mxu1 %v6278_v3  ;;  %v6269_v16 = vcombine.low %v644_v4, %v648_v5 }
  0x8f   : > { %v776_v7 = vld [vmem:[#allocation5 + $0x7e0] sm:$0xff]  ;;  %2268 = vmatpush1.bf16.msra.mxu1 %v6277_v9  ;;  %v713_v9 = vld [vmem:[#allocation5 + $0x5e8] sm:$0xff] }
  0x90   : > { %v6398_v11 = vcombine.high %v772_v6, %v776_v7  ;;  %v636_v12 = vld [vmem:[#allocation5 + $0x380] sm:$0xff]  ;;  %2076 = vmatprep.subr.bf16.mxu0 %v6270_v10  ;;  %v6397_v17 = vcombine.low %v772_v6, %v776_v7  ;;  %v581_v6 = vld [vmem:[#allocation5 + $0x1c8] sm:$0xff] }
  0x91   : > { %v640_v13 = vld [vmem:[#allocation5 + $0x3a0] sm:$0xff]  ;;  %2077 = vmatpush2.bf16.msra.mxu0 %v6269_v16  ;;  %v585_v7 = vld [vmem:[#allocation5 + $0x1e8] sm:$0xff] }
  0x92   : > { %v764_v14 = vld [vmem:[#allocation5 + $0x780] sm:$0xff]  ;;  %v6262_v18 = vcombine.high %v636_v12, %v640_v13  ;;  %2269 = vmatprep.subr.bf16.mxu1 %v6398_v11  ;;  %v6261_v24 = vcombine.low %v636_v12, %v640_v13  ;;  %v6208_v16 = vcombine.high %v581_v6, %v585_v7 }
  0x93   : > { %v768_v15 = vld [vmem:[#allocation5 + $0x7a0] sm:$0xff]  ;;  %2270 = vmatpush2.bf16.msra.mxu1 %v6397_v17  ;;  %v6336_v17 = vcombine.high %v709_v8, %v713_v9 }
  0x94   : > { %v6390_v19 = vcombine.high %v764_v14, %v768_v15  ;;  %v628_v20 = vld [vmem:[#allocation5 + $0x340] sm:$0xff]  ;;  %2078 = vmatprep.subr.bf16.mxu0 %v6262_v18  ;;  %v6389_v25 = vcombine.low %v764_v14, %v768_v15  ;;  %v334_v14 = vld [vmem:[%s8509_s10 + $0x10] sm:$0xff]  ;;  %v341_v18 = vld [vmem:[%s8509_s10 + $0x48] sm:$0xff] }
  0x95   : > { %v632_v21 = vld [vmem:[#allocation5 + $0x360] sm:$0xff]  ;;  %2079 = vmatpush2.bf16.msra.mxu0 %v6261_v24  ;;  %v338_v15 = vld [vmem:[%s8509_s10 + $0x30] sm:$0xff]  ;;  %v577_v24 = vld [vmem:[#allocation5 + $0x1a8] sm:$0xff] }
  0x96   : > { %v756_v22 = vld [vmem:[#allocation5 + $0x740] sm:$0xff]  ;;  %v6254_v26 = vcombine.high %v628_v20, %v632_v21  ;;  %2271 = vmatprep.subr.bf16.mxu1 %v6390_v19  ;;  %v6253_v32 = vcombine.low %v628_v20, %v632_v21  ;;  %v345_v19 = vld [vmem:[%s8509_s10 + $0x68] sm:$0xff]  ;;  %v343_v20 = vld [vmem:[%s8509_s10 + $0x58] sm:$0xff] }
  0x97   : > { %v760_v23 = vld [vmem:[#allocation5 + $0x760] sm:$0xff]  ;;  %2272 = vmatpush2.bf16.msra.mxu1 %v6389_v25  ;;  %v8543_v25 = vpack.c.bf16 %v338_v15, %v334_v14 }
  0x98   : > { %v6382_v27 = vcombine.high %v756_v22, %v760_v23  ;;  %v620_v28 = vld [vmem:[#allocation5 + $0x300] sm:$0xff]  ;;  %2080 = vmatprep.subr.bf16.mxu0 %v6254_v26  ;;  %v6381_v33 = vcombine.low %v756_v22, %v760_v23  ;;  %v347_v22 = vld [vmem:[%s8509_s10 + $0x78] sm:$0xff]  ;;  %v573_v23 = vld [vmem:[#allocation5 + $0x188] sm:$0xff]  ;;  %v6207_v26 = vcombine.low %v581_v6, %v585_v7 }
  0x99   : > { %v624_v29 = vld [vmem:[#allocation5 + $0x320] sm:$0xff]  ;;  %2081 = vmatpush2.bf16.msra.mxu0 %v6253_v32  ;;  %10580 = vst [vmem:[#allocation22_spill] sm:$0xff] %v8543_v25  ;;  %v6200_v32 = vcombine.high %v573_v23, %v577_v24  ;;  %v681_v6 = vld [vmem:[#allocation5 + $0x4e8] sm:$0xff]  ;;  %v354_v7 = vld [vmem:[%s8509_s10 + $0xb0] sm:$0xff] }
  0x9a   : > { %v748_v30 = vld [vmem:[#allocation5 + $0x700] sm:$0xff]  ;;  %v6246_v34 = vcombine.high %v620_v28, %v624_v29  ;;  %2273 = vmatprep.subr.bf16.mxu1 %v6382_v27  ;;  %v6245_v40 = vcombine.low %v620_v28, %v624_v29  ;;  %v701_v27 = vld [vmem:[#allocation5 + $0x588] sm:$0xff]  ;;  %v6335_v29 = vcombine.low %v709_v8, %v713_v9 }
  0x9b   : > { %v752_v31 = vld [vmem:[#allocation5 + $0x720] sm:$0xff]  ;;  %2274 = vmatpush2.bf16.msra.mxu1 %v6381_v33  ;;  %v705_v28 = vld [vmem:[#allocation5 + $0x5a8] sm:$0xff] }
  0x9c   : > { %v6374_v35 = vcombine.high %v748_v30, %v752_v31  ;;  %v612_v36 = vld [vmem:[#allocation5 + $0x2c0] sm:$0xff]  ;;  %2082 = vmatprep.subr.bf16.mxu0 %v6246_v34  ;;  %v6373_v41 = vcombine.low %v748_v30, %v752_v31  ;;  %v8545_v30 = vpack.c.bf16 %v345_v19, %v341_v18  ;;  %v8547_v31 = vpack.c.bf16 %v347_v22, %v343_v20  ;;  %v565_v33 = vld [vmem:[#allocation5 + $0x148] sm:$0xff] }
  0x9d   : > { %v616_v37 = vld [vmem:[#allocation5 + $0x2e0] sm:$0xff]  ;;  %2083 = vmatpush2.bf16.msra.mxu0 %v6245_v40  ;;  %v569_v34 = vld [vmem:[#allocation5 + $0x168] sm:$0xff]  ;;  %v342_v40 = vld [vmem:[%s8509_s10 + $0x50] sm:$0xff] }
  0x9e   : > { %v740_v38 = vld [vmem:[#allocation5 + $0x6c0] sm:$0xff]  ;;  %v6238_v42 = vcombine.high %v612_v36, %v616_v37  ;;  %2275 = vmatprep.subr.bf16.mxu1 %v6374_v35  ;;  %v6237_v48 = vcombine.low %v612_v36, %v616_v37  ;;  %10581 = vst [vmem:[#allocation23_spill] sm:$0xff] %v8545_v30  ;;  %10582 = vst [vmem:[#allocation24_spill] sm:$0xff] %v8547_v31  ;;  %v6328_v35 = vcombine.high %v701_v27, %v705_v28  ;;  %v693_v36 = vld [vmem:[#allocation5 + $0x548] sm:$0xff] }
  0x9f   : > { %v744_v39 = vld [vmem:[#allocation5 + $0x6e0] sm:$0xff]  ;;  %2276 = vmatpush2.bf16.msra.mxu1 %v6373_v41  ;;  %v697_v37 = vld [vmem:[#allocation5 + $0x568] sm:$0xff]  ;;  %v6199_v41 = vcombine.low %v573_v23, %v577_v24 }
  0xa0   : > { %v6366_v43 = vcombine.high %v740_v38, %v744_v39  ;;  %v604_v44 = vld [vmem:[#allocation5 + $0x280] sm:$0xff]  ;;  %2084 = vmatprep.subr.bf16.mxu0 %v6238_v42  ;;  %v6365_v49 = vcombine.low %v740_v38, %v744_v39  ;;  %v346_v42 = vld [vmem:[%s8509_s10 + $0x70] sm:$0xff]  ;;  %v357_v8 = vld [vmem:[%s8509_s10 + $0xc8] sm:$0xff] }
  0xa1   : > { %v608_v45 = vld [vmem:[#allocation5 + $0x2a0] sm:$0xff]  ;;  %2085 = vmatpush2.bf16.msra.mxu0 %v6237_v48  ;;  %v355_v48 = vld [vmem:[%s8509_s10 + $0xb8] sm:$0xff]  ;;  %v361_v9 = vld [vmem:[%s8509_s10 + $0xe8] sm:$0xff] }
  0xa2   : > { %v732_v46 = vld [vmem:[#allocation5 + $0x680] sm:$0xff]  ;;  %v6230_v50 = vcombine.high %v604_v44, %v608_v45  ;;  %2277 = vmatprep.subr.bf16.mxu1 %v6366_v43  ;;  %v6229_v56 = vcombine.low %v604_v44, %v608_v45  ;;  %v6327_v43 = vcombine.low %v701_v27, %v705_v28  ;;  %v349_v44 = vld [vmem:[%s8509_s10 + $0x88] sm:$0xff]  ;;  %v8585_v20 = vpack.c.bf16 %v361_v9, %v357_v8 }
  0xa3   : > { %v736_v47 = vld [vmem:[#allocation5 + $0x6a0] sm:$0xff]  ;;  %2278 = vmatpush2.bf16.msra.mxu1 %v6365_v49  ;;  %v353_v45 = vld [vmem:[%s8509_s10 + $0xa8] sm:$0xff]  ;;  %v6320_v49 = vcombine.high %v693_v36, %v697_v37 }
  0xa4   : > { %v6358_v51 = vcombine.high %v732_v46, %v736_v47  ;;  %v596_v52 = vld [vmem:[#allocation5 + $0x240] sm:$0xff]  ;;  %2086 = vmatprep.subr.bf16.mxu0 %v6230_v50  ;;  %v6357_v57 = vcombine.low %v732_v46, %v736_v47  ;;  %v6192_v46 = vcombine.high %v565_v33, %v569_v34  ;;  %v351_v47 = vld [vmem:[%s8509_s10 + $0x98] sm:$0xff]  ;;  %v545_v18 = vld [vmem:[#allocation5 + $0xa8] sm:$0xff]  ;;  %10588 = vst [vmem:[#allocation30_spill] sm:$0xff] %v8585_v20 }
  0xa5   : > { %v600_v53 = vld [vmem:[#allocation5 + $0x260] sm:$0xff]  ;;  %2087 = vmatpush2.bf16.msra.mxu0 %v6229_v56  ;;  %v689_v56 = vld [vmem:[#allocation5 + $0x528] sm:$0xff] }
  0xa6   : > { %v724_v54 = vld [vmem:[#allocation5 + $0x640] sm:$0xff]  ;;  %v6222_v59 = vcombine.high %v596_v52, %v600_v53  ;;  %2279 = vmatprep.subr.bf16.mxu1 %v6358_v51  ;;  %v6221_v2 = vcombine.low %v596_v52, %v600_v53  ;;  %v557_v51 = vld [vmem:[#allocation5 + $0x108] sm:$0xff]  ;;  %v8563_v53 = vpack.c.bf16 %v346_v42, %v342_v40  ;;  %v367_v42 = vld [vmem:[%s8509_s10 + $0x118] sm:$0xff] }
  0xa7   : > { %v728_v55 = vld [vmem:[#allocation5 + $0x660] sm:$0xff]  ;;  %2280 = vmatpush2.bf16.msra.mxu1 %v6357_v57  ;;  %v561_v52 = vld [vmem:[#allocation5 + $0x128] sm:$0xff]  ;;  %v8567_v57 = vpack.c.bf16 %v355_v48, %v351_v47 }
  0xa8   : > { %v6350_v60 = vcombine.high %v724_v54, %v728_v55  ;;  %v588_v61 = vld [vmem:[#allocation5 + $0x200] sm:$0xff]  ;;  %2088 = vmatprep.subr.bf16.mxu0 %v6222_v59  ;;  %v6349_v3 = vcombine.low %v724_v54, %v728_v55  ;;  %10584 = vst [vmem:[#allocation26_spill] sm:$0xff] %v8563_v53  ;;  %v8565_v54 = vpack.c.bf16 %v353_v45, %v349_v44  ;;  %v685_v55 = vld [vmem:[#allocation5 + $0x508] sm:$0xff]  ;;  %v8600_v44 = vld [vmem:[#allocation5 + $0x1d0] sm:$0xff] }
  0xa9   : > { %v592_v62 = vld [vmem:[#allocation5 + $0x220] sm:$0xff]  ;;  %2089 = vmatpush2.bf16.msra.mxu0 %v6221_v2  ;;  %10586 = vst [vmem:[#allocation28_spill] sm:$0xff] %v8567_v57  ;;  %v6191_v59 = vcombine.low %v565_v33, %v569_v34  ;;  %v549_v2 = vld [vmem:[#allocation5 + $0xc8] sm:$0xff]  ;;  %v358_v33 = vld [vmem:[%s8509_s10 + $0xd0] sm:$0xff] }
  0xaa   : > { %v716_v0 = vld [vmem:[#allocation5 + $0x600] sm:$0xff]  ;;  %v6214_v4 = vcombine.high %v588_v61, %v592_v62  ;;  %2281 = vmatprep.subr.bf16.mxu1 %v6350_v60  ;;  %v6213_v10 = vcombine.low %v588_v61, %v592_v62  ;;  %10585 = vst [vmem:[#allocation27_spill] sm:$0xff] %v8565_v54  ;;  %v6319_v61 = vcombine.low %v693_v36, %v697_v37  ;;  %v669_v22 = vld [vmem:[#allocation5 + $0x488] sm:$0xff]  ;;  %v362_v34 = vld [vmem:[%s8509_s10 + $0xf0] sm:$0xff] }
  0xab   : > { %v720_v1 = vld [vmem:[#allocation5 + $0x620] sm:$0xff]  ;;  %2282 = vmatpush2.bf16.msra.mxu1 %v6349_v3  ;;  %v6184_v62 = vcombine.high %v557_v51, %v561_v52  ;;  %v553_v3 = vld [vmem:[#allocation5 + $0xe8] sm:$0xff]  ;;  %v8602_v45 = vld [vmem:[#allocation5 + $0x1f0] sm:$0xff] }
  0xac   : > { %v6342_v5 = vcombine.high %v716_v0, %v720_v1  ;;  %v332_v11 = vld [vmem:[%s8509_s10] sm:$0xff]  ;;  %2090 = vmatprep.subr.bf16.mxu0 %v6214_v4  ;;  %v6341_v13 = vcombine.low %v716_v0, %v720_v1  ;;  %v6312_v1 = vcombine.high %v685_v55, %v689_v56  ;;  %v350_v4 = vld [vmem:[%s8509_s10 + $0x90] sm:$0xff]  ;;  %v6176_v14 = vcombine.high %v549_v2, %v553_v3  ;;  %v673_v23 = vld [vmem:[#allocation5 + $0x4a8] sm:$0xff] }
  0xad   : > { %v336_v12 = vld [vmem:[%s8509_s10 + $0x20] sm:$0xff]  ;;  %2091 = vmatpush2.bf16.msra.mxu0 %v6213_v10  ;;  %v6183_v10 = vcombine.low %v557_v51, %v561_v52  ;;  %v8583_v19 = vpack.c.bf16 %v354_v7, %v350_v4  ;;  %v6296_v36 = vcombine.high %v669_v22, %v673_v23  ;;  %v533_v37 = vld [vmem:[#allocation5 + $0x48] sm:$0xff]  ;;  %v6295_v47 = vcombine.low %v669_v22, %v673_v23  ;;  %v8607_v51 = vld [vmem:[#allocation5 + $0x5d0] sm:$0xff] }
  0xae   : > { %2283 = vmatprep.subr.bf16.mxu1 %v6342_v5  ;;  %v8540_v21 = vpack.c.bf16 %v336_v12, %v332_v11  ;;  %2446 = vmatprep.subr.bf16.mxu0 %v6208_v16  ;;  %v340_v38 = vld [vmem:[%s8509_s10 + $0x40] sm:$0xff]  ;;  %v677_v5 = vld [vmem:[#allocation5 + $0x4c8] sm:$0xff]  ;;  %v359_v11 = vld [vmem:[%s8509_s10 + $0xd8] sm:$0xff] }
  0xaf   : > { %2284 = vmatpush2.bf16.msra.mxu1 %v6341_v13  ;;  %v344_v39 = vld [vmem:[%s8509_s10 + $0x60] sm:$0xff]  ;;  %v363_v12 = vld [vmem:[%s8509_s10 + $0xf8] sm:$0xff]  ;;  %v6311_v13 = vcombine.low %v685_v55, %v689_v56  ;;  %v6304_v16 = vcombine.high %v677_v5, %v681_v6  ;;  %10587 = vst [vmem:[#allocation29_spill] sm:$0xff] %v8583_v19  ;;  %v661_v40 = vld [vmem:[#allocation5 + $0x448] sm:$0xff] }
  0xb0   : > { %10579 = vst [vmem:[#allocation21_spill] sm:$0xff] %v8540_v21  ;;  %2639 = vmatprep.subr.bf16.mxu1 %v6336_v17  ;;  %2093 = vmatmul.mubr.bf16.vlgmr.msra.gmra.mxu0 %v8540_v21  ;;  %v8561_v50 = vpack.c.bf16 %v344_v39, %v340_v38  ;;  %v348_v60 = vld [vmem:[%s8509_s10 + $0x80] sm:$0xff]  ;;  %v541_v17 = vld [vmem:[#allocation5 + $0x88] sm:$0xff]  ;;  %v8587_v24 = vpack.c.bf16 %v363_v12, %v359_v11  ;;  %v8609_v52 = vld [vmem:[#allocation5 + $0x5f0] sm:$0xff] }
  0xb1   : > { %2447 = vmatpush1.bf16.msra.mxu0 %v6207_v26  ;;  %2102 = vmatprep.mubr.bf16.mxu0 %v8545_v30  ;;  %v352_v0 = vld [vmem:[%s8509_s10 + $0xa0] sm:$0xff]  ;;  %v6175_v26 = vcombine.low %v549_v2, %v553_v3  ;;  %v537_v38 = vld [vmem:[#allocation5 + $0x68] sm:$0xff]  ;;  %v366_v12 = vld [vmem:[%s8509_s10 + $0x110] sm:$0xff] }
  0xb2   : > { %2286 = vmatmul.mubr.bf16.vlgmr.msra.gmra.mxu1 %v8543_v25  ;;  %2448 = vmatprep.subr.bf16.mxu0 %v6200_v32  ;;  %10583 = vst [vmem:[#allocation25_spill] sm:$0xff] %v8561_v50  ;;  %v8581_v15 = vpack.c.bf16 %v352_v0, %v348_v60  ;;  %10589 = vst [vmem:[#allocation31_spill] sm:$0xff] %v8587_v24  ;;  %v356_v27 = vld [vmem:[%s8509_s10 + $0xc0] sm:$0xff]  ;;  %v6168_v32 = vcombine.high %v541_v17, %v545_v18  ;;  %v369_v39 = vld [vmem:[%s8509_s10 + $0x128] sm:$0xff] }
  0xb3   : > { %2640 = vmatpush1.bf16.msra.mxu1 %v6335_v29  ;;  %2295 = vmatprep.mubr.bf16.mxu1 %v8547_v31  ;;  %v360_v28 = vld [vmem:[%s8509_s10 + $0xe0] sm:$0xff]  ;;  %v6303_v29 = vcombine.low %v677_v5, %v681_v6  ;;  %v6160_v48 = vcombine.high %v533_v37, %v537_v38  ;;  %v529_v60 = vld [vmem:[#allocation5 + $0x28] sm:$0xff]  ;;  %v6159_v4 = vcombine.low %v533_v37, %v537_v38  ;;  %v375_v23 = vld [vmem:[%s8509_s10 + $0x158] sm:$0xff] }
  0xb4   : > { %2641 = vmatprep.subr.bf16.mxu1 %v6328_v35  ;;  %v365_v35 = vld [vmem:[%s8509_s10 + $0x108] sm:$0xff]  ;;  %v8611_v55 = vpack.c.bf16 %v360_v28, %v356_v27  ;;  %v364_v5 = vld [vmem:[%s8509_s10 + $0x100] sm:$0xff] }
  0xb5   : > { %2449 = vmatpush1.bf16.msra.mxu0 %v6199_v41  ;;  %v665_v41 = vld [vmem:[#allocation5 + $0x468] sm:$0xff]  ;;  %v8617_v0 = vpack.c.bf16 %v369_v39, %v365_v35  ;;  %v368_v8 = vld [vmem:[%s8509_s10 + $0x120] sm:$0xff] }
  0xb6   : > { %2450 = vmatprep.subr.bf16.mxu0 %v6192_v46  ;;  %v371_v46 = vld [vmem:[%s8509_s10 + $0x138] sm:$0xff]  ;;  %10590 = vst [vmem:[#allocation32_spill] sm:$0xff] %v8611_v55  ;;  %v6288_v56 = vcombine.high %v661_v40, %v665_v41  ;;  %v657_v2 = vld [vmem:[#allocation5 + $0x428] sm:$0xff]  ;;  %v6287_v6 = vcombine.low %v661_v40, %v665_v41  ;;  %v372_v41 = vld [vmem:[%s8509_s10 + $0x140] sm:$0xff] }
  0xb7   : > { %2642 = vmatpush1.bf16.msra.mxu1 %v6327_v43  ;;  %v6167_v43 = vcombine.low %v541_v17, %v545_v18  ;;  %10592 = vst [vmem:[#allocation34_spill] sm:$0xff] %v8617_v0  ;;  %v8619_v3 = vpack.c.bf16 %v371_v46, %v367_v42  ;;  %v649_v11 = vld [vmem:[#allocation5 + $0x3e8] sm:$0xff]  ;;  %v376_v46 = vld [vmem:[%s8509_s10 + $0x160] sm:$0xff] }
  0xb8   : > { %2643 = vmatprep.subr.bf16.mxu1 %v6320_v49  ;;  %2103 = vmatmul.mubr.bf16.gmra.mxu0 %v8561_v50  ;;  %v373_v17 = vld [vmem:[%s8509_s10 + $0x148] sm:$0xff]  ;;  %v432_v49 = vld [vmem:[%s8509_s10 + $0x320] sm:$0xff] }
  0xb9   : > { %2112 = vmatprep.mubr.bf16.mxu0 %v8565_v54  ;;  %2451 = vmatpush1.bf16.msra.mxu0 %v6191_v59  ;;  %v525_v59 = vld [vmem:[#allocation5 + $0x8] sm:$0xff]  ;;  %10593 = vst [vmem:[#allocation35_spill] sm:$0xff] %v8619_v3 }
  0xba   : > { %2296 = vmatmul.mubr.bf16.gmra.mxu1 %v8563_v53  ;;  %2452 = vmatprep.subr.bf16.mxu0 %v6184_v62  ;;  %v8615_v62 = vpack.c.bf16 %v362_v34, %v358_v33  ;;  %v6152_v7 = vcombine.high %v525_v59, %v529_v60  ;;  %v377_v18 = vld [vmem:[%s8509_s10 + $0x168] sm:$0xff]  ;;  %v6151_v22 = vcombine.low %v525_v59, %v529_v60  ;;  %v374_v59 = vld [vmem:[%s8509_s10 + $0x150] sm:$0xff] }
  0xbb   : > { %2305 = vmatprep.mubr.bf16.mxu1 %v8567_v57  ;;  %2644 = vmatpush1.bf16.msra.mxu1 %v6319_v61  ;;  %v637_v33 = vld [vmem:[#allocation5 + $0x388] sm:$0xff] }
  0xbc   : > { %2645 = vmatprep.subr.bf16.mxu1 %v6312_v1  ;;  %10591 = vst [vmem:[#allocation33_spill] sm:$0xff] %v8615_v62  ;;  %v653_v1 = vld [vmem:[#allocation5 + $0x408] sm:$0xff] }
  0xbd   : > { %2453 = vmatpush1.bf16.msra.mxu0 %v6183_v10  ;;  %v6280_v9 = vcombine.high %v653_v1, %v657_v2  ;;  %v645_v10 = vld [vmem:[#allocation5 + $0x3c8] sm:$0xff]  ;;  %v6279_v27 = vcombine.low %v653_v1, %v657_v2  ;;  %v378_v2 = vld [vmem:[%s8509_s10 + $0x170] sm:$0xff] }
  0xbe   : > { %2454 = vmatprep.subr.bf16.mxu0 %v6176_v14  ;;  %v777_v14 = vld [vmem:[#allocation5 + $0x7e8] sm:$0xff]  ;;  %v6272_v28 = vcombine.high %v645_v10, %v649_v11  ;;  %v6271_v40 = vcombine.low %v645_v10, %v649_v11  ;;  %v8653_v11 = vpack.c.bf16 %v376_v46, %v372_v41 }
  0xbf   : > { %2646 = vmatpush1.bf16.msra.mxu1 %v6311_v13  ;;  %v773_v13 = vld [vmem:[#allocation5 + $0x7c8] sm:$0xff] }
  0xc0   : > { %2113 = vmatmul.mubr.bf16.gmra.mxu0 %v8581_v15  ;;  %2647 = vmatprep.subr.bf16.mxu1 %v6304_v16  ;;  %v370_v16 = vld [vmem:[%s8509_s10 + $0x130] sm:$0xff]  ;;  %v641_v34 = vld [vmem:[#allocation5 + $0x3a8] sm:$0xff]  ;;  %v6399_v42 = vcombine.low %v773_v13, %v777_v14  ;;  %10597 = vst [vmem:[#allocation39_spill] sm:$0xff] %v8653_v11 }
  0xc1   : > { %2122 = vmatprep.mubr.bf16.mxu0 %v8585_v20  ;;  %2455 = vmatpush1.bf16.msra.mxu0 %v6175_v26  ;;  %v379_v26 = vld [vmem:[%s8509_s10 + $0x178] sm:$0xff]  ;;  %v8635_v35 = vpack.c.bf16 %v370_v16, %v366_v12  ;;  %v765_v37 = vld [vmem:[#allocation5 + $0x788] sm:$0xff]  ;;  %v8655_v16 = vpack.c.bf16 %v378_v2, %v374_v59 }
  0xc2   : > { %2306 = vmatmul.mubr.bf16.gmra.mxu1 %v8583_v19  ;;  %2456 = vmatprep.subr.bf16.mxu0 %v6168_v32  ;;  %v6400_v32 = vcombine.high %v773_v13, %v777_v14  ;;  %v769_v38 = vld [vmem:[#allocation5 + $0x7a8] sm:$0xff]  ;;  %v8639_v39 = vpack.c.bf16 %v379_v26, %v375_v23  ;;  %v395_v59 = vld [vmem:[%s8509_s10 + $0x1f8] sm:$0xff] }
  0xc3   : > { %2315 = vmatprep.mubr.bf16.mxu1 %v8587_v24  ;;  %2648 = vmatpush1.bf16.msra.mxu1 %v6303_v29  ;;  %v8633_v29 = vpack.c.bf16 %v368_v8, %v364_v5  ;;  %10594 = vst [vmem:[#allocation36_spill] sm:$0xff] %v8635_v35  ;;  %v757_v60 = vld [vmem:[#allocation5 + $0x748] sm:$0xff]  ;;  %v387_v8 = vld [vmem:[%s8509_s10 + $0x1b8] sm:$0xff]  ;;  %10598 = vst [vmem:[#allocation40_spill] sm:$0xff] %v8655_v16 }
  0xc4   : > { %2649 = vmatprep.subr.bf16.mxu1 %v6296_v36  ;;  %v8637_v36 = vpack.c.bf16 %v377_v18, %v373_v17  ;;  %10596 = vst [vmem:[#allocation38_spill] sm:$0xff] %v8639_v39  ;;  %v761_v1 = vld [vmem:[#allocation5 + $0x768] sm:$0xff] }
  0xc5   : > { %2457 = vmatpush1.bf16.msra.mxu0 %v6167_v43  ;;  %v6264_v43 = vcombine.high %v637_v33, %v641_v34  ;;  %v385_v5 = vld [vmem:[%s8509_s10 + $0x1a8] sm:$0xff]  ;;  %v6384_v12 = vcombine.high %v757_v60, %v761_v1 }
  0xc6   : > { %2458 = vmatprep.subr.bf16.mxu0 %v6160_v48  ;;  %10595 = vst [vmem:[#allocation37_spill] sm:$0xff] %v8637_v36  ;;  %v629_v48 = vld [vmem:[#allocation5 + $0x348] sm:$0xff] }
  0xc7   : > { %2650 = vmatpush1.bf16.msra.mxu1 %v6295_v47  ;;  %v6392_v47 = vcombine.high %v765_v37, %v769_v38  ;;  %v621_v13 = vld [vmem:[#allocation5 + $0x308] sm:$0xff] }
  0xc8   : > { %2123 = vmatmul.mubr.bf16.gmra.mxu0 %v8611_v55  ;;  %2651 = vmatprep.subr.bf16.mxu1 %v6288_v56  ;;  %v633_v56 = vld [vmem:[#allocation5 + $0x368] sm:$0xff] }
  0xc9   : > { %2132 = vmatprep.mubr.bf16.mxu0 %v8617_v0  ;;  %2459 = vmatpush1.bf16.msra.mxu0 %v6159_v4  ;;  %v381_v4 = vld [vmem:[%s8509_s10 + $0x188] sm:$0xff]  ;;  %v6256_v10 = vcombine.high %v629_v48, %v633_v56  ;;  %v6255_v26 = vcombine.low %v629_v48, %v633_v56  ;;  %v391_v56 = vld [vmem:[%s8509_s10 + $0x1d8] sm:$0xff] }
  0xca   : > { %2316 = vmatmul.mubr.bf16.gmra.mxu1 %v8615_v62  ;;  %2460 = vmatprep.subr.bf16.mxu0 %v6152_v7  ;;  %v383_v7 = vld [vmem:[%s8509_s10 + $0x198] sm:$0xff]  ;;  %v625_v14 = vld [vmem:[#allocation5 + $0x328] sm:$0xff]  ;;  %v8657_v17 = vpack.c.bf16 %v385_v5, %v381_v4 }
  0xcb   : > { %2325 = vmatprep.mubr.bf16.mxu1 %v8619_v3  ;;  %2652 = vmatpush1.bf16.msra.mxu1 %v6287_v6  ;;  %v6263_v6 = vcombine.low %v637_v33, %v641_v34  ;;  %v749_v18 = vld [vmem:[#allocation5 + $0x708] sm:$0xff]  ;;  %v8659_v23 = vpack.c.bf16 %v387_v8, %v383_v7  ;;  %v384_v33 = vld [vmem:[%s8509_s10 + $0x1a0] sm:$0xff]  ;;  %v6247_v48 = vcombine.low %v621_v13, %v625_v14 }
  0xcc   : > { %2653 = vmatprep.subr.bf16.mxu1 %v6280_v9  ;;  %v6391_v9 = vcombine.low %v765_v37, %v769_v38  ;;  %10599 = vst [vmem:[#allocation41_spill] sm:$0xff] %v8657_v17  ;;  %v613_v37 = vld [vmem:[#allocation5 + $0x2c8] sm:$0xff] }
  0xcd   : > { %2461 = vmatpush1.bf16.msra.mxu0 %v6151_v22  ;;  %v753_v22 = vld [vmem:[#allocation5 + $0x728] sm:$0xff]  ;;  %10600 = vst [vmem:[#allocation42_spill] sm:$0xff] %v8659_v23 }
  0xce   : > { %2462 = vmatprep.subr.bf16.mxu0 %v6272_v28  ;;  %v6383_v28 = vcombine.low %v757_v60, %v761_v1  ;;  %v6376_v34 = vcombine.high %v749_v18, %v753_v22  ;;  %v617_v38 = vld [vmem:[#allocation5 + $0x2e8] sm:$0xff]  ;;  %v6375_v60 = vcombine.low %v749_v18, %v753_v22 }
  0xcf   : > { %2654 = vmatpush1.bf16.msra.mxu1 %v6279_v27  ;;  %v380_v27 = vld [vmem:[%s8509_s10 + $0x180] sm:$0xff]  ;;  %v741_v41 = vld [vmem:[#allocation5 + $0x6c8] sm:$0xff]  ;;  %v6240_v1 = vcombine.high %v613_v37, %v617_v38 }
  0xd0   : > { %2133 = vmatmul.mubr.bf16.gmra.mxu0 %v8633_v29  ;;  %2655 = vmatprep.subr.bf16.mxu1 %v6400_v32  ;;  %v6248_v32 = vcombine.high %v621_v13, %v625_v14  ;;  %v389_v46 = vld [vmem:[%s8509_s10 + $0x1c8] sm:$0xff]  ;;  %v8673_v2 = vpack.c.bf16 %v384_v33, %v380_v27  ;;  %v6239_v13 = vcombine.low %v613_v37, %v617_v38  ;;  %v388_v14 = vld [vmem:[%s8509_s10 + $0x1c0] sm:$0xff]  ;;  %v390_v33 = vld [vmem:[%s8509_s10 + $0x1d0] sm:$0xff] }
  0xd1   : > { %2142 = vmatprep.mubr.bf16.mxu0 %v8637_v36  ;;  %2463 = vmatpush2.bf16.msra.mxu0 %v6271_v40  ;;  %v382_v40 = vld [vmem:[%s8509_s10 + $0x190] sm:$0xff]  ;;  %v605_v5 = vld [vmem:[#allocation5 + $0x288] sm:$0xff] }
  0xd2   : > { %2326 = vmatmul.mubr.bf16.gmra.mxu1 %v8635_v35  ;;  %2464 = vmatprep.subr.bf16.mxu0 %v6264_v43  ;;  %v386_v43 = vld [vmem:[%s8509_s10 + $0x1b0] sm:$0xff]  ;;  %10601 = vst [vmem:[#allocation43_spill] sm:$0xff] %v8673_v2  ;;  %v729_v37 = vld [vmem:[#allocation5 + $0x668] sm:$0xff] }
  0xd3   : > { %2335 = vmatprep.mubr.bf16.mxu1 %v8639_v39  ;;  %2656 = vmatpush2.bf16.msra.mxu1 %v6399_v42  ;;  %v745_v42 = vld [vmem:[#allocation5 + $0x6e8] sm:$0xff]  ;;  %v8675_v7 = vpack.c.bf16 %v386_v43, %v382_v40  ;;  %v394_v38 = vld [vmem:[%s8509_s10 + $0x1f0] sm:$0xff]  ;;  %v399_v43 = vld [vmem:[%s8509_s10 + $0x218] sm:$0xff] }
  0xd4   : > { %2657 = vmatprep.subr.bf16.mxu1 %v6392_v47  ;;  %v393_v47 = vld [vmem:[%s8509_s10 + $0x1e8] sm:$0xff]  ;;  %v6368_v4 = vcombine.high %v741_v41, %v745_v42  ;;  %v6367_v18 = vcombine.low %v741_v41, %v745_v42 }
  0xd5   : > { %2465 = vmatpush2.bf16.msra.mxu0 %v6263_v6  ;;  %v609_v6 = vld [vmem:[#allocation5 + $0x2a8] sm:$0xff]  ;;  %10602 = vst [vmem:[#allocation44_spill] sm:$0xff] %v8675_v7  ;;  %v8677_v8 = vpack.c.bf16 %v393_v47, %v389_v46  ;;  %v403_v46 = vld [vmem:[%s8509_s10 + $0x238] sm:$0xff] }
  0xd6   : > { %2466 = vmatprep.subr.bf16.mxu0 %v6256_v10  ;;  %v737_v10 = vld [vmem:[#allocation5 + $0x6a8] sm:$0xff]  ;;  %v6232_v22 = vcombine.high %v605_v5, %v609_v6  ;;  %v6231_v42 = vcombine.low %v605_v5, %v609_v6  ;;  %v8699_v6 = vpack.c.bf16 %v403_v46, %v399_v43  ;;  %v6338_v43 = vcombine.high %v8607_v51, %v8609_v52 }
  0xd7   : > { %2658 = vmatpush2.bf16.msra.mxu1 %v6391_v9  ;;  %10603 = vst [vmem:[#allocation45_spill] sm:$0xff] %v8677_v8  ;;  %v733_v9 = vld [vmem:[#allocation5 + $0x688] sm:$0xff] }
  0xd8   : > { %2143 = vmatmul.mubr.bf16.gmra.mxu0 %v8653_v11  ;;  %2659 = vmatprep.subr.bf16.mxu1 %v6384_v12  ;;  %v8679_v12 = vpack.c.bf16 %v395_v59, %v391_v56  ;;  %v6360_v27 = vcombine.high %v733_v9, %v737_v10  ;;  %v397_v40 = vld [vmem:[%s8509_s10 + $0x208] sm:$0xff]  ;;  %v6359_v47 = vcombine.low %v733_v9, %v737_v10 }
  0xd9   : > { %2152 = vmatprep.mubr.bf16.mxu0 %v8657_v17  ;;  %2467 = vmatpush2.bf16.msra.mxu0 %v6255_v26  ;;  %v392_v26 = vld [vmem:[%s8509_s10 + $0x1e0] sm:$0xff]  ;;  %v401_v41 = vld [vmem:[%s8509_s10 + $0x228] sm:$0xff]  ;;  %10608 = vst [vmem:[#allocation50_spill] sm:$0xff] %v8699_v6 }
  0xda   : > { %2336 = vmatmul.mubr.bf16.gmra.mxu1 %v8655_v16  ;;  %2468 = vmatprep.subr.bf16.mxu0 %v6248_v32  ;;  %10604 = vst [vmem:[#allocation46_spill] sm:$0xff] %v8679_v12  ;;  %v601_v32 = vld [vmem:[#allocation5 + $0x268] sm:$0xff]  ;;  %v8693_v56 = vpack.c.bf16 %v392_v26, %v388_v14  ;;  %v8697_v61 = vpack.c.bf16 %v401_v41, %v397_v40  ;;  %v400_v26 = vld [vmem:[%s8509_s10 + $0x220] sm:$0xff] }
  0xdb   : > { %2345 = vmatprep.mubr.bf16.mxu1 %v8659_v23  ;;  %2660 = vmatpush2.bf16.msra.mxu1 %v6383_v28  ;;  %v597_v28 = vld [vmem:[#allocation5 + $0x248] sm:$0xff]  ;;  %v6210_v41 = vcombine.high %v8600_v44, %v8602_v45 }
  0xdc   : > { %2661 = vmatprep.subr.bf16.mxu1 %v6376_v34  ;;  %v725_v34 = vld [vmem:[#allocation5 + $0x648] sm:$0xff]  ;;  %10605 = vst [vmem:[#allocation47_spill] sm:$0xff] %v8693_v56  ;;  %10607 = vst [vmem:[#allocation49_spill] sm:$0xff] %v8697_v61  ;;  %v6223_v9 = vcombine.low %v597_v28, %v601_v32 }
  0xdd   : > { %2469 = vmatpush2.bf16.msra.mxu0 %v6247_v48  ;;  %v6224_v48 = vcombine.high %v597_v28, %v601_v32  ;;  %v6352_v59 = vcombine.high %v725_v34, %v729_v37  ;;  %v721_v5 = vld [vmem:[#allocation5 + $0x628] sm:$0xff]  ;;  %v6351_v10 = vcombine.low %v725_v34, %v729_v37  ;;  %v402_v28 = vld [vmem:[%s8509_s10 + $0x230] sm:$0xff]  ;;  %v407_v37 = vld [vmem:[%s8509_s10 + $0x258] sm:$0xff] }
  0xde   : > { %2470 = vmatprep.subr.bf16.mxu0 %v6240_v1  ;;  %v593_v1 = vld [vmem:[#allocation5 + $0x228] sm:$0xff] }
  0xdf   : > { %2662 = vmatpush2.bf16.msra.mxu1 %v6375_v60  ;;  %v589_v60 = vld [vmem:[#allocation5 + $0x208] sm:$0xff] }
  0xe0   : > { %2153 = vmatmul.mubr.bf16.gmra.mxu0 %v8673_v2  ;;  %2663 = vmatprep.subr.bf16.mxu1 %v6368_v4  ;;  %v8695_v4 = vpack.c.bf16 %v394_v38, %v390_v33  ;;  %v6216_v14 = vcombine.high %v589_v60, %v593_v1  ;;  %v405_v32 = vld [vmem:[%s8509_s10 + $0x248] sm:$0xff]  ;;  %v6215_v34 = vcombine.low %v589_v60, %v593_v1  ;;  %v411_v38 = vld [vmem:[%s8509_s10 + $0x278] sm:$0xff]  ;;  %v408_v60 = vld [vmem:[%s8509_s10 + $0x260] sm:$0xff] }
  0xe1   : > { %2162 = vmatprep.mubr.bf16.mxu0 %v8677_v8  ;;  %2471 = vmatpush2.bf16.msra.mxu0 %v6239_v13  ;;  %v717_v13 = vld [vmem:[#allocation5 + $0x608] sm:$0xff]  ;;  %v406_v1 = vld [vmem:[%s8509_s10 + $0x250] sm:$0xff] }
  0xe2   : > { %2346 = vmatmul.mubr.bf16.gmra.mxu1 %v8675_v7  ;;  %2472 = vmatprep.subr.bf16.mxu0 %v6232_v22  ;;  %10606 = vst [vmem:[#allocation48_spill] sm:$0xff] %v8695_v4  ;;  %v396_v22 = vld [vmem:[%s8509_s10 + $0x200] sm:$0xff]  ;;  %v409_v33 = vld [vmem:[%s8509_s10 + $0x268] sm:$0xff]  ;;  %v6343_v40 = vcombine.low %v717_v13, %v721_v5 }
  0xe3   : > { %2355 = vmatprep.mubr.bf16.mxu1 %v8679_v12  ;;  %2664 = vmatpush2.bf16.msra.mxu1 %v6367_v18  ;;  %v6344_v18 = vcombine.high %v717_v13, %v721_v5  ;;  %v410_v13 = vld [vmem:[%s8509_s10 + $0x270] sm:$0xff]  ;;  %v413_v5 = vld [vmem:[%s8509_s10 + $0x288] sm:$0xff] }
  0xe4   : > { %2665 = vmatprep.subr.bf16.mxu1 %v6360_v27  ;;  %v398_v27 = vld [vmem:[%s8509_s10 + $0x210] sm:$0xff] }
  0xe5   : > { %2473 = vmatpush2.bf16.msra.mxu0 %v6231_v42  ;;  %v8715_v42 = vpack.c.bf16 %v400_v26, %v396_v22  ;;  %v8719_v46 = vpack.c.bf16 %v402_v28, %v398_v27  ;;  %v8739_v22 = vpack.c.bf16 %v410_v13, %v406_v1  ;;  %v412_v28 = vld [vmem:[%s8509_s10 + $0x280] sm:$0xff] }
  0xe6   : > { %2474 = vmatprep.subr.bf16.mxu0 %v6224_v48  ;;  %v8723_v48 = vpack.c.bf16 %v411_v38, %v407_v37  ;;  %v421_v37 = vld [vmem:[%s8509_s10 + $0x2c8] sm:$0xff]  ;;  %v420_v13 = vld [vmem:[%s8509_s10 + $0x2c0] sm:$0xff] }
  0xe7   : > { %2666 = vmatpush2.bf16.msra.mxu1 %v6359_v47  ;;  %10609 = vst [vmem:[#allocation51_spill] sm:$0xff] %v8715_v42  ;;  %10610 = vst [vmem:[#allocation52_spill] sm:$0xff] %v8719_v46  ;;  %v8721_v47 = vpack.c.bf16 %v409_v33, %v405_v32  ;;  %v416_v32 = vld [vmem:[%s8509_s10 + $0x2a0] sm:$0xff]  ;;  %v414_v33 = vld [vmem:[%s8509_s10 + $0x290] sm:$0xff] }
  0xe8   : > { %2163 = vmatmul.mubr.bf16.gmra.mxu0 %v8693_v56  ;;  %2667 = vmatprep.subr.bf16.mxu1 %v6352_v59  ;;  %10612 = vst [vmem:[#allocation54_spill] sm:$0xff] %v8723_v48  ;;  %v404_v59 = vld [vmem:[%s8509_s10 + $0x240] sm:$0xff]  ;;  %10614 = vst [vmem:[#allocation56_spill] sm:$0xff] %v8739_v22  ;;  %v425_v38 = vld [vmem:[%s8509_s10 + $0x2e8] sm:$0xff] }
  0xe9   : > { %2172 = vmatprep.mubr.bf16.mxu0 %v8697_v61  ;;  %2475 = vmatpush2.bf16.msra.mxu0 %v6223_v9  ;;  %10611 = vst [vmem:[#allocation53_spill] sm:$0xff] %v8721_v47  ;;  %v417_v9 = vld [vmem:[%s8509_s10 + $0x2a8] sm:$0xff] }
  0xea   : > { %2356 = vmatmul.mubr.bf16.gmra.mxu1 %v8695_v4  ;;  %2476 = vmatprep.subr.bf16.mxu0 %v6216_v14  ;;  %v419_v14 = vld [vmem:[%s8509_s10 + $0x2b8] sm:$0xff]  ;;  %v8741_v26 = vpack.c.bf16 %v417_v9, %v413_v5  ;;  %v424_v5 = vld [vmem:[%s8509_s10 + $0x2e0] sm:$0xff]  ;;  %v422_v9 = vld [vmem:[%s8509_s10 + $0x2d0] sm:$0xff] }
  0xeb   : > { %2365 = vmatprep.mubr.bf16.mxu1 %v8699_v6  ;;  %2668 = vmatpush2.bf16.msra.mxu1 %v6351_v10  ;;  %v415_v10 = vld [vmem:[%s8509_s10 + $0x298] sm:$0xff] }
  0xec   : > { %2669 = vmatprep.subr.bf16.mxu1 %v6344_v18  ;;  %v8737_v18 = vpack.c.bf16 %v408_v60, %v404_v59  ;;  %10615 = vst [vmem:[#allocation57_spill] sm:$0xff] %v8741_v26  ;;  %v8743_v27 = vpack.c.bf16 %v419_v14, %v415_v10  ;;  %v8761_v60 = vpack.c.bf16 %v425_v38, %v421_v37  ;;  %v426_v10 = vld [vmem:[%s8509_s10 + $0x2f0] sm:$0xff]  ;;  %v429_v14 = vld [vmem:[%s8509_s10 + $0x308] sm:$0xff] }
  0xed   : > { %2477 = vmatpush2.bf16.msra.mxu0 %v6215_v34  ;;  %v418_v34 = vld [vmem:[%s8509_s10 + $0x2b0] sm:$0xff]  ;;  %v8779_v37 = vpack.c.bf16 %v426_v10, %v422_v9  ;;  %v441_v9 = vld [vmem:[%s8509_s10 + $0x368] sm:$0xff]  ;;  %v439_v10 = vld [vmem:[%s8509_s10 + $0x358] sm:$0xff] }
  0xee   : > { %2832 = vmatprep.subr.bf16.mxu0 %v6210_v41  ;;  %10613 = vst [vmem:[#allocation55_spill] sm:$0xff] %v8737_v18  ;;  %10616 = vst [vmem:[#allocation58_spill] sm:$0xff] %v8743_v27  ;;  %v427_v41 = vld [vmem:[%s8509_s10 + $0x2f8] sm:$0xff]  ;;  %v8759_v59 = vpack.c.bf16 %v418_v34, %v414_v33  ;;  %v8777_v34 = vpack.c.bf16 %v424_v5, %v420_v13  ;;  %v434_v13 = vld [vmem:[%s8509_s10 + $0x330] sm:$0xff] }
  0xef   : > { %2670 = vmatpush2.bf16.msra.mxu1 %v6343_v40  ;;  %v423_v40 = vld [vmem:[%s8509_s10 + $0x2d8] sm:$0xff]  ;;  %10619 = vst [vmem:[#allocation61_spill] sm:$0xff] %v8761_v60  ;;  %10622 = vst [vmem:[#allocation64_spill] sm:$0xff] %v8779_v37  ;;  %v437_v5 = vld [vmem:[%s8509_s10 + $0x348] sm:$0xff] }
  0xf0   : > { %2173 = vmatmul.mubr.bf16.gmra.mxu0 %v8715_v42  ;;  %3025 = vmatprep.subr.bf16.mxu1 %v6338_v43  ;;  %v8757_v43 = vpack.c.bf16 %v416_v32, %v412_v28  ;;  %10618 = vst [vmem:[#allocation60_spill] sm:$0xff] %v8759_v59  ;;  %v8763_v1 = vpack.c.bf16 %v427_v41, %v423_v40  ;;  %v433_v28 = vld [vmem:[%s8509_s10 + $0x328] sm:$0xff]  ;;  %v431_v32 = vld [vmem:[%s8509_s10 + $0x318] sm:$0xff]  ;;  %10621 = vst [vmem:[#allocation63_spill] sm:$0xff] %v8777_v34 }
  0xf1   : > { %2182 = vmatprep.mubr.bf16.mxu0 %v8721_v47  ;;  %v435_v33 = vld [vmem:[%s8509_s10 + $0x338] sm:$0xff]  ;;  %v8781_v38 = vpack.c.bf16 %v433_v28, %v429_v14  ;;  %v428_v41 = vld [vmem:[%s8509_s10 + $0x300] sm:$0xff] }
  0xf2   : > { %2366 = vmatmul.mubr.bf16.gmra.mxu1 %v8719_v46  ;;  %10617 = vst [vmem:[#allocation59_spill] sm:$0xff] %v8757_v43  ;;  %10620 = vst [vmem:[#allocation62_spill] sm:$0xff] %v8763_v1  ;;  %v8783_v40 = vpack.c.bf16 %v435_v33, %v431_v32  ;;  %v443_v14 = vld [vmem:[%s8509_s10 + $0x378] sm:$0xff]  ;;  %v8797_v28 = vpack.c.bf16 %v432_v49, %v428_v41  ;;  %v8801_v33 = vpack.c.bf16 %v441_v9, %v437_v5  ;;  %v442_v49 = vld [vmem:[%s8509_s10 + $0x370] sm:$0xff] }
  0xf3   : > { %2375 = vmatprep.mubr.bf16.mxu1 %v8723_v48  ;;  %10623 = vst [vmem:[#allocation65_spill] sm:$0xff] %v8781_v38  ;;  %v449_v41 = vld [vmem:[%s8509_s10 + $0x3a8] sm:$0xff]  ;;  %v451_v5 = vld [vmem:[%s8509_s10 + $0x3b8] sm:$0xff] }
  0xf4   : > { %10624 = vst [vmem:[#allocation66_spill] sm:$0xff] %v8783_v40  ;;  %10625 = vst [vmem:[#allocation67_spill] sm:$0xff] %v8797_v28 }
  0xf5   : > { %10627 = vst [vmem:[#allocation69_spill] sm:$0xff] %v8801_v33 }
  0xf8   : > { %2183 = vmatmul.mubr.bf16.gmra.mxu0 %v8737_v18 }
  0xf9   : > { %2192 = vmatprep.mubr.bf16.mxu0 %v8741_v26 }
  0xfa   : > { %2376 = vmatmul.mubr.bf16.gmra.mxu1 %v8739_v22 }
  0xfb   : > { %2385 = vmatprep.mubr.bf16.mxu1 %v8743_v27 }
 0x100   : > { %2193 = vmatmul.mubr.bf16.gmra.mxu0 %v8757_v43 }
 0x101   : > { %2202 = vmatprep.mubr.bf16.mxu0 %v8761_v60  ;;  %v458_v60 = vld [vmem:[%s8509_s10 + $0x3f0] sm:$0xff] }
 0x102   : > { %2386 = vmatmul.mubr.bf16.gmra.mxu1 %v8759_v59 }
 0x103   : > { %2395 = vmatprep.mubr.bf16.mxu1 %v8763_v1  ;;  %v430_v1 = vld [vmem:[%s8509_s10 + $0x310] sm:$0xff] }
 0x104   : > { %v8799_v32 = vpack.c.bf16 %v434_v13, %v430_v1  ;;  %v445_v1 = vld [vmem:[%s8509_s10 + $0x388] sm:$0xff]  ;;  %v447_v13 = vld [vmem:[%s8509_s10 + $0x398] sm:$0xff] }
 0x106   : > { %10626 = vst [vmem:[#allocation68_spill] sm:$0xff] %v8799_v32 }
 0x108   : > { %2203 = vmatmul.mubr.bf16.gmra.mxu0 %v8777_v34  ;;  %v438_v34 = vld [vmem:[%s8509_s10 + $0x350] sm:$0xff] }
 0x109   : > { %2212 = vmatprep.mubr.bf16.mxu0 %v8781_v38  ;;  %v8803_v38 = vpack.c.bf16 %v443_v14, %v439_v10  ;;  %v8819_v10 = vpack.c.bf16 %v442_v49, %v438_v34  ;;  %v8821_v14 = vpack.c.bf16 %v449_v41, %v445_v1  ;;  %v450_v34 = vld [vmem:[%s8509_s10 + $0x3b0] sm:$0xff]  ;;  %v455_v49 = vld [vmem:[%s8509_s10 + $0x3d8] sm:$0xff] }
 0x10a   : > { %2396 = vmatmul.mubr.bf16.gmra.mxu1 %v8779_v37  ;;  %v440_v37 = vld [vmem:[%s8509_s10 + $0x360] sm:$0xff]  ;;  %v459_v1 = vld [vmem:[%s8509_s10 + $0x3f8] sm:$0xff] }
 0x10b   : > { %2405 = vmatprep.mubr.bf16.mxu1 %v8783_v40  ;;  %10628 = vst [vmem:[#allocation70_spill] sm:$0xff] %v8803_v38  ;;  %v436_v40 = vld [vmem:[%s8509_s10 + $0x340] sm:$0xff]  ;;  %10630 = vst [vmem:[#allocation72_spill] sm:$0xff] %v8819_v10 }
 0x10c   : > { %v8817_v9 = vpack.c.bf16 %v440_v37, %v436_v40  ;;  %10631 = vst [vmem:[#allocation73_spill] sm:$0xff] %v8821_v14  ;;  %v453_v37 = vld [vmem:[%s8509_s10 + $0x3c8] sm:$0xff] }
 0x10d   : > { %v457_v40 = vld [vmem:[%s8509_s10 + $0x3e8] sm:$0xff] }
 0x10e   : > { %10629 = vst [vmem:[#allocation71_spill] sm:$0xff] %v8817_v9 }
 0x110   : > { %2213 = vmatmul.mubr.bf16.gmra.mxu0 %v8797_v28  ;;  %v446_v28 = vld [vmem:[%s8509_s10 + $0x390] sm:$0xff] }
 0x111   : > { %2222 = vmatprep.mubr.bf16.mxu0 %v8801_v33  ;;  %v8823_v33 = vpack.c.bf16 %v451_v5, %v447_v13  ;;  %v8839_v13 = vpack.c.bf16 %v450_v34, %v446_v28  ;;  %v8841_v5 = vpack.c.bf16 %v457_v40, %v453_v37  ;;  %v578_v34 = vld [vmem:[#allocation5 + $0x1b0] sm:$0xff] }
 0x112   : > { %2406 = vmatmul.mubr.bf16.gmra.mxu1 %v8799_v32  ;;  %v448_v32 = vld [vmem:[%s8509_s10 + $0x3a0] sm:$0xff]  ;;  %v702_v37 = vld [vmem:[#allocation5 + $0x590] sm:$0xff] }
 0x113   : > { %2415 = vmatprep.mubr.bf16.mxu1 %v8803_v38  ;;  %10632 = vst [vmem:[#allocation74_spill] sm:$0xff] %v8823_v33  ;;  %v444_v38 = vld [vmem:[%s8509_s10 + $0x380] sm:$0xff]  ;;  %10634 = vst [vmem:[#allocation76_spill] sm:$0xff] %v8839_v13  ;;  %v706_v40 = vld [vmem:[#allocation5 + $0x5b0] sm:$0xff] }
 0x114   : > { %v8837_v41 = vpack.c.bf16 %v448_v32, %v444_v38  ;;  %10635 = vst [vmem:[#allocation77_spill] sm:$0xff] %v8841_v5  ;;  %v574_v32 = vld [vmem:[#allocation5 + $0x190] sm:$0xff] }
 0x116   : > { %10633 = vst [vmem:[#allocation75_spill] sm:$0xff] %v8837_v41 }
 0x118   : > { %2223 = vmatmul.mubr.bf16.gmra.mxu0 %v8817_v9  ;;  %v454_v9 = vld [vmem:[%s8509_s10 + $0x3d0] sm:$0xff] }
 0x119   : > { %2232 = vmatprep.mubr.bf16.mxu0 %v8821_v14  ;;  %v8843_v14 = vpack.c.bf16 %v459_v1, %v455_v49  ;;  %v8855_v28 = vpack.c.bf16 %v458_v60, %v454_v9  ;;  %v6202_v49 = vcombine.high %v574_v32, %v578_v34  ;;  %v566_v1 = vld [vmem:[#allocation5 + $0x150] sm:$0xff] }
 0x11a   : > { %2416 = vmatmul.mubr.bf16.gmra.mxu1 %v8819_v10  ;;  %v456_v10 = vld [vmem:[%s8509_s10 + $0x3e0] sm:$0xff]  ;;  %v694_v60 = vld [vmem:[#allocation5 + $0x550] sm:$0xff] }
 0x11b   : > { %2425 = vmatprep.mubr.bf16.mxu1 %v8823_v33  ;;  %10636 = vst [vmem:[#allocation78_spill] sm:$0xff] %v8843_v14  ;;  %v452_v33 = vld [vmem:[%s8509_s10 + $0x3c0] sm:$0xff]  ;;  %10638 = vst [vmem:[#allocation80_spill] sm:$0xff] %v8855_v28  ;;  %v698_v9 = vld [vmem:[#allocation5 + $0x570] sm:$0xff]  ;;  %s8188_s10 = sshll.u32 %s8323_s11, 4  ;;  %s8189_s10 = int_to_ptr.vmem [resolvable:$false] %s8188_s10 }
 0x11c   : > { %v8853_v38 = vpack.c.bf16 %v456_v10, %v452_v33  ;;  %v6330_v33 = vcombine.high %v702_v37, %v706_v40  ;;  %v10639_v10 = vcombine.low %v8600_v44, %v8602_v45  ;;  %v8873_v44 = vld [vmem:[#allocation5 + $0x1f8] sm:$0xff]  ;;  %s8190_s29 = scalar_lea.vmem %s8189_s10, 16384  ;;  %p8191_p5 = scmp.lt.s32.totalorder %s10120_s26, %s8189_s10 }
 0x11d   : > { %v8875_v45 = vld [vmem:[#allocation5 + $0x5d8] sm:$0xff]  ;;  %p8192_p10 = scmp.lt.s32.totalorder %s8190_s29, %s8184_s13 }
 0x11e   : > { %10637 = vst [vmem:[#allocation79_spill] sm:$0xff] %v8853_v38 }
 0x11f   : > { %p8193_p2 = por %p8192_p10, %p8191_p5 }
 0x120   : > { %2233 = vmatmul.mubr.bf16.gmra.mxu0 %v8837_v41 }
 0x121   : > { %2242 = vmatprep.mubr.bf16.mxu0 %v8841_v5  ;;  %v558_v5 = vld [vmem:[#allocation5 + $0x110] sm:$0xff]  ;;  %p8194_p9 = pnand %p8193_p2, %p8187_p0 }
 0x122   : > { %2426 = vmatmul.mubr.bf16.gmra.mxu1 %v8839_v13  ;;  %v562_v13 = vld [vmem:[#allocation5 + $0x130] sm:$0xff] }
 0x123   : > { %2435 = vmatprep.mubr.bf16.mxu1 %v8843_v14  ;;  %v570_v14 = vld [vmem:[#allocation5 + $0x170] sm:$0xff] }
 0x128   : > { %2243 = vmatmul.mubr.bf16.gmra.mxu0 %v8853_v38  ;;  %v6194_v38 = vcombine.high %v566_v1, %v570_v14 }
 0x129   : > { %2478 = vmatprep.mubr.bf16.mxu0 %v8525_v58  ;;  %v6201_v58 = vcombine.low %v574_v32, %v578_v34  ;;  %v8879_v32 = vld [vmem:[#allocation5 + $0x5f8] sm:$0xff]  ;;  %v6193_v34 = vcombine.low %v566_v1, %v570_v14  ;;  %v6185_v14 = vcombine.low %v558_v5, %v562_v13  ;;  %v542_v1 = vld [vmem:[#allocation5 + $0x90] sm:$0xff] }
 0x12a   : > { %2436 = vmatmul.mubr.bf16.gmra.mxu1 %v8855_v28  ;;  %v6329_v28 = vcombine.low %v702_v37, %v706_v40  ;;  %v6321_v40 = vcombine.low %v694_v60, %v698_v9  ;;  %v674_v37 = vld [vmem:[#allocation5 + $0x4b0] sm:$0xff] }
 0x12b   : > { %2671 = vmatprep.mubr.bf16.mxu1 %v8529_v63  ;;  %v10640_v63 = vcombine.low %v8607_v51, %v8609_v52  ;;  %v686_v51 = vld [vmem:[#allocation5 + $0x510] sm:$0xff] }
 0x12c   : > { %v678_v52 = vld [vmem:[#allocation5 + $0x4d0] sm:$0xff] }
 0x130   : > { %2479 = vmatmul.mubr.bf16.vlgmr.msra.gmra.mxu0 %v8540_v21  ;;  %v6322_v21 = vcombine.high %v694_v60, %v698_v9  ;;  %v546_v60 = vld [vmem:[#allocation5 + $0xb0] sm:$0xff] }
 0x131   : > { %2833 = vmatpush1.bf16.msra.mxu0 %v10639_v10  ;;  %2488 = vmatprep.mubr.bf16.mxu0 %v8545_v30  ;;  %v554_v10 = vld [vmem:[#allocation5 + $0xf0] sm:$0xff] }
 0x132   : > { %2672 = vmatmul.mubr.bf16.vlgmr.msra.gmra.mxu1 %v8543_v25  ;;  %2834 = vmatprep.subr.bf16.mxu0 %v6202_v49  ;;  %v8871_v25 = vld [vmem:[#allocation5 + $0x1d8] sm:$0xff]  ;;  %v6186_v49 = vcombine.high %v558_v5, %v562_v13  ;;  %v670_v9 = vld [vmem:[#allocation5 + $0x490] sm:$0xff] }
 0x133   : > { %3026 = vmatpush1.bf16.msra.mxu1 %v10640_v63  ;;  %2681 = vmatprep.mubr.bf16.mxu1 %v8547_v31  ;;  %v690_v63 = vld [vmem:[#allocation5 + $0x530] sm:$0xff]  ;;  %v6298_v13 = vcombine.high %v670_v9, %v674_v37 }
 0x134   : > { %3027 = vmatprep.subr.bf16.mxu1 %v6330_v33  ;;  %v6314_v33 = vcombine.high %v686_v51, %v690_v63  ;;  %v682_v31 = vld [vmem:[#allocation5 + $0x4f0] sm:$0xff] }
 0x135   : > { %2835 = vmatpush1.bf16.msra.mxu0 %v6201_v58  ;;  %v550_v58 = vld [vmem:[#allocation5 + $0xd0] sm:$0xff] }
 0x136   : > { %2836 = vmatprep.subr.bf16.mxu0 %v6194_v38  ;;  %v6313_v38 = vcombine.low %v686_v51, %v690_v63  ;;  %v534_v5 = vld [vmem:[#allocation5 + $0x50] sm:$0xff] }
 0x137   : > { %3028 = vmatpush1.bf16.msra.mxu1 %v6329_v28  ;;  %v6306_v28 = vcombine.high %v678_v52, %v682_v31  ;;  %v662_v51 = vld [vmem:[#allocation5 + $0x450] sm:$0xff] }
 0x138   : > { %3029 = vmatprep.subr.bf16.mxu1 %v6322_v21  ;;  %2489 = vmatmul.mubr.bf16.gmra.mxu0 %v8561_v50  ;;  %v6178_v21 = vcombine.high %v550_v58, %v554_v10  ;;  %v6170_v50 = vcombine.high %v542_v1, %v546_v60  ;;  %v666_v63 = vld [vmem:[#allocation5 + $0x470] sm:$0xff] }
 0x139   : > { %2498 = vmatprep.mubr.bf16.mxu0 %v8565_v54  ;;  %2837 = vmatpush1.bf16.msra.mxu0 %v6193_v34  ;;  %v6305_v54 = vcombine.low %v678_v52, %v682_v31  ;;  %v538_v34 = vld [vmem:[#allocation5 + $0x70] sm:$0xff]  ;;  %v6297_v31 = vcombine.low %v670_v9, %v674_v37 }
 0x13a   : > { %2682 = vmatmul.mubr.bf16.gmra.mxu1 %v8563_v53  ;;  %2838 = vmatprep.subr.bf16.mxu0 %v6186_v49  ;;  %v6177_v53 = vcombine.low %v550_v58, %v554_v10  ;;  %v6162_v52 = vcombine.high %v534_v5, %v538_v34  ;;  %v6290_v49 = vcombine.high %v662_v51, %v666_v63  ;;  %v530_v58 = vld [vmem:[#allocation5 + $0x30] sm:$0xff] }
 0x13b   : > { %2691 = vmatprep.mubr.bf16.mxu1 %v8567_v57  ;;  %3030 = vmatpush1.bf16.msra.mxu1 %v6321_v40  ;;  %v6169_v40 = vcombine.low %v542_v1, %v546_v60  ;;  %v654_v10 = vld [vmem:[#allocation5 + $0x410] sm:$0xff] }
 0x13c   : > { %3031 = vmatprep.subr.bf16.mxu1 %v6314_v33  ;;  %v526_v33 = vld [vmem:[#allocation5 + $0x10] sm:$0xff] }
 0x13d   : > { %2839 = vmatpush1.bf16.msra.mxu0 %v6185_v14  ;;  %v658_v14 = vld [vmem:[#allocation5 + $0x430] sm:$0xff]  ;;  %v6153_v60 = vcombine.low %v526_v33, %v530_v58 }
 0x13e   : > { %2840 = vmatprep.subr.bf16.mxu0 %v6178_v21  ;;  %v6289_v21 = vcombine.low %v662_v51, %v666_v63  ;;  %v774_v37 = vld [vmem:[#allocation5 + $0x7d0] sm:$0xff]  ;;  %v6281_v9 = vcombine.low %v654_v10, %v658_v14 }
 0x13f   : > { %3032 = vmatpush1.bf16.msra.mxu1 %v6313_v38  ;;  %v6161_v38 = vcombine.low %v534_v5, %v538_v34  ;;  %v778_v1 = vld [vmem:[#allocation5 + $0x7f0] sm:$0xff] }
 0x140   : > { %2499 = vmatmul.mubr.bf16.gmra.mxu0 %v8581_v15  ;;  %3033 = vmatprep.subr.bf16.mxu1 %v6306_v28  ;;  %v6154_v28 = vcombine.high %v526_v33, %v530_v58  ;;  %v6402_v5 = vcombine.high %v774_v37, %v778_v1  ;;  %v638_v34 = vld [vmem:[#allocation5 + $0x390] sm:$0xff] }
 0x141   : > { %2508 = vmatprep.mubr.bf16.mxu0 %v8585_v20  ;;  %2841 = vmatpush1.bf16.msra.mxu0 %v6177_v53  ;;  %v6282_v53 = vcombine.high %v654_v10, %v658_v14  ;;  %v642_v51 = vld [vmem:[#allocation5 + $0x3b0] sm:$0xff] }
 0x142   : > { %2692 = vmatmul.mubr.bf16.gmra.mxu1 %v8583_v19  ;;  %2842 = vmatprep.subr.bf16.mxu0 %v6170_v50  ;;  %v650_v50 = vld [vmem:[#allocation5 + $0x3f0] sm:$0xff] }
 0x143   : > { %2701 = vmatprep.mubr.bf16.mxu1 %v8587_v24  ;;  %3034 = vmatpush1.bf16.msra.mxu1 %v6305_v54  ;;  %v646_v54 = vld [vmem:[#allocation5 + $0x3d0] sm:$0xff] }
 0x144   : > { %3035 = vmatprep.subr.bf16.mxu1 %v6298_v13  ;;  %v6274_v13 = vcombine.high %v646_v54, %v650_v50  ;;  %v766_v63 = vld [vmem:[#allocation5 + $0x790] sm:$0xff] }
 0x145   : > { %2843 = vmatpush1.bf16.msra.mxu0 %v6169_v40  ;;  %v770_v40 = vld [vmem:[#allocation5 + $0x7b0] sm:$0xff] }
 0x146   : > { %2844 = vmatprep.subr.bf16.mxu0 %v6162_v52  ;;  %v6401_v52 = vcombine.low %v774_v37, %v778_v1  ;;  %v6394_v33 = vcombine.high %v766_v63, %v770_v40  ;;  %v630_v58 = vld [vmem:[#allocation5 + $0x350] sm:$0xff] }
 0x147   : > { %3036 = vmatpush1.bf16.msra.mxu1 %v6297_v31  ;;  %v6273_v31 = vcombine.low %v646_v54, %v650_v50  ;;  %v758_v10 = vld [vmem:[#allocation5 + $0x750] sm:$0xff] }
 0x148   : > { %2509 = vmatmul.mubr.bf16.gmra.mxu0 %v8611_v55  ;;  %3037 = vmatprep.subr.bf16.mxu1 %v6290_v49  ;;  %v6266_v49 = vcombine.high %v638_v34, %v642_v51  ;;  %v762_v14 = vld [vmem:[#allocation5 + $0x770] sm:$0xff] }
 0x149   : > { %2518 = vmatprep.mubr.bf16.mxu0 %v8617_v0  ;;  %2845 = vmatpush1.bf16.msra.mxu0 %v6161_v38  ;;  %v634_v38 = vld [vmem:[#allocation5 + $0x370] sm:$0xff]  ;;  %v6386_v54 = vcombine.high %v758_v10, %v762_v14 }
 0x14a   : > { %2702 = vmatmul.mubr.bf16.gmra.mxu1 %v8615_v62  ;;  %2846 = vmatprep.subr.bf16.mxu0 %v6154_v28  ;;  %v6393_v28 = vcombine.low %v766_v63, %v770_v40  ;;  %v622_v50 = vld [vmem:[#allocation5 + $0x310] sm:$0xff] }
 0x14b   : > { %2711 = vmatprep.mubr.bf16.mxu1 %v8619_v3  ;;  %3038 = vmatpush1.bf16.msra.mxu1 %v6289_v21  ;;  %v6265_v21 = vcombine.low %v638_v34, %v642_v51  ;;  %v626_v37 = vld [vmem:[#allocation5 + $0x330] sm:$0xff] }
 0x14c   : > { %3039 = vmatprep.subr.bf16.mxu1 %v6282_v53  ;;  %v6258_v53 = vcombine.high %v630_v58, %v634_v38  ;;  %v750_v1 = vld [vmem:[#allocation5 + $0x710] sm:$0xff] }
 0x14d   : > { %2847 = vmatpush1.bf16.msra.mxu0 %v6153_v60  ;;  %v754_v60 = vld [vmem:[#allocation5 + $0x730] sm:$0xff] }
 0x14e   : > { %2848 = vmatprep.subr.bf16.mxu0 %v6274_v13  ;;  %v6385_v13 = vcombine.low %v758_v10, %v762_v14  ;;  %v6378_v34 = vcombine.high %v750_v1, %v754_v60  ;;  %v614_v51 = vld [vmem:[#allocation5 + $0x2d0] sm:$0xff] }
 0x14f   : > { %3040 = vmatpush1.bf16.msra.mxu1 %v6281_v9  ;;  %v6257_v9 = vcombine.low %v630_v58, %v634_v38  ;;  %v742_v63 = vld [vmem:[#allocation5 + $0x6d0] sm:$0xff] }
 0x150   : > { %2519 = vmatmul.mubr.bf16.gmra.mxu0 %v8633_v29  ;;  %3041 = vmatprep.subr.bf16.mxu1 %v6402_v5  ;;  %v6250_v5 = vcombine.high %v622_v50, %v626_v37  ;;  %v746_v40 = vld [vmem:[#allocation5 + $0x6f0] sm:$0xff] }
 0x151   : > { %2528 = vmatprep.mubr.bf16.mxu0 %v8637_v36  ;;  %2849 = vmatpush2.bf16.msra.mxu0 %v6273_v31  ;;  %v618_v31 = vld [vmem:[#allocation5 + $0x2f0] sm:$0xff]  ;;  %v6370_v58 = vcombine.high %v742_v63, %v746_v40 }
 0x152   : > { %2712 = vmatmul.mubr.bf16.gmra.mxu1 %v8635_v35  ;;  %2850 = vmatprep.subr.bf16.mxu0 %v6266_v49  ;;  %v6377_v49 = vcombine.low %v750_v1, %v754_v60  ;;  %v606_v38 = vld [vmem:[#allocation5 + $0x290] sm:$0xff] }
 0x153   : > { %2721 = vmatprep.mubr.bf16.mxu1 %v8639_v39  ;;  %3042 = vmatpush2.bf16.msra.mxu1 %v6401_v52  ;;  %v6249_v52 = vcombine.low %v622_v50, %v626_v37  ;;  %v610_v10 = vld [vmem:[#allocation5 + $0x2b0] sm:$0xff] }
 0x154   : > { %3043 = vmatprep.subr.bf16.mxu1 %v6394_v33  ;;  %v6242_v33 = vcombine.high %v614_v51, %v618_v31  ;;  %v734_v14 = vld [vmem:[#allocation5 + $0x690] sm:$0xff] }
 0x155   : > { %2851 = vmatpush2.bf16.msra.mxu0 %v6265_v21  ;;  %v738_v21 = vld [vmem:[#allocation5 + $0x6b0] sm:$0xff] }
 0x156   : > { %2852 = vmatprep.subr.bf16.mxu0 %v6258_v53  ;;  %v6369_v53 = vcombine.low %v742_v63, %v746_v40  ;;  %v6362_v50 = vcombine.high %v734_v14, %v738_v21  ;;  %v598_v37 = vld [vmem:[#allocation5 + $0x250] sm:$0xff] }
 0x157   : > { %3044 = vmatpush2.bf16.msra.mxu1 %v6393_v28  ;;  %v6241_v28 = vcombine.low %v614_v51, %v618_v31  ;;  %v726_v1 = vld [vmem:[#allocation5 + $0x650] sm:$0xff] }
 0x158   : > { %2529 = vmatmul.mubr.bf16.gmra.mxu0 %v8653_v11  ;;  %3045 = vmatprep.subr.bf16.mxu1 %v6386_v54  ;;  %v6234_v54 = vcombine.high %v606_v38, %v610_v10  ;;  %v730_v60 = vld [vmem:[#allocation5 + $0x670] sm:$0xff] }
 0x159   : > { %2538 = vmatprep.mubr.bf16.mxu0 %v8657_v17  ;;  %2853 = vmatpush2.bf16.msra.mxu0 %v6257_v9  ;;  %v602_v9 = vld [vmem:[#allocation5 + $0x270] sm:$0xff]  ;;  %v6354_v51 = vcombine.high %v726_v1, %v730_v60 }
 0x15a   : > { %2722 = vmatmul.mubr.bf16.gmra.mxu1 %v8655_v16  ;;  %2854 = vmatprep.subr.bf16.mxu0 %v6250_v5  ;;  %v6361_v5 = vcombine.low %v734_v14, %v738_v21  ;;  %v590_v31 = vld [vmem:[#allocation5 + $0x210] sm:$0xff]  ;;  %v6212_v21 = vcombine.high %v8871_v25, %v8873_v44 }
 0x15b   : > { %2731 = vmatprep.mubr.bf16.mxu1 %v8659_v23  ;;  %3046 = vmatpush2.bf16.msra.mxu1 %v6385_v13  ;;  %v6233_v13 = vcombine.low %v606_v38, %v610_v10  ;;  %v594_v63 = vld [vmem:[#allocation5 + $0x230] sm:$0xff] }
 0x15c   : > { %3047 = vmatprep.subr.bf16.mxu1 %v6378_v34  ;;  %v6226_v34 = vcombine.high %v598_v37, %v602_v9  ;;  %v718_v40 = vld [vmem:[#allocation5 + $0x610] sm:$0xff]  ;;  %v6217_v10 = vcombine.low %v590_v31, %v594_v63 }
 0x15d   : > { %2855 = vmatpush2.bf16.msra.mxu0 %v6249_v52  ;;  %v722_v52 = vld [vmem:[#allocation5 + $0x630] sm:$0xff] }
 0x15e   : > { %2856 = vmatprep.subr.bf16.mxu0 %v6242_v33  ;;  %v6353_v33 = vcombine.low %v726_v1, %v730_v60  ;;  %v6346_v38 = vcombine.high %v718_v40, %v722_v52  ;;  %v6345_v14 = vcombine.low %v718_v40, %v722_v52 }
 0x15f   : > { %3048 = vmatpush2.bf16.msra.mxu1 %v6377_v49  ;;  %v6225_v49 = vcombine.low %v598_v37, %v602_v9 }
 0x160   : > { %2539 = vmatmul.mubr.bf16.gmra.mxu0 %v8673_v2  ;;  %3049 = vmatprep.subr.bf16.mxu1 %v6370_v58  ;;  %v6218_v58 = vcombine.high %v590_v31, %v594_v63 }
 0x161   : > { %2548 = vmatprep.mubr.bf16.mxu0 %v8677_v8  ;;  %2857 = vmatpush2.bf16.msra.mxu0 %v6241_v28  ;;  %v6340_v28 = vcombine.high %v8875_v45, %v8879_v32 }
 0x162   : > { %2732 = vmatmul.mubr.bf16.gmra.mxu1 %v8675_v7  ;;  %2858 = vmatprep.subr.bf16.mxu0 %v6234_v54 }
 0x163   : > { %2741 = vmatprep.mubr.bf16.mxu1 %v8679_v12  ;;  %3050 = vmatpush2.bf16.msra.mxu1 %v6369_v53 }
 0x164   : > { %3051 = vmatprep.subr.bf16.mxu1 %v6362_v50 }
 0x165   : > { %2859 = vmatpush2.bf16.msra.mxu0 %v6233_v13 }
 0x166   : > { %2860 = vmatprep.subr.bf16.mxu0 %v6226_v34 }
 0x167   : > { %3052 = vmatpush2.bf16.msra.mxu1 %v6361_v5 }
 0x168   : > { %2549 = vmatmul.mubr.bf16.gmra.mxu0 %v8693_v56  ;;  %3053 = vmatprep.subr.bf16.mxu1 %v6354_v51 }
 0x169   : > { %2558 = vmatprep.mubr.bf16.mxu0 %v8697_v61  ;;  %2861 = vmatpush2.bf16.msra.mxu0 %v6225_v49 }
 0x16a   : > { %2742 = vmatmul.mubr.bf16.gmra.mxu1 %v8695_v4  ;;  %2862 = vmatprep.subr.bf16.mxu0 %v6218_v58 }
 0x16b   : > { %2751 = vmatprep.mubr.bf16.mxu1 %v8699_v6  ;;  %3054 = vmatpush2.bf16.msra.mxu1 %v6353_v33 }
 0x16c   : > { %3055 = vmatprep.subr.bf16.mxu1 %v6346_v38 }
 0x16d   : > { %2863 = vmatpush2.bf16.msra.mxu0 %v6217_v10 }
 0x16e   : > { %3218 = vmatprep.subr.bf16.mxu0 %v6212_v21 }
 0x16f   : > { %3056 = vmatpush2.bf16.msra.mxu1 %v6345_v14 }
 0x170   : > { %v2094_v53 = vpop.f32.mrf.mxu0  ;;  %2559 = vmatmul.mubr.bf16.gmra.mxu0 %v8715_v42  ;;  %3411 = vmatprep.subr.bf16.mxu1 %v6340_v28 }
 0x171   : > { %2568 = vmatprep.mubr.bf16.mxu0 %v8721_v47 }
 0x172   : > { %v2287_v54 = vpop.f32.mrf.mxu1  ;;  %2752 = vmatmul.mubr.bf16.gmra.mxu1 %v8719_v46  ;;  %v2096_v37 = vpop.f32.mrf.mxu0 }
 0x173   : > { %v8918_v50 = vadd.f32 %v2287_v54, %v2094_v53  ;;  %2761 = vmatprep.mubr.bf16.mxu1 %v8723_v48 }
 0x174   : > { %v2289_v9 = vpop.f32.mrf.mxu1  ;;  %v2098_v1 = vpop.f32.mrf.mxu0 }
 0x175   : > { %3700 = vrot.lane.b32.xlu0 %v8918_v50, %s8322_s27  ;;  %v8923_v13 = vadd.f32 %v2289_v9, %v2096_v37  ;;  %v10641_v37 = vld [vmem:[#allocation61_spill] sm:$0xff] }
 0x176   : > { %v2291_v60 = vpop.f32.mrf.mxu1  ;;  %v2100_v5 = vpop.f32.mrf.mxu0 }
 0x177   : > { %v8932_v40 = vadd.f32 %v2291_v60, %v2098_v1  ;;  %v10643_v60 = vld [vmem:[#allocation62_spill] sm:$0xff] }
 0x178   : > { %v2293_v34 = vpop.f32.mrf.mxu1  ;;  %v2104_v51 = vpop.f32.mrf.mxu0  ;;  %2569 = vmatmul.mubr.bf16.gmra.mxu0 %v8737_v18 }
 0x179   : > { %4020 = vrot.lane.b32.xlu0 %v8923_v13, %s8322_s27  ;;  %v8928_v31 = vadd.f32 %v2293_v34, %v2100_v5  ;;  %2578 = vmatprep.mubr.bf16.mxu0 %v8741_v26  ;;  %v10686_v26 = vld [vmem:[#allocation22_spill] sm:$0xff] }
 0x17a   : > { %v2297_v63 = vpop.f32.mrf.mxu1  ;;  %2762 = vmatmul.mubr.bf16.gmra.mxu1 %v8739_v22  ;;  %v2106_v52 = vpop.f32.mrf.mxu0 }
 0x17b   : > { %4022 = vrot.lane.b32.xlu1 %v8928_v31, %s8322_s27  ;;  %2771 = vmatprep.mubr.bf16.mxu1 %v8743_v27  ;;  %v8937_v33 = vadd.f32 %v2297_v63, %v2104_v51 }
 0x17c   : > { %v2299_v49 = vpop.f32.mrf.mxu1  ;;  %v2108_v58 = vpop.f32.mrf.mxu0 }
 0x17d   : > { %3702 = vrot.lane.b32.xlu0 %v8932_v40, %s8322_s27  ;;  %v8941_v10 = vadd.f32 %v2299_v49, %v2106_v52 }
 0x17e   : > { %v2301_v38 = vpop.f32.mrf.mxu1  ;;  %v2110_v14 = vpop.f32.mrf.mxu0 }
 0x17f   : > { %3704 = vrot.lane.b32.xlu1 %v8937_v33, %s8322_s27  ;;  %v8945_v28 = vadd.f32 %v2301_v38, %v2108_v58 }
 0x180   : > { %v2303_v21 = vpop.f32.mrf.mxu1  ;;  %v2114_v53 = vpop.f32.mrf.mxu0  ;;  %2579 = vmatmul.mubr.bf16.gmra.mxu0 %v8757_v43 }
 0x181   : > { %4024 = vrot.lane.b32.xlu0 %v8941_v10, %s8322_s27  ;;  %2588 = vmatprep.mubr.bf16.mxu0 %v10641_v37  ;;  %v8957_v34 = vadd.f32 %v2303_v21, %v2110_v14  ;;  %v10647_v14 = vld [vmem:[#allocation63_spill] sm:$0xff]  ;;  %v10651_v37 = vld [vmem:[#allocation66_spill] sm:$0xff] }
 0x182   : > { %v2307_v54 = vpop.f32.mrf.mxu1  ;;  %2772 = vmatmul.mubr.bf16.gmra.mxu1 %v8759_v59  ;;  %v2116_v1 = vpop.f32.mrf.mxu0 }
 0x183   : > { %v8952_v9 = vadd.f32 %v2307_v54, %v2114_v53  ;;  %3706 = vrot.lane.b32.xlu1 %v8945_v28, %s8322_s27  ;;  %2781 = vmatprep.mubr.bf16.mxu1 %v10643_v60  ;;  %10644 = vst [vmem:[#allocation82_spill] sm:$0xff] %v8957_v34  ;;  %v10648_v54 = vld [vmem:[#allocation64_spill] sm:$0xff]  ;;  %v10649_v60 = vld [vmem:[#allocation65_spill] sm:$0xff] }
 0x184   : > { %v2309_v5 = vpop.f32.mrf.mxu1  ;;  %v2118_v51 = vpop.f32.mrf.mxu0 }
 0x185   : > { %10642 = vst [vmem:[#allocation81_spill] sm:$0xff] %v8952_v9  ;;  %3708 = vrot.lane.b32.xlu0 %v8952_v9, %s8322_s27  ;;  %v8961_v52 = vadd.f32 %v2309_v5, %v2116_v1  ;;  %v571_v9 = vld [vmem:[#allocation5 + $0x178] sm:$0xff] }
 0x186   : > { %v2311_v63 = vpop.f32.mrf.mxu1  ;;  %v2120_v49 = vpop.f32.mrf.mxu0 }
 0x187   : > { %10645 = vst [vmem:[#allocation83_spill] sm:$0xff] %v8961_v52  ;;  %4026 = vrot.lane.b32.xlu1 %v8957_v34, %s8322_s27  ;;  %v8965_v38 = vadd.f32 %v2311_v63, %v2118_v51 }
 0x188   : > { %v2313_v58 = vpop.f32.mrf.mxu1  ;;  %v2124_v53 = vpop.f32.mrf.mxu0  ;;  %2589 = vmatmul.mubr.bf16.gmra.mxu0 %v10647_v14 }
 0x189   : > { %10646 = vst [vmem:[#allocation84_spill] sm:$0xff] %v8965_v38  ;;  %4028 = vrot.lane.b32.xlu0 %v8961_v52, %s8322_s27  ;;  %2598 = vmatprep.mubr.bf16.mxu0 %v10649_v60  ;;  %v8977_v63 = vadd.f32 %v2313_v58, %v2120_v49  ;;  %v10655_v49 = vld [vmem:[#allocation67_spill] sm:$0xff] }
 0x18a   : > { %v2317_v21 = vpop.f32.mrf.mxu1  ;;  %2782 = vmatmul.mubr.bf16.gmra.mxu1 %v10648_v54  ;;  %v2126_v5 = vpop.f32.mrf.mxu0  ;;  %v10656_v54 = vld [vmem:[#allocation68_spill] sm:$0xff] }
 0x18b   : > { %v8972_v1 = vadd.f32 %v2317_v21, %v2124_v53  ;;  %3710 = vrot.lane.b32.xlu1 %v8965_v38, %s8322_s27  ;;  %2791 = vmatprep.mubr.bf16.mxu1 %v10651_v37  ;;  %10652 = vst [vmem:[#allocation86_spill] sm:$0xff] %v8977_v63 }
 0x18c   : > { %v2319_v51 = vpop.f32.mrf.mxu1  ;;  %v2128_v14 = vpop.f32.mrf.mxu0 }
 0x18d   : > { %10650 = vst [vmem:[#allocation85_spill] sm:$0xff] %v8972_v1  ;;  %3712 = vrot.lane.b32.xlu0 %v8972_v1, %s8322_s27  ;;  %v8981_v43 = vadd.f32 %v2319_v51, %v2126_v5  ;;  %v10657_v1 = vld [vmem:[#allocation69_spill] sm:$0xff] }
 0x18e   : > { %v2321_v59 = vpop.f32.mrf.mxu1  ;;  %v2130_v53 = vpop.f32.mrf.mxu0 }
 0x18f   : > { %10653 = vst [vmem:[#allocation87_spill] sm:$0xff] %v8981_v43  ;;  %4030 = vrot.lane.b32.xlu1 %v8977_v63, %s8322_s27  ;;  %v8985_v60 = vadd.f32 %v2321_v59, %v2128_v14  ;;  %v10659_v63 = vld [vmem:[#allocation70_spill] sm:$0xff] }
 0x190   : > { %v2323_v21 = vpop.f32.mrf.mxu1  ;;  %v2134_v37 = vpop.f32.mrf.mxu0  ;;  %2599 = vmatmul.mubr.bf16.gmra.mxu0 %v10655_v49 }
 0x191   : > { %10654 = vst [vmem:[#allocation88_spill] sm:$0xff] %v8985_v60  ;;  %4032 = vrot.lane.b32.xlu0 %v8981_v43, %s8322_s27  ;;  %2608 = vmatprep.mubr.bf16.mxu0 %v10657_v1  ;;  %v8997_v14 = vadd.f32 %v2323_v21, %v2130_v53  ;;  %v10663_v53 = vld [vmem:[#allocation71_spill] sm:$0xff] }
 0x192   : > { %v2327_v58 = vpop.f32.mrf.mxu1  ;;  %2792 = vmatmul.mubr.bf16.gmra.mxu1 %v10656_v54  ;;  %v2136_v51 = vpop.f32.mrf.mxu0  ;;  %v10664_v54 = vld [vmem:[#allocation72_spill] sm:$0xff] }
 0x193   : > { %v8992_v5 = vadd.f32 %v2327_v58, %v2134_v37  ;;  %3714 = vrot.lane.b32.xlu1 %v8985_v60, %s8322_s27  ;;  %2801 = vmatprep.mubr.bf16.mxu1 %v10659_v63  ;;  %10660 = vst [vmem:[#allocation90_spill] sm:$0xff] %v8997_v14 }
 0x194   : > { %v2329_v59 = vpop.f32.mrf.mxu1  ;;  %v2138_v49 = vpop.f32.mrf.mxu0 }
 0x195   : > { %10658 = vst [vmem:[#allocation89_spill] sm:$0xff] %v8992_v5  ;;  %3716 = vrot.lane.b32.xlu0 %v8992_v5, %s8322_s27  ;;  %v9001_v52 = vadd.f32 %v2329_v59, %v2136_v51  ;;  %v10665_v5 = vld [vmem:[#allocation73_spill] sm:$0xff] }
 0x196   : > { %v2331_v43 = vpop.f32.mrf.mxu1  ;;  %v2140_v37 = vpop.f32.mrf.mxu0 }
 0x197   : > { %10661 = vst [vmem:[#allocation91_spill] sm:$0xff] %v9001_v52  ;;  %4034 = vrot.lane.b32.xlu1 %v8997_v14, %s8322_s27  ;;  %v9005_v1 = vadd.f32 %v2331_v43, %v2138_v49  ;;  %v10667_v14 = vld [vmem:[#allocation74_spill] sm:$0xff] }
 0x198   : > { %v2333_v58 = vpop.f32.mrf.mxu1  ;;  %v2144_v63 = vpop.f32.mrf.mxu0  ;;  %2609 = vmatmul.mubr.bf16.gmra.mxu0 %v10663_v53 }
 0x199   : > { %10662 = vst [vmem:[#allocation92_spill] sm:$0xff] %v9005_v1  ;;  %4036 = vrot.lane.b32.xlu0 %v9001_v52, %s8322_s27  ;;  %2618 = vmatprep.mubr.bf16.mxu0 %v10665_v5  ;;  %v9017_v49 = vadd.f32 %v2333_v58, %v2140_v37  ;;  %v10671_v58 = vld [vmem:[#allocation76_spill] sm:$0xff] }
 0x19a   : > { %v2337_v21 = vpop.f32.mrf.mxu1  ;;  %2802 = vmatmul.mubr.bf16.gmra.mxu1 %v10664_v54  ;;  %v2146_v59 = vpop.f32.mrf.mxu0  ;;  %v10672_v54 = vld [vmem:[#allocation77_spill] sm:$0xff] }
 0x19b   : > { %v9012_v51 = vadd.f32 %v2337_v21, %v2144_v63  ;;  %3718 = vrot.lane.b32.xlu1 %v9005_v1, %s8322_s27  ;;  %2811 = vmatprep.mubr.bf16.mxu1 %v10667_v14  ;;  %10668 = vst [vmem:[#allocation94_spill] sm:$0xff] %v9017_v49 }
 0x19c   : > { %v2339_v43 = vpop.f32.mrf.mxu1  ;;  %v2148_v53 = vpop.f32.mrf.mxu0 }
 0x19d   : > { %10666 = vst [vmem:[#allocation93_spill] sm:$0xff] %v9012_v51  ;;  %3720 = vrot.lane.b32.xlu0 %v9012_v51, %s8322_s27  ;;  %v9021_v60 = vadd.f32 %v2339_v43, %v2146_v59  ;;  %v10674_v51 = vld [vmem:[#allocation78_spill] sm:$0xff] }
 0x19e   : > { %v2341_v52 = vpop.f32.mrf.mxu1  ;;  %v2150_v63 = vpop.f32.mrf.mxu0 }
 0x19f   : > { %10669 = vst [vmem:[#allocation95_spill] sm:$0xff] %v9021_v60  ;;  %4038 = vrot.lane.b32.xlu1 %v9017_v49, %s8322_s27  ;;  %v9025_v5 = vadd.f32 %v2341_v52, %v2148_v53 }
 0x1a0   : > { %v2343_v21 = vpop.f32.mrf.mxu1  ;;  %v2154_v14 = vpop.f32.mrf.mxu0  ;;  %2619 = vmatmul.mubr.bf16.gmra.mxu0 %v8837_v41 }
 0x1a1   : > { %10670 = vst [vmem:[#allocation96_spill] sm:$0xff] %v9025_v5  ;;  %4040 = vrot.lane.b32.xlu0 %v9021_v60, %s8322_s27  ;;  %2628 = vmatprep.mubr.bf16.mxu0 %v10672_v54  ;;  %v9037_v53 = vadd.f32 %v2343_v21, %v2150_v63  ;;  %v10678_v63 = vld [vmem:[#allocation79_spill] sm:$0xff] }
 0x1a2   : > { %v2347_v37 = vpop.f32.mrf.mxu1  ;;  %2812 = vmatmul.mubr.bf16.gmra.mxu1 %v10671_v58  ;;  %v2156_v43 = vpop.f32.mrf.mxu0  ;;  %v10679_v58 = vld [vmem:[#allocation80_spill] sm:$0xff] }
 0x1a3   : > { %v9032_v59 = vadd.f32 %v2347_v37, %v2154_v14  ;;  %3722 = vrot.lane.b32.xlu1 %v9025_v5, %s8322_s27  ;;  %2821 = vmatprep.mubr.bf16.mxu1 %v10674_v51  ;;  %10675 = vst [vmem:[#allocation98_spill] sm:$0xff] %v9037_v53  ;;  %v575_v5 = vld [vmem:[#allocation5 + $0x198] sm:$0xff] }
 0x1a4   : > { %v2349_v52 = vpop.f32.mrf.mxu1  ;;  %v2158_v41 = vpop.f32.mrf.mxu0 }
 0x1a5   : > { %10673 = vst [vmem:[#allocation97_spill] sm:$0xff] %v9032_v59  ;;  %3724 = vrot.lane.b32.xlu0 %v9032_v59, %s8322_s27  ;;  %v9041_v49 = vadd.f32 %v2349_v52, %v2156_v43  ;;  %v10680_v59 = vld [vmem:[#allocation19_spill] sm:$0xff] }
 0x1a6   : > { %v2351_v60 = vpop.f32.mrf.mxu1  ;;  %v2160_v14 = vpop.f32.mrf.mxu0 }
 0x1a7   : > { %10676 = vst [vmem:[#allocation99_spill] sm:$0xff] %v9041_v49  ;;  %4042 = vrot.lane.b32.xlu1 %v9037_v53, %s8322_s27  ;;  %v9045_v54 = vadd.f32 %v2351_v60, %v2158_v41  ;;  %v10682_v53 = vld [vmem:[#allocation20_spill] sm:$0xff] }
 0x1a8   : > { %v2353_v37 = vpop.f32.mrf.mxu1  ;;  %v2164_v51 = vpop.f32.mrf.mxu0  ;;  %2629 = vmatmul.mubr.bf16.gmra.mxu0 %v10678_v63 }
 0x1a9   : > { %10677 = vst [vmem:[#allocation100_spill] sm:$0xff] %v9045_v54  ;;  %4044 = vrot.lane.b32.xlu0 %v9041_v49, %s8322_s27  ;;  %2864 = vmatprep.mubr.bf16.mxu0 %v10680_v59  ;;  %v9057_v60 = vadd.f32 %v2353_v37, %v2160_v14  ;;  %v707_v59 = vld [vmem:[#allocation5 + $0x5b8] sm:$0xff]  ;;  %v10685_v37 = vld [vmem:[#allocation21_spill] sm:$0xff] }
 0x1aa   : > { %v2357_v21 = vpop.f32.mrf.mxu1  ;;  %2822 = vmatmul.mubr.bf16.gmra.mxu1 %v10679_v58  ;;  %v2166_v52 = vpop.f32.mrf.mxu0  ;;  %v579_v58 = vld [vmem:[#allocation5 + $0x1b8] sm:$0xff] }
 0x1ab   : > { %v9052_v43 = vadd.f32 %v2357_v21, %v2164_v51  ;;  %3726 = vrot.lane.b32.xlu1 %v9045_v54, %s8322_s27  ;;  %3057 = vmatprep.mubr.bf16.mxu1 %v10682_v53  ;;  %10683 = vst [vmem:[#allocation102_spill] sm:$0xff] %v9057_v60  ;;  %v703_v21 = vld [vmem:[#allocation5 + $0x598] sm:$0xff]  ;;  %v6203_v22 = vcombine.low %v575_v5, %v579_v58 }
 0x1ac   : > { %v2359_v41 = vpop.f32.mrf.mxu1  ;;  %v2168_v63 = vpop.f32.mrf.mxu0  ;;  %v567_v53 = vld [vmem:[#allocation5 + $0x158] sm:$0xff]  ;;  %v6331_v18 = vcombine.low %v703_v21, %v707_v59 }
 0x1ad   : > { %10681 = vst [vmem:[#allocation101_spill] sm:$0xff] %v9052_v43  ;;  %3728 = vrot.lane.b32.xlu0 %v9052_v43, %s8322_s27  ;;  %v9061_v1 = vadd.f32 %v2359_v41, %v2166_v52  ;;  %v6204_v43 = vcombine.high %v575_v5, %v579_v58  ;;  %v695_v52 = vld [vmem:[#allocation5 + $0x558] sm:$0xff] }
 0x1ae   : > { %v2361_v49 = vpop.f32.mrf.mxu1  ;;  %v2170_v51 = vpop.f32.mrf.mxu0  ;;  %v699_v41 = vld [vmem:[#allocation5 + $0x578] sm:$0xff] }
 0x1af   : > { %10684 = vst [vmem:[#allocation103_spill] sm:$0xff] %v9061_v1  ;;  %4046 = vrot.lane.b32.xlu1 %v9057_v60, %s8322_s27  ;;  %v9065_v38 = vadd.f32 %v2361_v49, %v2168_v63  ;;  %v10687_v60 = vcombine.low %v8871_v25, %v8873_v44  ;;  %v6332_v49 = vcombine.high %v703_v21, %v707_v59 }
 0x1b0   : > { %v2363_v54 = vpop.f32.mrf.mxu1  ;;  %v2174_v14 = vpop.f32.mrf.mxu0  ;;  %2865 = vmatmul.mubr.bf16.vlgmr.msra.gmra.mxu0 %v10685_v37  ;;  %v6196_v25 = vcombine.high %v567_v53, %v571_v9  ;;  %v6324_v44 = vcombine.high %v695_v52, %v699_v41  ;;  %v6195_v21 = vcombine.low %v567_v53, %v571_v9 }
 0x1b1   : > { %4048 = vrot.lane.b32.xlu0 %v9061_v1, %s8322_s27  ;;  %3219 = vmatpush1.bf16.msra.mxu0 %v10687_v60  ;;  %v10689_v1 = vcombine.low %v8875_v45, %v8879_v32  ;;  %v9083_v5 = vadd.f32 %v2363_v54, %v2170_v51  ;;  %v559_v32 = vld [vmem:[#allocation5 + $0x118] sm:$0xff] }
 0x1b2   : > { %v2367_v27 = vpop.f32.mrf.mxu1  ;;  %3058 = vmatmul.mubr.bf16.vlgmr.msra.gmra.mxu1 %v10686_v26  ;;  %v2176_v37 = vpop.f32.mrf.mxu0  ;;  %2874 = vmatprep.mubr.bf16.mxu0 %v8545_v30  ;;  %v10690_v26 = vld [vmem:[#allocation24_spill] sm:$0xff]  ;;  %v687_v60 = vld [vmem:[#allocation5 + $0x518] sm:$0xff] }
 0x1b3   : > { %v9074_v63 = vadd.f32 %v2367_v27, %v2174_v14  ;;  %3412 = vmatpush1.bf16.msra.mxu1 %v10689_v1  ;;  %3730 = vrot.lane.b32.xlu1 %v9065_v38, %s8322_s27  ;;  %v563_v1 = vld [vmem:[#allocation5 + $0x138] sm:$0xff]  ;;  %v6323_v14 = vcombine.low %v695_v52, %v699_v41 }
 0x1b4   : > { %v2369_v34 = vpop.f32.mrf.mxu1  ;;  %3067 = vmatprep.mubr.bf16.mxu1 %v10690_v26  ;;  %v2178_v27 = vpop.f32.mrf.mxu0  ;;  %3220 = vmatprep.subr.bf16.mxu0 %v6204_v43  ;;  %v691_v54 = vld [vmem:[#allocation5 + $0x538] sm:$0xff]  ;;  %v6187_v52 = vcombine.low %v559_v32, %v563_v1 }
 0x1b5   : > { %10688 = vst [vmem:[#allocation104_spill] sm:$0xff] %v9074_v63  ;;  %3732 = vrot.lane.b32.xlu0 %v9074_v63, %s8322_s27  ;;  %3413 = vmatprep.subr.bf16.mxu1 %v6332_v49  ;;  %v9087_v58 = vadd.f32 %v2369_v34, %v2176_v37  ;;  %v10691_v34 = vld [vmem:[#allocation25_spill] sm:$0xff]  ;;  %v6188_v37 = vcombine.high %v559_v32, %v563_v1  ;;  %v10692_v26 = vld [vmem:[#allocation26_spill] sm:$0xff] }
 0x1b6   : > { %v2371_v45 = vpop.f32.mrf.mxu1  ;;  %3221 = vmatpush1.bf16.msra.mxu0 %v6203_v22  ;;  %v2180_v59 = vpop.f32.mrf.mxu0  ;;  %v6316_v30 = vcombine.high %v687_v60, %v691_v54  ;;  %v6315_v41 = vcombine.low %v687_v60, %v691_v54  ;;  %v543_v1 = vld [vmem:[#allocation5 + $0x98] sm:$0xff] }
 0x1b7   : > { %4050 = vrot.lane.b32.xlu1 %v9083_v5, %s8322_s27  ;;  %3414 = vmatpush1.bf16.msra.mxu1 %v6331_v18  ;;  %v9091_v43 = vadd.f32 %v2371_v45, %v2178_v27  ;;  %v10693_v18 = vld [vmem:[#allocation27_spill] sm:$0xff]  ;;  %v555_v45 = vld [vmem:[#allocation5 + $0xf8] sm:$0xff] }
 0x1b8   : > { %v2373_v51 = vpop.f32.mrf.mxu1  ;;  %3222 = vmatprep.subr.bf16.mxu0 %v6196_v25  ;;  %3415 = vmatprep.subr.bf16.mxu1 %v6324_v44  ;;  %v2184_v22 = vpop.f32.mrf.mxu0  ;;  %v551_v25 = vld [vmem:[#allocation5 + $0xd8] sm:$0xff] }
 0x1b9   : > { %4052 = vrot.lane.b32.xlu0 %v9087_v58, %s8322_s27  ;;  %2875 = vmatmul.mubr.bf16.gmra.mxu0 %v10691_v34  ;;  %v9103_v44 = vadd.f32 %v2373_v51, %v2180_v59  ;;  %v547_v60 = vld [vmem:[#allocation5 + $0xb8] sm:$0xff]  ;;  %v6180_v54 = vcombine.high %v551_v25, %v555_v45 }
 0x1ba   : > { %v2377_v49 = vpop.f32.mrf.mxu1  ;;  %3068 = vmatmul.mubr.bf16.gmra.mxu1 %v10692_v26  ;;  %2884 = vmatprep.mubr.bf16.mxu0 %v10693_v18  ;;  %v2186_v9 = vpop.f32.mrf.mxu0 }
 0x1bb   : > { %v9098_v63 = vadd.f32 %v2377_v49, %v2184_v22  ;;  %3734 = vrot.lane.b32.xlu1 %v9091_v43, %s8322_s27  ;;  %3077 = vmatprep.mubr.bf16.mxu1 %v8567_v57  ;;  %v679_v22 = vld [vmem:[#allocation5 + $0x4d8] sm:$0xff] }
 0x1bc   : > { %v2379_v53 = vpop.f32.mrf.mxu1  ;;  %3223 = vmatpush1.bf16.msra.mxu0 %v6195_v21  ;;  %3416 = vmatpush1.bf16.msra.mxu1 %v6323_v14  ;;  %v2188_v27 = vpop.f32.mrf.mxu0  ;;  %v683_v49 = vld [vmem:[#allocation5 + $0x4f8] sm:$0xff] }
 0x1bd   : > { %3736 = vrot.lane.b32.xlu0 %v9098_v63, %s8322_s27  ;;  %3224 = vmatprep.subr.bf16.mxu0 %v6188_v37  ;;  %v9107_v26 = vadd.f32 %v2379_v53, %v2186_v9  ;;  %v6308_v51 = vcombine.high %v679_v22, %v683_v49  ;;  %v671_v21 = vld [vmem:[#allocation5 + $0x498] sm:$0xff]  ;;  %v6179_v9 = vcombine.low %v551_v25, %v555_v45 }
 0x1be   : > { %v2381_v18 = vpop.f32.mrf.mxu1  ;;  %3417 = vmatprep.subr.bf16.mxu1 %v6316_v30  ;;  %v2190_v32 = vpop.f32.mrf.mxu0  ;;  %v675_v14 = vld [vmem:[#allocation5 + $0x4b8] sm:$0xff] }
 0x1bf   : > { %4054 = vrot.lane.b32.xlu1 %v9103_v44, %s8322_s27  ;;  %v9111_v37 = vadd.f32 %v2381_v18, %v2188_v27  ;;  %v6300_v27 = vcombine.high %v671_v21, %v675_v14 }
 0x1c0   : > { %v2383_v59 = vpop.f32.mrf.mxu1  ;;  %3225 = vmatpush1.bf16.msra.mxu0 %v6187_v52  ;;  %3418 = vmatpush1.bf16.msra.mxu1 %v6315_v41  ;;  %v2194_v30 = vpop.f32.mrf.mxu0  ;;  %v6307_v52 = vcombine.low %v679_v22, %v683_v49  ;;  %v6172_v41 = vcombine.high %v543_v1, %v547_v60  ;;  %v535_v49 = vld [vmem:[#allocation5 + $0x58] sm:$0xff] }
 0x1c1   : > { %4056 = vrot.lane.b32.xlu0 %v9107_v26, %s8322_s27  ;;  %2885 = vmatmul.mubr.bf16.gmra.mxu0 %v8581_v15  ;;  %v9123_v25 = vadd.f32 %v2383_v59, %v2190_v32  ;;  %v667_v32 = vld [vmem:[#allocation5 + $0x478] sm:$0xff] }
 0x1c2   : > { %v2387_v53 = vpop.f32.mrf.mxu1  ;;  %3078 = vmatmul.mubr.bf16.gmra.mxu1 %v8583_v19  ;;  %2894 = vmatprep.mubr.bf16.mxu0 %v8585_v20  ;;  %v2196_v18 = vpop.f32.mrf.mxu0  ;;  %v6299_v20 = vcombine.low %v671_v21, %v675_v14 }
 0x1c3   : > { %v9118_v57 = vadd.f32 %v2387_v53, %v2194_v30  ;;  %3738 = vrot.lane.b32.xlu1 %v9111_v37, %s8322_s27  ;;  %3087 = vmatprep.mubr.bf16.mxu1 %v8587_v24  ;;  %v539_v30 = vld [vmem:[#allocation5 + $0x78] sm:$0xff] }
 0x1c4   : > { %v2389_v34 = vpop.f32.mrf.mxu1  ;;  %3226 = vmatprep.subr.bf16.mxu0 %v6180_v54  ;;  %3419 = vmatprep.subr.bf16.mxu1 %v6308_v51  ;;  %v2198_v45 = vpop.f32.mrf.mxu0  ;;  %v663_v54 = vld [vmem:[#allocation5 + $0x458] sm:$0xff]  ;;  %v6171_v51 = vcombine.low %v543_v1, %v547_v60  ;;  %v6163_v21 = vcombine.low %v535_v49, %v539_v30 }
 0x1c5   : > { %3740 = vrot.lane.b32.xlu0 %v9118_v57, %s8322_s27  ;;  %3227 = vmatpush1.bf16.msra.mxu0 %v6179_v9  ;;  %v9127_v53 = vadd.f32 %v2389_v34, %v2196_v18  ;;  %v6164_v34 = vcombine.high %v535_v49, %v539_v30  ;;  %v6291_v14 = vcombine.low %v663_v54, %v667_v32  ;;  %v775_v49 = vld [vmem:[#allocation5 + $0x7d8] sm:$0xff] }
 0x1c6   : > { %v2391_v22 = vpop.f32.mrf.mxu1  ;;  %3420 = vmatpush1.bf16.msra.mxu1 %v6307_v52  ;;  %3228 = vmatprep.subr.bf16.mxu0 %v6172_v41  ;;  %v2200_v24 = vpop.f32.mrf.mxu0  ;;  %v6292_v41 = vcombine.high %v663_v54, %v667_v32  ;;  %v779_v30 = vld [vmem:[#allocation5 + $0x7f8] sm:$0xff] }
 0x1c7   : > { %4058 = vrot.lane.b32.xlu1 %v9123_v25, %s8322_s27  ;;  %3421 = vmatprep.subr.bf16.mxu1 %v6300_v27  ;;  %v9131_v19 = vadd.f32 %v2391_v22, %v2198_v45  ;;  %v527_v27 = vld [vmem:[#allocation5 + $0x18] sm:$0xff] }
 0x1c8   : > { %v2393_v59 = vpop.f32.mrf.mxu1  ;;  %v2204_v9 = vpop.f32.mrf.mxu0 }
 0x1c9   : > { %4060 = vrot.lane.b32.xlu0 %v9127_v53, %s8322_s27  ;;  %2895 = vmatmul.mubr.bf16.gmra.mxu0 %v8611_v55  ;;  %v9143_v45 = vadd.f32 %v2393_v59, %v2200_v24  ;;  %v647_v59 = vld [vmem:[#allocation5 + $0x3d8] sm:$0xff] }
 0x1ca   : > { %v2397_v52 = vpop.f32.mrf.mxu1  ;;  %3088 = vmatmul.mubr.bf16.gmra.mxu1 %v8615_v62  ;;  %2904 = vmatprep.mubr.bf16.mxu0 %v8617_v0  ;;  %v2206_v1 = vpop.f32.mrf.mxu0  ;;  %v659_v0 = vld [vmem:[#allocation5 + $0x438] sm:$0xff] }
 0x1cb   : > { %v9138_v18 = vadd.f32 %v2397_v52, %v2204_v9  ;;  %3742 = vrot.lane.b32.xlu1 %v9131_v19, %s8322_s27  ;;  %3097 = vmatprep.mubr.bf16.mxu1 %v8619_v3  ;;  %v531_v9 = vld [vmem:[#allocation5 + $0x38] sm:$0xff] }
 0x1cc   : > { %v2399_v60 = vpop.f32.mrf.mxu1  ;;  %3229 = vmatpush1.bf16.msra.mxu0 %v6171_v51  ;;  %3422 = vmatpush1.bf16.msra.mxu1 %v6299_v20  ;;  %v2208_v22 = vpop.f32.mrf.mxu0  ;;  %v655_v52 = vld [vmem:[#allocation5 + $0x418] sm:$0xff]  ;;  %v6156_v54 = vcombine.high %v527_v27, %v531_v9 }
 0x1cd   : > { %3744 = vrot.lane.b32.xlu0 %v9138_v18, %s8322_s27  ;;  %3230 = vmatprep.subr.bf16.mxu0 %v6164_v34  ;;  %v9147_v55 = vadd.f32 %v2399_v60, %v2206_v1  ;;  %v6284_v32 = vcombine.high %v655_v52, %v659_v0  ;;  %v651_v51 = vld [vmem:[#allocation5 + $0x3f8] sm:$0xff]  ;;  %v6283_v1 = vcombine.low %v655_v52, %v659_v0 }
 0x1ce   : > { %v2401_v62 = vpop.f32.mrf.mxu1  ;;  %3423 = vmatprep.subr.bf16.mxu1 %v6292_v41  ;;  %v2210_v20 = vpop.f32.mrf.mxu0 }
 0x1cf   : > { %10694 = vst [vmem:[#allocation105_spill] sm:$0xff] %v9147_v55  ;;  %4062 = vrot.lane.b32.xlu1 %v9143_v45, %s8322_s27  ;;  %v9151_v34 = vadd.f32 %v2401_v62, %v2208_v22  ;;  %v6276_v22 = vcombine.high %v647_v59, %v651_v51 }
 0x1d0   : > { %v2403_v24 = vpop.f32.mrf.mxu1  ;;  %3231 = vmatpush1.bf16.msra.mxu0 %v6163_v21  ;;  %3424 = vmatpush1.bf16.msra.mxu1 %v6291_v14  ;;  %v2214_v41 = vpop.f32.mrf.mxu0  ;;  %v6155_v21 = vcombine.low %v527_v27, %v531_v9  ;;  %v6404_v14 = vcombine.high %v775_v49, %v779_v30  ;;  %v639_v9 = vld [vmem:[#allocation5 + $0x398] sm:$0xff] }
 0x1d1   : > { %4064 = vrot.lane.b32.xlu0 %v9147_v55, %s8322_s27  ;;  %2905 = vmatmul.mubr.bf16.gmra.mxu0 %v8633_v29  ;;  %v9163_v0 = vadd.f32 %v2403_v24, %v2210_v20  ;;  %v771_v20 = vld [vmem:[#allocation5 + $0x7b8] sm:$0xff] }
 0x1d2   : > { %v2407_v60 = vpop.f32.mrf.mxu1  ;;  %3098 = vmatmul.mubr.bf16.gmra.mxu1 %v8635_v35  ;;  %2914 = vmatprep.mubr.bf16.mxu0 %v8637_v36  ;;  %v2216_v62 = vpop.f32.mrf.mxu0  ;;  %v6403_v36 = vcombine.low %v775_v49, %v779_v30 }
 0x1d3   : > { %v9158_v3 = vadd.f32 %v2407_v60, %v2214_v41  ;;  %3746 = vrot.lane.b32.xlu1 %v9151_v34, %s8322_s27  ;;  %3107 = vmatprep.mubr.bf16.mxu1 %v8639_v39  ;;  %v643_v41 = vld [vmem:[#allocation5 + $0x3b8] sm:$0xff] }
 0x1d4   : > { %v2409_v55 = vpop.f32.mrf.mxu1  ;;  %3232 = vmatprep.subr.bf16.mxu0 %v6156_v54  ;;  %3425 = vmatprep.subr.bf16.mxu1 %v6284_v32  ;;  %v2218_v52 = vpop.f32.mrf.mxu0  ;;  %v767_v54 = vld [vmem:[#allocation5 + $0x798] sm:$0xff]  ;;  %v6275_v32 = vcombine.low %v647_v59, %v651_v51  ;;  %v6267_v59 = vcombine.low %v639_v9, %v643_v41 }
 0x1d5   : > { %3748 = vrot.lane.b32.xlu0 %v9158_v3, %s8322_s27  ;;  %3426 = vmatpush1.bf16.msra.mxu1 %v6283_v1  ;;  %v9167_v60 = vadd.f32 %v2409_v55, %v2216_v62  ;;  %v6268_v55 = vcombine.high %v639_v9, %v643_v41  ;;  %v6395_v51 = vcombine.low %v767_v54, %v771_v20  ;;  %v9191_v9 = vld [vmem:[#allocation5 + $0x718] sm:$0xff] }
 0x1d6   : > { %v2411_v27 = vpop.f32.mrf.mxu1  ;;  %3233 = vmatpush1.bf16.msra.mxu0 %v6155_v21  ;;  %3427 = vmatprep.subr.bf16.mxu1 %v6404_v14  ;;  %v2220_v39 = vpop.f32.mrf.mxu0  ;;  %v6396_v14 = vcombine.high %v767_v54, %v771_v20 }
 0x1d7   : > { %4066 = vrot.lane.b32.xlu1 %v9163_v0, %s8322_s27  ;;  %3234 = vmatprep.subr.bf16.mxu0 %v6276_v22  ;;  %v9171_v35 = vadd.f32 %v2411_v27, %v2218_v52  ;;  %v631_v22 = vld [vmem:[#allocation5 + $0x358] sm:$0xff] }
 0x1d8   : > { %v2413_v24 = vpop.f32.mrf.mxu1  ;;  %v2224_v1 = vpop.f32.mrf.mxu0 }
 0x1d9   : > { %4068 = vrot.lane.b32.xlu0 %v9167_v60, %s8322_s27  ;;  %2915 = vmatmul.mubr.bf16.gmra.mxu0 %v8653_v11  ;;  %v9183_v52 = vadd.f32 %v2413_v24, %v2220_v39  ;;  %v9193_v39 = vld [vmem:[#allocation5 + $0x738] sm:$0xff] }
 0x1da   : > { %v2417_v21 = vpop.f32.mrf.mxu1  ;;  %3108 = vmatmul.mubr.bf16.gmra.mxu1 %v8655_v16  ;;  %2924 = vmatprep.mubr.bf16.mxu0 %v8657_v17  ;;  %v2226_v49 = vpop.f32.mrf.mxu0  ;;  %v763_v17 = vld [vmem:[#allocation5 + $0x778] sm:$0xff] }
 0x1db   : > { %v9178_v62 = vadd.f32 %v2417_v21, %v2224_v1  ;;  %3750 = vrot.lane.b32.xlu1 %v9171_v35, %s8322_s27  ;;  %3117 = vmatprep.mubr.bf16.mxu1 %v8659_v23  ;;  %v635_v1 = vld [vmem:[#allocation5 + $0x378] sm:$0xff] }
 0x1dc   : > { %v2419_v30 = vpop.f32.mrf.mxu1  ;;  %3428 = vmatpush2.bf16.msra.mxu1 %v6403_v36  ;;  %3235 = vmatpush2.bf16.msra.mxu0 %v6275_v32  ;;  %v2228_v27 = vpop.f32.mrf.mxu0  ;;  %v759_v21 = vld [vmem:[#allocation5 + $0x758] sm:$0xff]  ;;  %v6260_v54 = vcombine.high %v631_v22, %v635_v1 }
 0x1dd   : > { %3752 = vrot.lane.b32.xlu0 %v9178_v62, %s8322_s27  ;;  %3236 = vmatprep.subr.bf16.mxu0 %v6268_v55  ;;  %v9187_v11 = vadd.f32 %v2419_v30, %v2226_v49  ;;  %v6388_v20 = vcombine.high %v759_v21, %v763_v17  ;;  %v623_v24 = vld [vmem:[#allocation5 + $0x318] sm:$0xff]  ;;  %v6387_v49 = vcombine.low %v759_v21, %v763_v17 }
 0x1de   : > { %v2421_v16 = vpop.f32.mrf.mxu1  ;;  %3429 = vmatprep.subr.bf16.mxu1 %v6396_v14  ;;  %v2230_v36 = vpop.f32.mrf.mxu0  ;;  %v627_v32 = vld [vmem:[#allocation5 + $0x338] sm:$0xff] }
 0x1df   : > { %10695 = vst [vmem:[#allocation106_spill] sm:$0xff] %v9187_v11  ;;  %4070 = vrot.lane.b32.xlu1 %v9183_v52, %s8322_s27  ;;  %v9195_v55 = vadd.f32 %v2421_v16, %v2228_v27  ;;  %v6252_v27 = vcombine.high %v623_v24, %v627_v32  ;;  %v9213_v21 = vld [vmem:[#allocation5 + $0x2d8] sm:$0xff] }
 0x1e0   : > { %v2423_v41 = vpop.f32.mrf.mxu1  ;;  %3430 = vmatpush2.bf16.msra.mxu1 %v6395_v51  ;;  %3237 = vmatpush2.bf16.msra.mxu0 %v6267_v59  ;;  %v2234_v14 = vpop.f32.mrf.mxu0  ;;  %v6259_v51 = vcombine.low %v631_v22, %v635_v1  ;;  %v6380_v59 = vcombine.high %v9191_v9, %v9193_v39 }
 0x1e1   : > { %4072 = vrot.lane.b32.xlu0 %v9187_v11, %s8322_s27  ;;  %2925 = vmatmul.mubr.bf16.gmra.mxu0 %v8673_v2  ;;  %v9209_v17 = vadd.f32 %v2423_v41, %v2230_v36  ;;  %v743_v41 = vld [vmem:[#allocation5 + $0x6d8] sm:$0xff] }
 0x1e2   : > { %v2427_v30 = vpop.f32.mrf.mxu1  ;;  %3118 = vmatmul.mubr.bf16.gmra.mxu1 %v8675_v7  ;;  %2934 = vmatprep.mubr.bf16.mxu0 %v8677_v8  ;;  %v2236_v16 = vpop.f32.mrf.mxu0  ;;  %v6251_v8 = vcombine.low %v623_v24, %v627_v32 }
 0x1e3   : > { %v9204_v23 = vadd.f32 %v2427_v30, %v2234_v14  ;;  %3754 = vrot.lane.b32.xlu1 %v9195_v55, %s8322_s27  ;;  %3127 = vmatprep.mubr.bf16.mxu1 %v8679_v12  ;;  %10697 = vst [vmem:[#allocation108_spill] sm:$0xff] %v9209_v17  ;;  %v9215_v14 = vld [vmem:[#allocation5 + $0x2f8] sm:$0xff] }
 0x1e4   : > { %v2429_v2 = vpop.f32.mrf.mxu1  ;;  %3238 = vmatprep.subr.bf16.mxu0 %v6260_v54  ;;  %3431 = vmatprep.subr.bf16.mxu1 %v6388_v20  ;;  %v2238_v22 = vpop.f32.mrf.mxu0  ;;  %v747_v54 = vld [vmem:[#allocation5 + $0x6f8] sm:$0xff] }
 0x1e5   : > { %10696 = vst [vmem:[#allocation107_spill] sm:$0xff] %v9204_v23  ;;  %3756 = vrot.lane.b32.xlu0 %v9204_v23, %s8322_s27  ;;  %3432 = vmatpush2.bf16.msra.mxu1 %v6387_v49  ;;  %v9217_v30 = vadd.f32 %v2429_v2, %v2236_v16  ;;  %v6379_v49 = vcombine.low %v9191_v9, %v9193_v39  ;;  %v3604_v16 = vld [vmem:[#allocation7] sm:$0xff] }
 0x1e6   : > { %v2431_v1 = vpop.f32.mrf.mxu1  ;;  %3239 = vmatpush2.bf16.msra.mxu0 %v6259_v51  ;;  %3433 = vmatprep.subr.bf16.mxu1 %v6380_v59  ;;  %v2240_v36 = vpop.f32.mrf.mxu0  ;;  %v6244_v59 = vcombine.high %v9213_v21, %v9215_v14  ;;  %v6372_v24 = vcombine.high %v743_v41, %v747_v54  ;;  %v3636_v9 = vld [vmem:[#allocation8] sm:$0xff] }
 0x1e7   : > { %10698 = vst [vmem:[#allocation109_spill] sm:$0xff] %v9217_v30  ;;  %v3701_v12 = vpop.permute.xlu0 %3700  ;;  %4074 = vrot.lane.b32.xlu1 %v9209_v17, %s8322_s27  ;;  %3240 = vmatprep.subr.bf16.mxu0 %v6252_v27  ;;  %v9223_v51 = vadd.f32 %v2431_v1, %v2238_v22  ;;  %v3605_v27 = vld [vmem:[#allocation7 + $0x8] sm:$0xff]  ;;  %v3668_v17 = vmul.f32 %v3604_v16, %v8918_v50  ;;  %v9256_v50 = vld [vmem:[#allocation5 + $0x258] sm:$0xff] }
 0x1e8   : > { %v2433_v20 = vpop.f32.mrf.mxu1  ;;  %v2244_v2 = vpop.f32.mrf.mxu0  ;;  %v3637_v1 = vld [vmem:[#allocation8 + $0x8] sm:$0xff] }
 0x1e9   : > { %10699 = vst [vmem:[#allocation110_spill] sm:$0xff] %v9223_v51  ;;  %4076 = vrot.lane.b32.xlu0 %v9217_v30, %s8322_s27  ;;  %2935 = vmatmul.mubr.bf16.gmra.mxu0 %v8693_v56  ;;  %v9237_v56 = vld [vmem:[#allocation5 + $0x298] sm:$0xff]  ;;  %v9249_v11 = vadd.f32 %v2433_v20, %v2240_v36 }
 0x1ea   : > { %v2437_v7 = vpop.f32.mrf.mxu1  ;;  %3128 = vmatmul.mubr.bf16.gmra.mxu1 %v8695_v4  ;;  %2944 = vmatprep.mubr.bf16.mxu0 %v8697_v61  ;;  %v2246_v22 = vpop.f32.mrf.mxu0  ;;  %v6243_v61 = vcombine.low %v9213_v21, %v9215_v14  ;;  %v9243_v4 = vld [vmem:[#allocation5 + $0x698] sm:$0xff]  ;;  %v3669_v21 = vmul.f32 %v3605_v27, %v8932_v40  ;;  %v3989_v14 = vmul.f32 %v3605_v27, %v8928_v31 }
 0x1eb   : > { %v9232_v39 = vadd.f32 %v2437_v7, %v2244_v2  ;;  %v4021_v32 = vpop.permute.xlu0 %4020  ;;  %3758 = vrot.lane.b32.xlu1 %v9223_v51, %s8322_s27  ;;  %3137 = vmatprep.mubr.bf16.mxu1 %v8699_v6  ;;  %v6371_v7 = vcombine.low %v743_v41, %v747_v54  ;;  %v9241_v2 = vld [vmem:[#allocation5 + $0x2b8] sm:$0xff]  ;;  %v3988_v6 = vmul.f32 %v3604_v16, %v8923_v13 }
 0x1ec   : > { %v4084_v30 = vmul.f32 %v4021_v32, %v3636_v9  ;;  %v2439_v23 = vpop.f32.mrf.mxu1  ;;  %3434 = vmatpush2.bf16.msra.mxu1 %v6379_v49  ;;  %3241 = vmatpush2.bf16.msra.mxu0 %v6251_v8  ;;  %v9245_v51 = vld [vmem:[#allocation5 + $0x6b8] sm:$0xff]  ;;  %10701 = vst [vmem:[#allocation112_spill] sm:$0xff] %v9249_v11  ;;  %v2248_v8 = vpop.f32.mrf.mxu0  ;;  %v3764_v41 = vmul.f32 %v3701_v12, %v3636_v9 }
 0x1ed   : > { %10700 = vst [vmem:[#allocation111_spill] sm:$0xff] %v9232_v39  ;;  %v4023_v32 = vpop.permute.xlu1 %4022  ;;  %3760 = vrot.lane.b32.xlu0 %v9232_v39, %s8322_s27  ;;  %3242 = vmatprep.subr.bf16.mxu0 %v6244_v59  ;;  %v9258_v13 = vld [vmem:[#allocation5 + $0x278] sm:$0xff]  ;;  %v9260_v36 = vadd.f32 %v2439_v23, %v2246_v22  ;;  %v6235_v40 = vcombine.low %v9237_v56, %v9241_v2  ;;  %v3638_v39 = vld [vmem:[#allocation8 + $0x10] sm:$0xff] }
 0x1ee   : > { %v4085_v54 = vmul.f32 %v4023_v32, %v3637_v1  ;;  %v2441_v49 = vpop.f32.mrf.mxu1  ;;  %3435 = vmatprep.subr.bf16.mxu1 %v6372_v24  ;;  %v2250_v59 = vpop.f32.mrf.mxu0  ;;  %v6236_v12 = vcombine.high %v9237_v56, %v9241_v2  ;;  %v6364_v31 = vcombine.high %v9243_v4, %v9245_v51  ;;  %v4116_v16 = vadd.f32 %v4084_v30, %v3988_v6  ;;  %v9270_v23 = vld [vmem:[#allocation5 + $0x658] sm:$0xff] }
 0x1ef   : > { %v3703_v20 = vpop.permute.xlu0 %3702  ;;  %4078 = vrot.lane.b32.xlu1 %v9249_v11, %s8322_s27  ;;  %v9272_v22 = vld [vmem:[#allocation5 + $0x678] sm:$0xff]  ;;  %v9274_v32 = vadd.f32 %v2441_v49, %v2248_v8  ;;  %v6363_v6 = vcombine.low %v9243_v4, %v9245_v51  ;;  %v3796_v30 = vadd.f32 %v3764_v41, %v3668_v17  ;;  %v3606_v8 = vld [vmem:[#allocation7 + $0x10] sm:$0xff] }
 0x1f0   : > { %v4117_v27 = vadd.f32 %v4085_v54, %v3989_v14  ;;  %v3765_v24 = vmul.f32 %v3703_v20, %v3637_v1  ;;  %v2443_v9 = vpop.f32.mrf.mxu1  ;;  %3243 = vmatpush2.bf16.msra.mxu0 %v6243_v61  ;;  %3436 = vmatpush2.bf16.msra.mxu1 %v6371_v7  ;;  %v2480_v56 = vpop.f32.mrf.mxu0  ;;  %v6228_v61 = vcombine.high %v9256_v50, %v9258_v13  ;;  %v3607_v14 = vld [vmem:[#allocation7 + $0x18] sm:$0xff] }
 0x1f1   : > { %v3705_v11 = vpop.permute.xlu1 %3704  ;;  %4080 = vrot.lane.b32.xlu0 %v9260_v36, %s8322_s27  ;;  %2945 = vmatmul.mubr.bf16.gmra.mxu0 %v8715_v42  ;;  %v3639_v51 = vld [vmem:[#allocation8 + $0x18] sm:$0xff]  ;;  %v6356_v17 = vcombine.high %v9270_v23, %v9272_v22 }
 0x1f2   : > { %v7175_v1 = vpack.c.bf16 %v4117_v27, %v4116_v16  ;;  %v3797_v7 = vadd.f32 %v3765_v24, %v3669_v21  ;;  %v2673_v2 = vpop.f32.mrf.mxu1  ;;  %3138 = vmatmul.mubr.bf16.gmra.mxu1 %v8719_v46  ;;  %2954 = vmatprep.mubr.bf16.mxu0 %v8721_v47  ;;  %v2482_v4 = vpop.f32.mrf.mxu0  ;;  %v3766_v41 = vmul.f32 %v3705_v11, %v3638_v39  ;;  %v9304_v11 = vld [vmem:[#allocation5 + $0x218] sm:$0xff] }
 0x1f3   : > { %v9285_v54 = vadd.f32 %v2673_v2, %v2480_v56  ;;  %v4025_v49 = vpop.permute.xlu0 %4024  ;;  %3762 = vrot.lane.b32.xlu1 %v9274_v32, %s8322_s27  ;;  %3147 = vmatprep.mubr.bf16.mxu1 %v8723_v48  ;;  %v9297_v16 = vadd.f32 %v2443_v9, %v2250_v59  ;;  %v3670_v56 = vmul.f32 %v3606_v8, %v8937_v33 }
 0x1f4   : > { %7747 = vst [vmem:[%s9294_s17 + $0x80] sm:$0xff] %v7175_v1   ;;  %v7095_v21 = vpack.c.bf16 %v3797_v7, %v3796_v30  ;;  %v2675_v20 = vpop.f32.mrf.mxu1  ;;  %3244 = vmatprep.subr.bf16.mxu0 %v6236_v12  ;;  %3437 = vmatprep.subr.bf16.mxu1 %v6364_v31  ;;  %v2484_v24 = vpop.f32.mrf.mxu0  ;;  %v3671_v2 = vmul.f32 %v3607_v14, %v8945_v28  ;;  %v9306_v12 = vld [vmem:[#allocation5 + $0x238] sm:$0xff] }
 0x1f5   : > { %v3707_v27 = vpop.permute.xlu1 %3706  ;;  %4341 = vrot.lane.b32.xlu0 %v9285_v54, %s8322_s27  ;;  %3245 = vmatpush2.bf16.msra.mxu0 %v6235_v40  ;;  %v3990_v59 = vmul.f32 %v3606_v8, %v8941_v10  ;;  %v9309_v31 = vadd.f32 %v2675_v20, %v2482_v4  ;;  %v6227_v28 = vcombine.low %v9256_v50, %v9258_v13  ;;  %v719_v40 = vld [vmem:[#allocation5 + $0x618] sm:$0xff]  ;;  %v10703_v13 = vld [vmem:[#allocation55_spill] sm:$0xff] }
 0x1f6   : > { %7096 = vst [vmem:[%s9294_s17] sm:$0xff] %v7095_v21   ;;  %v3767_v48 = vmul.f32 %v3707_v27, %v3639_v51  ;;  %v2677_v1 = vpop.f32.mrf.mxu1  ;;  %3438 = vmatpush2.bf16.msra.mxu1 %v6363_v6  ;;  %3246 = vmatprep.subr.bf16.mxu0 %v6228_v61  ;;  %v2486_v33 = vpop.f32.mrf.mxu0  ;;  %v723_v6 = vld [vmem:[#allocation5 + $0x638] sm:$0xff]  ;;  %v3798_v61 = vadd.f32 %v3766_v41, %v3670_v56  ;;  %v3640_v27 = vld [vmem:[#allocation8 + $0x20] sm:$0xff] }
 0x1f7   : > { %v3709_v9 = vpop.permute.xlu0 %3708  ;;  %4082 = vrot.lane.b32.xlu1 %v9297_v16, %s8322_s27  ;;  %3439 = vmatprep.subr.bf16.mxu1 %v6356_v17  ;;  %v4086_v30 = vmul.f32 %v4025_v49, %v3638_v39  ;;  %v6355_v10 = vcombine.low %v9270_v23, %v9272_v22  ;;  %v10702_v8 = vld [vmem:[#allocation82_spill] sm:$0xff]  ;;  %v9318_v20 = vadd.f32 %v2677_v1, %v2484_v24  ;;  %v10704_v23 = vld [vmem:[#allocation56_spill] sm:$0xff]  ;;  %v10705_v22 = vld [vmem:[#allocation57_spill] sm:$0xff] }
 0x1f8   : > { %v3799_v7 = vadd.f32 %v3767_v48, %v3671_v2  ;;  %v2679_v21 = vpop.f32.mrf.mxu1  ;;  %v3991_v4 = vmul.f32 %v3607_v14, %v10702_v8  ;;  %v2490_v50 = vpop.f32.mrf.mxu0  ;;  %v6220_v39 = vcombine.high %v9304_v11, %v9306_v12  ;;  %v6348_v14 = vcombine.high %v719_v40, %v723_v6  ;;  %v3608_v41 = vld [vmem:[#allocation7 + $0x20] sm:$0xff]  ;;  %v3609_v24 = vld [vmem:[#allocation7 + $0x28] sm:$0xff] }
 0x1f9   : > { %v4027_v47 = vpop.permute.xlu1 %4026  ;;  %4662 = vrot.lane.b32.xlu0 %v9309_v31, %s8322_s27  ;;  %2955 = vmatmul.mubr.bf16.gmra.mxu0 %v10703_v13  ;;  %v3641_v8 = vld [vmem:[#allocation8 + $0x28] sm:$0xff]  ;;  %v10706_v13 = vld [vmem:[#allocation58_spill] sm:$0xff] }
 0x1fa   : > { %v7100_v48 = vpack.c.bf16 %v3799_v7, %v3798_v61  ;;  %v4087_v49 = vmul.f32 %v4027_v47, %v3639_v51  ;;  %v2683_v17 = vpop.f32.mrf.mxu1  ;;  %3148 = vmatmul.mubr.bf16.gmra.mxu1 %v10704_v23  ;;  %2964 = vmatprep.mubr.bf16.mxu0 %v10705_v22  ;;  %v2492_v1 = vpop.f32.mrf.mxu0  ;;  %v6219_v47 = vcombine.low %v9304_v11, %v9306_v12  ;;  %v10708_v11 = vld [vmem:[#allocation84_spill] sm:$0xff] }
 0x1fb   : > { %v9327_v56 = vadd.f32 %v2683_v17, %v2490_v50  ;;  %v4029_v2 = vpop.permute.xlu0 %4028  ;;  %4343 = vrot.lane.b32.xlu1 %v9318_v20, %s8322_s27  ;;  %3157 = vmatprep.mubr.bf16.mxu1 %v10706_v13  ;;  %v6347_v51 = vcombine.low %v719_v40, %v723_v6  ;;  %v4118_v61 = vadd.f32 %v4086_v30, %v3990_v59  ;;  %v10707_v13 = vld [vmem:[#allocation81_spill] sm:$0xff] }
 0x1fc   : > { %7732 = vst [vmem:[%s9294_s17 + $0x8] sm:$0xff] %v7100_v48   ;;  %v3768_v7 = vmul.f32 %v3709_v9, %v3640_v27  ;;  %v4119_v22 = vadd.f32 %v4087_v49, %v3991_v4  ;;  %v2685_v23 = vpop.f32.mrf.mxu1  ;;  %3247 = vmatpush2.bf16.msra.mxu0 %v6227_v28  ;;  %3440 = vmatpush2.bf16.msra.mxu1 %v6355_v10  ;;  %v2494_v46 = vpop.f32.mrf.mxu0  ;;  %v3642_v49 = vld [vmem:[#allocation8 + $0x30] sm:$0xff] }
 0x1fd   : > { %v9335_v50 = vadd.f32 %v2679_v21, %v2486_v33  ;;  %v3711_v17 = vpop.permute.xlu1 %3710  ;;  %4345 = vrot.lane.b32.xlu0 %v9327_v56, %s8322_s27  ;;  %3248 = vmatprep.subr.bf16.mxu0 %v6220_v39  ;;  %v3672_v42 = vmul.f32 %v3608_v41, %v10707_v13  ;;  %v3673_v12 = vmul.f32 %v3609_v24, %v10708_v11  ;;  %v10709_v13 = vld [vmem:[#allocation83_spill] sm:$0xff] }
 0x1fe   : > { %v7180_v59 = vpack.c.bf16 %v4119_v22, %v4118_v61  ;;  %v3769_v40 = vmul.f32 %v3711_v17, %v3641_v8  ;;  %v2687_v9 = vpop.f32.mrf.mxu1  ;;  %3441 = vmatprep.subr.bf16.mxu1 %v6348_v14  ;;  %v9341_v6 = vadd.f32 %v2685_v23, %v2492_v1  ;;  %v2496_v33 = vpop.f32.mrf.mxu0  ;;  %v4088_v21 = vmul.f32 %v4029_v2, %v3640_v27  ;;  %v10710_v14 = vld [vmem:[#allocation59_spill] sm:$0xff]  ;;  %v10711_v1 = vld [vmem:[#allocation86_spill] sm:$0xff] }
 0x1ff   : > { %v3713_v28 = vpop.permute.xlu0 %3712  ;;  %4664 = vrot.lane.b32.xlu1 %v9335_v50, %s8322_s27  ;;  %v3800_v30 = vadd.f32 %v3768_v7, %v3672_v42  ;;  %v3992_v39 = vmul.f32 %v3608_v41, %v10709_v13  ;;  %v9347_v48 = vadd.f32 %v2687_v9, %v2494_v46  ;;  %v3993_v42 = vmul.f32 %v3609_v24, %v10711_v1  ;;  %v3610_v46 = vld [vmem:[#allocation7 + $0x30] sm:$0xff]  ;;  %v3611_v41 = vld [vmem:[#allocation7 + $0x38] sm:$0xff]  ;;  %v10717_v1 = vld [vmem:[#allocation88_spill] sm:$0xff] }
 0x200   : > { %7748 = vst [vmem:[%s9294_s17 + $0x88] sm:$0xff] %v7180_v59   ;;  %v3801_v10 = vadd.f32 %v3769_v40, %v3673_v12  ;;  %v2689_v4 = vpop.f32.mrf.mxu1  ;;  %3249 = vmatpush2.bf16.msra.mxu0 %v6219_v47  ;;  %3442 = vmatpush2.bf16.msra.mxu1 %v6347_v51  ;;  %v2500_v23 = vpop.f32.mrf.mxu0  ;;  %v10712_v47 = vld [vmem:[#allocation60_spill] sm:$0xff]  ;;  %v10713_v51 = vld [vmem:[#allocation61_spill] sm:$0xff]  ;;  %v3643_v12 = vld [vmem:[#allocation8 + $0x38] sm:$0xff] }
 0x201   : > { %v4031_v22 = vpop.permute.xlu1 %4030  ;;  %4666 = vrot.lane.b32.xlu0 %v9341_v6, %s8322_s27  ;;  %2965 = vmatmul.mubr.bf16.gmra.mxu0 %v10710_v14  ;;  %v10715_v59 = vld [vmem:[#allocation62_spill] sm:$0xff]  ;;  %v4120_v24 = vadd.f32 %v4088_v21, %v3992_v39 }
 0x202   : > { %v7105_v27 = vpack.c.bf16 %v3801_v10, %v3800_v30  ;;  %v4089_v2 = vmul.f32 %v4031_v22, %v3641_v8  ;;  %v2693_v61 = vpop.f32.mrf.mxu1  ;;  %3158 = vmatmul.mubr.bf16.gmra.mxu1 %v10712_v47  ;;  %2974 = vmatprep.mubr.bf16.mxu0 %v10713_v51  ;;  %v2502_v11 = vpop.f32.mrf.mxu0  ;;  %v3770_v8 = vmul.f32 %v3713_v28, %v3642_v49  ;;  %v10716_v22 = vld [vmem:[#allocation85_spill] sm:$0xff] }
 0x203   : > { %v9355_v7 = vadd.f32 %v2693_v61, %v2500_v23  ;;  %v4033_v17 = vpop.permute.xlu0 %4032  ;;  %4347 = vrot.lane.b32.xlu1 %v9347_v48, %s8322_s27  ;;  %3167 = vmatprep.mubr.bf16.mxu1 %v10715_v59  ;;  %v9361_v30 = vadd.f32 %v2689_v4, %v2496_v33  ;;  %v3674_v23 = vmul.f32 %v3610_v46, %v10716_v22 }
 0x204   : > { %7733 = vst [vmem:[%s9294_s17 + $0x10] sm:$0xff] %v7105_v27   ;;  %v4121_v40 = vadd.f32 %v4089_v2, %v3993_v42  ;;  %v2695_v9 = vpop.f32.mrf.mxu1  ;;  %v2504_v13 = vpop.f32.mrf.mxu0  ;;  %v3675_v61 = vmul.f32 %v3611_v41, %v10717_v1  ;;  %v4090_v39 = vmul.f32 %v4033_v17, %v3642_v49  ;;  %v10719_v2 = vld [vmem:[#allocation87_spill] sm:$0xff]  ;;  %v10724_v17 = vld [vmem:[#allocation65_spill] sm:$0xff] }
 0x205   : > { %10714 = vst [vmem:[#allocation82_spill] sm:$0xff] %v9355_v7  ;;  %v3715_v10 = vpop.permute.xlu1 %3714  ;;  %4349 = vrot.lane.b32.xlu0 %v9355_v7, %s8322_s27  ;;  %v9367_v21 = vadd.f32 %v2695_v9, %v2502_v11  ;;  %v3802_v4 = vadd.f32 %v3770_v8, %v3674_v23  ;;  %v3994_v14 = vmul.f32 %v3610_v46, %v10719_v2  ;;  %v3644_v1 = vld [vmem:[#allocation8 + $0x40] sm:$0xff]  ;;  %v10722_v9 = vld [vmem:[#allocation90_spill] sm:$0xff]  ;;  %v3645_v2 = vld [vmem:[#allocation8 + $0x48] sm:$0xff] }
 0x206   : > { %v7185_v51 = vpack.c.bf16 %v4121_v40, %v4120_v24  ;;  %v3771_v47 = vmul.f32 %v3715_v10, %v3643_v12  ;;  %v2697_v59 = vpop.f32.mrf.mxu1  ;;  %v2506_v33 = vpop.f32.mrf.mxu0  ;;  %v10721_v40 = vld [vmem:[#allocation63_spill] sm:$0xff]  ;;  %v3995_v10 = vmul.f32 %v3611_v41, %v10722_v9 }
 0x207   : > { %10718 = vst [vmem:[#allocation81_spill] sm:$0xff] %v9367_v21  ;;  %v3717_v28 = vpop.permute.xlu0 %3716  ;;  %4668 = vrot.lane.b32.xlu1 %v9361_v30, %s8322_s27  ;;  %v9373_v22 = vadd.f32 %v2697_v59, %v2504_v13  ;;  %v3612_v46 = vld [vmem:[#allocation7 + $0x40] sm:$0xff]  ;;  %v3613_v59 = vld [vmem:[#allocation7 + $0x48] sm:$0xff]  ;;  %v4122_v41 = vadd.f32 %v4090_v39, %v3994_v14 }
 0x208   : > { %7749 = vst [vmem:[%s9294_s17 + $0x90] sm:$0xff] %v7185_v51   ;;  %v3803_v42 = vadd.f32 %v3771_v47, %v3675_v61  ;;  %v2699_v27 = vpop.f32.mrf.mxu1  ;;  %v2510_v11 = vpop.f32.mrf.mxu0  ;;  %v10723_v47 = vld [vmem:[#allocation64_spill] sm:$0xff] }
 0x209   : > { %10720 = vst [vmem:[#allocation84_spill] sm:$0xff] %v9373_v22  ;;  %v4035_v24 = vpop.permute.xlu1 %4034  ;;  %4670 = vrot.lane.b32.xlu0 %v9367_v21, %s8322_s27  ;;  %2975 = vmatmul.mubr.bf16.gmra.mxu0 %v10721_v40  ;;  %v10726_v40 = vld [vmem:[#allocation66_spill] sm:$0xff] }
 0x20a   : > { %v7110_v8 = vpack.c.bf16 %v3803_v42, %v3802_v4  ;;  %v4091_v51 = vmul.f32 %v4035_v24, %v3643_v12  ;;  %v2703_v49 = vpop.f32.mrf.mxu1  ;;  %3168 = vmatmul.mubr.bf16.gmra.mxu1 %v10723_v47  ;;  %2984 = vmatprep.mubr.bf16.mxu0 %v10724_v17  ;;  %v2512_v61 = vpop.f32.mrf.mxu0  ;;  %v3772_v12 = vmul.f32 %v3717_v28, %v3644_v1  ;;  %v10729_v47 = vld [vmem:[#allocation92_spill] sm:$0xff] }
 0x20b   : > { %v9381_v13 = vadd.f32 %v2703_v49, %v2510_v11  ;;  %v4037_v23 = vpop.permute.xlu0 %4036  ;;  %4351 = vrot.lane.b32.xlu1 %v9373_v22, %s8322_s27  ;;  %3177 = vmatprep.mubr.bf16.mxu1 %v10726_v40  ;;  %v9387_v24 = vadd.f32 %v2699_v27, %v2506_v33  ;;  %v10728_v49 = vld [vmem:[#allocation89_spill] sm:$0xff]  ;;  %v3677_v21 = vmul.f32 %v3613_v59, %v10729_v47 }
 0x20c   : > { %7734 = vst [vmem:[%s9294_s17 + $0x18] sm:$0xff] %v7110_v8   ;;  %v4123_v4 = vadd.f32 %v4091_v51, %v3995_v10  ;;  %v2705_v42 = vpop.f32.mrf.mxu1  ;;  %v2514_v11 = vpop.f32.mrf.mxu0  ;;  %v3676_v17 = vmul.f32 %v3612_v46, %v10728_v49  ;;  %v4092_v27 = vmul.f32 %v4037_v23, %v3644_v1  ;;  %v10731_v51 = vld [vmem:[#allocation91_spill] sm:$0xff]  ;;  %v3646_v47 = vld [vmem:[#allocation8 + $0x50] sm:$0xff] }
 0x20d   : > { %10725 = vst [vmem:[#allocation83_spill] sm:$0xff] %v9381_v13  ;;  %10727 = vst [vmem:[#allocation86_spill] sm:$0xff] %v9387_v24  ;;  %v3719_v9 = vpop.permute.xlu1 %3718  ;;  %4353 = vrot.lane.b32.xlu0 %v9381_v13, %s8322_s27  ;;  %v9393_v14 = vadd.f32 %v2705_v42, %v2512_v61  ;;  %v3996_v13 = vmul.f32 %v3612_v46, %v10731_v51  ;;  %v10734_v42 = vld [vmem:[#allocation94_spill] sm:$0xff] }
 0x20e   : > { %v7190_v22 = vpack.c.bf16 %v4123_v4, %v4122_v41  ;;  %v3773_v7 = vmul.f32 %v3719_v9, %v3645_v2  ;;  %v2707_v40 = vpop.f32.mrf.mxu1  ;;  %v2516_v33 = vpop.f32.mrf.mxu0  ;;  %v3804_v39 = vadd.f32 %v3772_v12, %v3676_v17  ;;  %v10733_v4 = vld [vmem:[#allocation67_spill] sm:$0xff]  ;;  %v3997_v9 = vmul.f32 %v3613_v59, %v10734_v42  ;;  %v3615_v46 = vld [vmem:[#allocation7 + $0x58] sm:$0xff] }
 0x20f   : > { %10730 = vst [vmem:[#allocation85_spill] sm:$0xff] %v9393_v14  ;;  %v3721_v28 = vpop.permute.xlu0 %3720  ;;  %4672 = vrot.lane.b32.xlu1 %v9387_v24, %s8322_s27  ;;  %v9399_v49 = vadd.f32 %v2707_v40, %v2514_v11  ;;  %v3614_v40 = vld [vmem:[#allocation7 + $0x50] sm:$0xff]  ;;  %v3647_v51 = vld [vmem:[#allocation8 + $0x58] sm:$0xff]  ;;  %v4124_v59 = vadd.f32 %v4092_v27, %v3996_v13 }
 0x210   : > { %7750 = vst [vmem:[%s9294_s17 + $0x98] sm:$0xff] %v7190_v22   ;;  %v3805_v10 = vadd.f32 %v3773_v7, %v3677_v21  ;;  %v2709_v8 = vpop.f32.mrf.mxu1  ;;  %v2520_v61 = vpop.f32.mrf.mxu0  ;;  %v10735_v7 = vld [vmem:[#allocation68_spill] sm:$0xff]  ;;  %v10736_v21 = vld [vmem:[#allocation69_spill] sm:$0xff] }
 0x211   : > { %10732 = vst [vmem:[#allocation88_spill] sm:$0xff] %v9399_v49  ;;  %v4039_v41 = vpop.permute.xlu1 %4038  ;;  %4674 = vrot.lane.b32.xlu0 %v9393_v14, %s8322_s27  ;;  %2985 = vmatmul.mubr.bf16.gmra.mxu0 %v10733_v4  ;;  %v10738_v4 = vld [vmem:[#allocation70_spill] sm:$0xff] }
 0x212   : > { %v7115_v17 = vpack.c.bf16 %v3805_v10, %v3804_v39  ;;  %v4093_v22 = vmul.f32 %v4039_v41, %v3645_v2  ;;  %v2713_v1 = vpop.f32.mrf.mxu1  ;;  %3178 = vmatmul.mubr.bf16.gmra.mxu1 %v10735_v7  ;;  %2994 = vmatprep.mubr.bf16.mxu0 %v10736_v21  ;;  %v2522_v11 = vpop.f32.mrf.mxu0  ;;  %v3774_v2 = vmul.f32 %v3721_v28, %v3646_v47  ;;  %v10741_v7 = vld [vmem:[#allocation96_spill] sm:$0xff] }
 0x213   : > { %v9407_v23 = vadd.f32 %v2713_v1, %v2520_v61  ;;  %v4041_v12 = vpop.permute.xlu0 %4040  ;;  %4355 = vrot.lane.b32.xlu1 %v9399_v49, %s8322_s27  ;;  %3187 = vmatprep.mubr.bf16.mxu1 %v10738_v4  ;;  %v9413_v41 = vadd.f32 %v2709_v8, %v2516_v33  ;;  %v10740_v1 = vld [vmem:[#allocation93_spill] sm:$0xff]  ;;  %v3679_v14 = vmul.f32 %v3615_v46, %v10741_v7  ;;  %v3648_v7 = vld [vmem:[#allocation8 + $0x60] sm:$0xff] }
 0x214   : > { %7735 = vst [vmem:[%s9294_s17 + $0x20] sm:$0xff] %v7115_v17   ;;  %v4125_v39 = vadd.f32 %v4093_v22, %v3997_v9  ;;  %v2715_v10 = vpop.f32.mrf.mxu1  ;;  %v2524_v61 = vpop.f32.mrf.mxu0  ;;  %v3678_v21 = vmul.f32 %v3614_v40, %v10740_v1  ;;  %v4094_v8 = vmul.f32 %v4041_v12, %v3646_v47  ;;  %v10743_v22 = vld [vmem:[#allocation95_spill] sm:$0xff] }
 0x215   : > { %10737 = vst [vmem:[#allocation87_spill] sm:$0xff] %v9407_v23  ;;  %10739 = vst [vmem:[#allocation90_spill] sm:$0xff] %v9413_v41  ;;  %v3723_v42 = vpop.permute.xlu1 %3722  ;;  %4357 = vrot.lane.b32.xlu0 %v9407_v23, %s8322_s27  ;;  %v9419_v13 = vadd.f32 %v2715_v10, %v2522_v11  ;;  %v3998_v23 = vmul.f32 %v3614_v40, %v10743_v22  ;;  %v10746_v10 = vld [vmem:[#allocation98_spill] sm:$0xff]  ;;  %v3617_v40 = vld [vmem:[#allocation7 + $0x68] sm:$0xff] }
 0x216   : > { %v7195_v49 = vpack.c.bf16 %v4125_v39, %v4124_v59  ;;  %v3775_v24 = vmul.f32 %v3723_v42, %v3647_v51  ;;  %v2717_v4 = vpop.f32.mrf.mxu1  ;;  %v2526_v33 = vpop.f32.mrf.mxu0  ;;  %v3806_v27 = vadd.f32 %v3774_v2, %v3678_v21  ;;  %v10745_v39 = vld [vmem:[#allocation71_spill] sm:$0xff]  ;;  %v3999_v42 = vmul.f32 %v3615_v46, %v10746_v10  ;;  %v3649_v22 = vld [vmem:[#allocation8 + $0x68] sm:$0xff] }
 0x217   : > { %10742 = vst [vmem:[#allocation89_spill] sm:$0xff] %v9419_v13  ;;  %v3725_v28 = vpop.permute.xlu0 %3724  ;;  %4676 = vrot.lane.b32.xlu1 %v9413_v41, %s8322_s27  ;;  %v9425_v1 = vadd.f32 %v2717_v4, %v2524_v61  ;;  %v3616_v4 = vld [vmem:[#allocation7 + $0x60] sm:$0xff]  ;;  %v4126_v46 = vadd.f32 %v4094_v8, %v3998_v23 }
 0x218   : > { %7751 = vst [vmem:[%s9294_s17 + $0xa0] sm:$0xff] %v7195_v49   ;;  %v3807_v9 = vadd.f32 %v3775_v24, %v3679_v14  ;;  %v2719_v17 = vpop.f32.mrf.mxu1  ;;  %v2530_v11 = vpop.f32.mrf.mxu0  ;;  %v10747_v24 = vld [vmem:[#allocation72_spill] sm:$0xff]  ;;  %v10748_v14 = vld [vmem:[#allocation73_spill] sm:$0xff] }
 0x219   : > { %10744 = vst [vmem:[#allocation92_spill] sm:$0xff] %v9425_v1  ;;  %v4043_v59 = vpop.permute.xlu1 %4042  ;;  %4678 = vrot.lane.b32.xlu0 %v9419_v13, %s8322_s27  ;;  %2995 = vmatmul.mubr.bf16.gmra.mxu0 %v10745_v39  ;;  %v10750_v39 = vld [vmem:[#allocation74_spill] sm:$0xff] }
 0x21a   : > { %v7120_v21 = vpack.c.bf16 %v3807_v9, %v3806_v27  ;;  %v4095_v49 = vmul.f32 %v4043_v59, %v3647_v51  ;;  %v2723_v47 = vpop.f32.mrf.mxu1  ;;  %3188 = vmatmul.mubr.bf16.gmra.mxu1 %v10747_v24  ;;  %3004 = vmatprep.mubr.bf16.mxu0 %v10748_v14  ;;  %v2532_v61 = vpop.f32.mrf.mxu0  ;;  %v3776_v51 = vmul.f32 %v3725_v28, %v3648_v7  ;;  %v10752_v24 = vld [vmem:[#allocation100_spill] sm:$0xff] }
 0x21b   : > { %v9433_v12 = vadd.f32 %v2723_v47, %v2530_v11  ;;  %v4045_v2 = vpop.permute.xlu0 %4044  ;;  %4359 = vrot.lane.b32.xlu1 %v9425_v1, %s8322_s27  ;;  %3197 = vmatprep.mubr.bf16.mxu1 %v10750_v39  ;;  %v9439_v59 = vadd.f32 %v2719_v17, %v2526_v33  ;;  %v10751_v47 = vld [vmem:[#allocation97_spill] sm:$0xff]  ;;  %v3681_v13 = vmul.f32 %v3617_v40, %v10752_v24 }
 0x21c   : > { %7736 = vst [vmem:[%s9294_s17 + $0x28] sm:$0xff] %v7120_v21   ;;  %v4127_v27 = vadd.f32 %v4095_v49, %v3999_v42  ;;  %v2725_v9 = vpop.f32.mrf.mxu1  ;;  %v2534_v11 = vpop.f32.mrf.mxu0  ;;  %v3680_v14 = vmul.f32 %v3616_v4, %v10751_v47  ;;  %v4096_v17 = vmul.f32 %v4045_v2, %v3648_v7  ;;  %v10754_v49 = vld [vmem:[#allocation99_spill] sm:$0xff]  ;;  %v3650_v24 = vld [vmem:[#allocation8 + $0x70] sm:$0xff] }
 0x21d   : > { %10749 = vst [vmem:[#allocation91_spill] sm:$0xff] %v9433_v12  ;;  %v3727_v10 = vpop.permute.xlu1 %3726  ;;  %4361 = vrot.lane.b32.xlu0 %v9433_v12, %s8322_s27  ;;  %v9445_v23 = vadd.f32 %v2725_v9, %v2532_v61  ;;  %v4000_v12 = vmul.f32 %v3616_v4, %v10754_v49  ;;  %v10757_v9 = vld [vmem:[#allocation102_spill] sm:$0xff] }
 0x21e   : > { %v7200_v1 = vpack.c.bf16 %v4127_v27, %v4126_v46  ;;  %v3777_v41 = vmul.f32 %v3727_v10, %v3649_v22  ;;  %v2727_v39 = vpop.f32.mrf.mxu1  ;;  %v2536_v33 = vpop.f32.mrf.mxu0  ;;  %v3808_v8 = vadd.f32 %v3776_v51, %v3680_v14  ;;  %v10756_v27 = vld [vmem:[#allocation75_spill] sm:$0xff]  ;;  %v4001_v10 = vmul.f32 %v3617_v40, %v10757_v9  ;;  %v3619_v4 = vld [vmem:[#allocation7 + $0x78] sm:$0xff] }
 0x21f   : > { %10753 = vst [vmem:[#allocation94_spill] sm:$0xff] %v9445_v23  ;;  %v3729_v28 = vpop.permute.xlu0 %3728  ;;  %4680 = vrot.lane.b32.xlu1 %v9439_v59, %s8322_s27  ;;  %v9451_v47 = vadd.f32 %v2727_v39, %v2534_v11  ;;  %v3618_v39 = vld [vmem:[#allocation7 + $0x70] sm:$0xff]  ;;  %v3651_v49 = vld [vmem:[#allocation8 + $0x78] sm:$0xff]  ;;  %v4128_v40 = vadd.f32 %v4096_v17, %v4000_v12 }
 0x220   : > { %7752 = vst [vmem:[%s9294_s17 + $0xa8] sm:$0xff] %v7200_v1   ;;  %v3809_v42 = vadd.f32 %v3777_v41, %v3681_v13  ;;  %v2729_v21 = vpop.f32.mrf.mxu1  ;;  %v2540_v61 = vpop.f32.mrf.mxu0  ;;  %v10758_v41 = vld [vmem:[#allocation76_spill] sm:$0xff]  ;;  %v10759_v13 = vld [vmem:[#allocation77_spill] sm:$0xff] }
 0x221   : > { %10755 = vst [vmem:[#allocation93_spill] sm:$0xff] %v9451_v47  ;;  %v4047_v46 = vpop.permute.xlu1 %4046  ;;  %4682 = vrot.lane.b32.xlu0 %v9445_v23, %s8322_s27  ;;  %3005 = vmatmul.mubr.bf16.gmra.mxu0 %v10756_v27  ;;  %v10761_v27 = vld [vmem:[#allocation78_spill] sm:$0xff] }
 0x222   : > { %v7125_v14 = vpack.c.bf16 %v3809_v42, %v3808_v8  ;;  %v4097_v1 = vmul.f32 %v4047_v46, %v3649_v22  ;;  %v2733_v7 = vpop.f32.mrf.mxu1  ;;  %3198 = vmatmul.mubr.bf16.gmra.mxu1 %v10758_v41  ;;  %3014 = vmatprep.mubr.bf16.mxu0 %v10759_v13  ;;  %v2542_v11 = vpop.f32.mrf.mxu0  ;;  %v3778_v22 = vmul.f32 %v3729_v28, %v3650_v24 }
 0x223   : > { %v9459_v2 = vadd.f32 %v2733_v7, %v2540_v61  ;;  %v4049_v51 = vpop.permute.xlu0 %4048  ;;  %4363 = vrot.lane.b32.xlu1 %v9451_v47, %s8322_s27  ;;  %3207 = vmatprep.mubr.bf16.mxu1 %v10761_v27  ;;  %v9465_v46 = vadd.f32 %v2729_v21, %v2536_v33  ;;  %v10762_v7 = vld [vmem:[#allocation101_spill] sm:$0xff]  ;;  %v3683_v41 = vmul.f32 %v3619_v4, %v9065_v38  ;;  %v3652_v38 = vld [vmem:[#allocation8 + $0x80] sm:$0xff] }
 0x224   : > { %7737 = vst [vmem:[%s9294_s17 + $0x30] sm:$0xff] %v7125_v14   ;;  %v4129_v8 = vadd.f32 %v4097_v1, %v4001_v10  ;;  %v2735_v42 = vpop.f32.mrf.mxu1  ;;  %v2544_v61 = vpop.f32.mrf.mxu0  ;;  %v3682_v13 = vmul.f32 %v3618_v39, %v10762_v7  ;;  %v4098_v21 = vmul.f32 %v4049_v51, %v3650_v24  ;;  %v10764_v1 = vld [vmem:[#allocation103_spill] sm:$0xff] }
 0x225   : > { %10760 = vst [vmem:[#allocation96_spill] sm:$0xff] %v9459_v2  ;;  %v3731_v9 = vpop.permute.xlu1 %3730  ;;  %4365 = vrot.lane.b32.xlu0 %v9459_v2, %s8322_s27  ;;  %v9471_v12 = vadd.f32 %v2735_v42, %v2542_v11  ;;  %v4002_v2 = vmul.f32 %v3618_v39, %v10764_v1  ;;  %v4003_v42 = vmul.f32 %v3619_v4, %v9083_v5  ;;  %v3621_v39 = vld [vmem:[#allocation7 + $0x88] sm:$0xff] }
 0x226   : > { %v7205_v23 = vpack.c.bf16 %v4129_v8, %v4128_v40  ;;  %v3779_v47 = vmul.f32 %v3731_v9, %v3651_v49  ;;  %v2737_v27 = vpop.f32.mrf.mxu1  ;;  %v2546_v33 = vpop.f32.mrf.mxu0  ;;  %v3810_v17 = vadd.f32 %v3778_v22, %v3682_v13  ;;  %v10765_v8 = vld [vmem:[#allocation79_spill] sm:$0xff]  ;;  %v10768_v1 = vld [vmem:[#allocation20_spill] sm:$0xff] }
 0x227   : > { %10763 = vst [vmem:[#allocation95_spill] sm:$0xff] %v9471_v12  ;;  %v3733_v28 = vpop.permute.xlu0 %3732  ;;  %4684 = vrot.lane.b32.xlu1 %v9465_v46, %s8322_s27  ;;  %v9477_v7 = vadd.f32 %v2737_v27, %v2544_v61  ;;  %v3620_v27 = vld [vmem:[#allocation7 + $0x80] sm:$0xff]  ;;  %v3653_v61 = vld [vmem:[#allocation8 + $0x88] sm:$0xff]  ;;  %v4130_v5 = vadd.f32 %v4098_v21, %v4002_v2 }
 0x228   : > { %7753 = vst [vmem:[%s9294_s17 + $0xb0] sm:$0xff] %v7205_v23   ;;  %v3811_v10 = vadd.f32 %v3779_v47, %v3683_v41  ;;  %v2739_v14 = vpop.f32.mrf.mxu1  ;;  %v2550_v11 = vpop.f32.mrf.mxu0  ;;  %v10766_v47 = vld [vmem:[#allocation80_spill] sm:$0xff]  ;;  %v10767_v41 = vld [vmem:[#allocation19_spill] sm:$0xff]  ;;  %v3780_v4 = vmul.f32 %v3733_v28, %v3652_v38 }
 0x229   : > { %v4051_v40 = vpop.permute.xlu1 %4050  ;;  %4686 = vrot.lane.b32.xlu0 %v9471_v12, %s8322_s27  ;;  %3015 = vmatmul.mubr.bf16.gmra.mxu0 %v10765_v8 }
 0x22a   : > { %v7130_v13 = vpack.c.bf16 %v3811_v10, %v3810_v17  ;;  %v4099_v23 = vmul.f32 %v4051_v40, %v3651_v49  ;;  %v2743_v24 = vpop.f32.mrf.mxu1  ;;  %3208 = vmatmul.mubr.bf16.gmra.mxu1 %v10766_v47  ;;  %3250 = vmatprep.mubr.bf16.mxu0 %v10767_v41  ;;  %v2552_v9 = vpop.f32.mrf.mxu0  ;;  %v9491_v10 = vadd.f32 %v2739_v14, %v2546_v33 }
 0x22b   : > { %v9485_v51 = vadd.f32 %v2743_v24, %v2550_v11  ;;  %v4053_v22 = vpop.permute.xlu0 %4052  ;;  %4367 = vrot.lane.b32.xlu1 %v9477_v7, %s8322_s27  ;;  %3443 = vmatprep.mubr.bf16.mxu1 %v10768_v1  ;;  %v10769_v24 = vld [vmem:[#allocation104_spill] sm:$0xff]  ;;  %v3685_v47 = vmul.f32 %v3621_v39, %v9091_v43  ;;  %v3654_v43 = vld [vmem:[#allocation8 + $0x90] sm:$0xff] }
 0x22c   : > { %7738 = vst [vmem:[%s9294_s17 + $0x38] sm:$0xff] %v7130_v13   ;;  %v4131_v49 = vadd.f32 %v4099_v23, %v4003_v42  ;;  %v2745_v17 = vpop.f32.mrf.mxu1  ;;  %v2554_v11 = vpop.f32.mrf.mxu0  ;;  %v3684_v41 = vmul.f32 %v3620_v27, %v10769_v24  ;;  %v4100_v14 = vmul.f32 %v4053_v22, %v3652_v38  ;;  %v4004_v23 = vmul.f32 %v3620_v27, %v9087_v58  ;;  %v3622_v58 = vld [vmem:[#allocation7 + $0x90] sm:$0xff]  ;;  %v3623_v27 = vld [vmem:[#allocation7 + $0x98] sm:$0xff] }
 0x22d   : > { %v3735_v40 = vpop.permute.xlu1 %3734  ;;  %4369 = vrot.lane.b32.xlu0 %v9485_v51, %s8322_s27  ;;  %v9497_v2 = vadd.f32 %v2745_v17, %v2552_v9  ;;  %v4005_v17 = vmul.f32 %v3621_v39, %v9103_v44 }
 0x22e   : > { %v7210_v8 = vpack.c.bf16 %v4131_v49, %v4130_v5  ;;  %v3781_v12 = vmul.f32 %v3735_v40, %v3653_v61  ;;  %v2747_v1 = vpop.f32.mrf.mxu1  ;;  %v2556_v33 = vpop.f32.mrf.mxu0  ;;  %v3812_v21 = vadd.f32 %v3780_v4, %v3684_v41  ;;  %v10770_v49 = vld [vmem:[#allocation21_spill] sm:$0xff]  ;;  %v3655_v41 = vld [vmem:[#allocation8 + $0x98] sm:$0xff]  ;;  %v4132_v44 = vadd.f32 %v4100_v14, %v4004_v23 }
 0x22f   : > { %v3737_v28 = vpop.permute.xlu0 %3736  ;;  %4688 = vrot.lane.b32.xlu1 %v9491_v10, %s8322_s27  ;;  %v9503_v24 = vadd.f32 %v2747_v1, %v2554_v11  ;;  %v10773_v1 = vld [vmem:[#allocation24_spill] sm:$0xff] }
 0x230   : > { %7754 = vst [vmem:[%s9294_s17 + $0xb8] sm:$0xff] %v7210_v8   ;;  %v3813_v42 = vadd.f32 %v3781_v12, %v3685_v47  ;;  %v2749_v13 = vpop.f32.mrf.mxu1  ;;  %v2560_v9 = vpop.f32.mrf.mxu0  ;;  %v10771_v12 = vld [vmem:[#allocation22_spill] sm:$0xff]  ;;  %v10772_v47 = vld [vmem:[#allocation23_spill] sm:$0xff]  ;;  %v3782_v39 = vmul.f32 %v3737_v28, %v3654_v43 }
 0x231   : > { %v4055_v5 = vpop.permute.xlu1 %4054  ;;  %4690 = vrot.lane.b32.xlu0 %v9497_v2, %s8322_s27  ;;  %3251 = vmatmul.mubr.bf16.vlgmr.msra.gmra.mxu0 %v10770_v49  ;;  %v3686_v49 = vmul.f32 %v3622_v58, %v9098_v63 }
 0x232   : > { %v7135_v4 = vpack.c.bf16 %v3813_v42, %v3812_v21  ;;  %v4101_v8 = vmul.f32 %v4055_v5, %v3653_v61  ;;  %v2753_v38 = vpop.f32.mrf.mxu1  ;;  %3444 = vmatmul.mubr.bf16.vlgmr.msra.gmra.mxu1 %v10771_v12  ;;  %3260 = vmatprep.mubr.bf16.mxu0 %v10772_v47  ;;  %v2562_v11 = vpop.f32.mrf.mxu0  ;;  %v9517_v42 = vadd.f32 %v2749_v13, %v2556_v33 }
 0x233   : > { %v9511_v22 = vadd.f32 %v2753_v38, %v2560_v9  ;;  %v4057_v40 = vpop.permute.xlu0 %4056  ;;  %4371 = vrot.lane.b32.xlu1 %v9503_v24, %s8322_s27  ;;  %3453 = vmatprep.mubr.bf16.mxu1 %v10773_v1  ;;  %v3687_v38 = vmul.f32 %v3623_v27, %v9111_v37  ;;  %v3814_v13 = vadd.f32 %v3782_v39, %v3686_v49  ;;  %v3656_v37 = vld [vmem:[#allocation8 + $0xa0] sm:$0xff] }
 0x234   : > { %7739 = vst [vmem:[%s9294_s17 + $0x40] sm:$0xff] %v7135_v4   ;;  %v4133_v61 = vadd.f32 %v4101_v8, %v4005_v17  ;;  %v2755_v21 = vpop.f32.mrf.mxu1  ;;  %v2564_v9 = vpop.f32.mrf.mxu0  ;;  %v4102_v23 = vmul.f32 %v4057_v40, %v3654_v43  ;;  %v4006_v8 = vmul.f32 %v3622_v58, %v9107_v26  ;;  %v10775_v40 = vld [vmem:[#allocation26_spill] sm:$0xff]  ;;  %v10776_v49 = vld [vmem:[#allocation27_spill] sm:$0xff]  ;;  %v3625_v58 = vld [vmem:[#allocation7 + $0xa8] sm:$0xff] }
 0x235   : > { %v3739_v5 = vpop.permute.xlu1 %3738  ;;  %4373 = vrot.lane.b32.xlu0 %v9511_v22, %s8322_s27  ;;  %v9523_v14 = vadd.f32 %v2755_v21, %v2562_v11  ;;  %v4007_v21 = vmul.f32 %v3623_v27, %v9123_v25  ;;  %v3624_v26 = vld [vmem:[#allocation7 + $0xa0] sm:$0xff] }
 0x236   : > { %v7215_v12 = vpack.c.bf16 %v4133_v61, %v4132_v44  ;;  %v3783_v47 = vmul.f32 %v3739_v5, %v3655_v41  ;;  %v2757_v1 = vpop.f32.mrf.mxu1  ;;  %v2566_v33 = vpop.f32.mrf.mxu0  ;;  %v10774_v61 = vld [vmem:[#allocation25_spill] sm:$0xff]  ;;  %v4134_v25 = vadd.f32 %v4102_v23, %v4006_v8 }
 0x237   : > { %v3741_v28 = vpop.permute.xlu0 %3740  ;;  %4692 = vrot.lane.b32.xlu1 %v9517_v42, %s8322_s27  ;;  %v9529_v63 = vadd.f32 %v2757_v1, %v2564_v9  ;;  %v10777_v1 = vld [vmem:[#allocation28_spill] sm:$0xff] }
 0x238   : > { %7755 = vst [vmem:[%s9294_s17 + $0xc0] sm:$0xff] %v7215_v12   ;;  %v3815_v17 = vadd.f32 %v3783_v47, %v3687_v38  ;;  %v2759_v4 = vpop.f32.mrf.mxu1  ;;  %v2570_v11 = vpop.f32.mrf.mxu0  ;;  %v3657_v47 = vld [vmem:[#allocation8 + $0xa8] sm:$0xff]  ;;  %v3784_v27 = vmul.f32 %v3741_v28, %v3656_v37 }
 0x239   : > { %v4059_v44 = vpop.permute.xlu1 %4058  ;;  %4694 = vrot.lane.b32.xlu0 %v9523_v14, %s8322_s27  ;;  %3261 = vmatmul.mubr.bf16.gmra.mxu0 %v10774_v61  ;;  %v3688_v61 = vmul.f32 %v3624_v26, %v9118_v57 }
 0x23a   : > { %v7140_v39 = vpack.c.bf16 %v3815_v17, %v3814_v13  ;;  %v4103_v5 = vmul.f32 %v4059_v44, %v3655_v41  ;;  %v2763_v43 = vpop.f32.mrf.mxu1  ;;  %3454 = vmatmul.mubr.bf16.gmra.mxu1 %v10775_v40  ;;  %3270 = vmatprep.mubr.bf16.mxu0 %v10776_v49  ;;  %v2572_v12 = vpop.f32.mrf.mxu0  ;;  %v9543_v17 = vadd.f32 %v2759_v4, %v2566_v33 }
 0x23b   : > { %v9537_v9 = vadd.f32 %v2763_v43, %v2570_v11  ;;  %v4061_v38 = vpop.permute.xlu0 %4060  ;;  %4375 = vrot.lane.b32.xlu1 %v9529_v63, %s8322_s27  ;;  %3463 = vmatprep.mubr.bf16.mxu1 %v10777_v1  ;;  %v3689_v43 = vmul.f32 %v3625_v58, %v9131_v19  ;;  %v3816_v4 = vadd.f32 %v3784_v27, %v3688_v61  ;;  %v3658_v19 = vld [vmem:[#allocation8 + $0xb0] sm:$0xff] }
 0x23c   : > { %7740 = vst [vmem:[%s9294_s17 + $0x48] sm:$0xff] %v7140_v39   ;;  %v4135_v41 = vadd.f32 %v4103_v5, %v4007_v21  ;;  %v2765_v13 = vpop.f32.mrf.mxu1  ;;  %v2574_v11 = vpop.f32.mrf.mxu0  ;;  %v4104_v8 = vmul.f32 %v4061_v38, %v3656_v37  ;;  %v4008_v5 = vmul.f32 %v3624_v26, %v9127_v53  ;;  %v10778_v38 = vld [vmem:[#allocation29_spill] sm:$0xff]  ;;  %v3627_v26 = vld [vmem:[#allocation7 + $0xb8] sm:$0xff] }
 0x23d   : > { %v3743_v44 = vpop.permute.xlu1 %3742  ;;  %4377 = vrot.lane.b32.xlu0 %v9537_v9, %s8322_s27  ;;  %v9549_v23 = vadd.f32 %v2765_v13, %v2572_v12  ;;  %v3626_v53 = vld [vmem:[#allocation7 + $0xb0] sm:$0xff] }
 0x23e   : > { %v7220_v40 = vpack.c.bf16 %v4135_v41, %v4134_v25  ;;  %v3785_v49 = vmul.f32 %v3743_v44, %v3657_v47  ;;  %v2767_v1 = vpop.f32.mrf.mxu1  ;;  %v2576_v33 = vpop.f32.mrf.mxu0  ;;  %v4009_v41 = vmul.f32 %v3625_v58, %v9143_v45  ;;  %v10779_v44 = vld [vmem:[#allocation30_spill] sm:$0xff]  ;;  %v4136_v45 = vadd.f32 %v4104_v8, %v4008_v5 }
 0x23f   : > { %v3745_v28 = vpop.permute.xlu0 %3744  ;;  %4696 = vrot.lane.b32.xlu1 %v9543_v17, %s8322_s27  ;;  %v9555_v57 = vadd.f32 %v2767_v1, %v2574_v11 }
 0x240   : > { %7756 = vst [vmem:[%s9294_s17 + $0xc8] sm:$0xff] %v7220_v40   ;;  %v3817_v21 = vadd.f32 %v3785_v49, %v3689_v43  ;;  %v2769_v39 = vpop.f32.mrf.mxu1  ;;  %v2580_v12 = vpop.f32.mrf.mxu0  ;;  %v10780_v40 = vld [vmem:[#allocation31_spill] sm:$0xff]  ;;  %v3786_v58 = vmul.f32 %v3745_v28, %v3658_v19 }
 0x241   : > { %v4063_v25 = vpop.permute.xlu1 %4062  ;;  %4698 = vrot.lane.b32.xlu0 %v9549_v23, %s8322_s27  ;;  %3271 = vmatmul.mubr.bf16.gmra.mxu0 %v8581_v15  ;;  %v3659_v15 = vld [vmem:[#allocation8 + $0xb8] sm:$0xff]  ;;  %v9569_v1 = vadd.f32 %v2769_v39, %v2576_v33 }
 0x242   : > { %v7145_v27 = vpack.c.bf16 %v3817_v21, %v3816_v4  ;;  %v4105_v13 = vmul.f32 %v4063_v25, %v3657_v47  ;;  %v2773_v37 = vpop.f32.mrf.mxu1  ;;  %3464 = vmatmul.mubr.bf16.gmra.mxu1 %v10778_v38  ;;  %3280 = vmatprep.mubr.bf16.mxu0 %v10779_v44  ;;  %v2582_v43 = vpop.f32.mrf.mxu0  ;;  %v3690_v25 = vmul.f32 %v3626_v53, %v9138_v18 }
 0x243   : > { %v9563_v11 = vadd.f32 %v2773_v37, %v2580_v12  ;;  %v4065_v61 = vpop.permute.xlu0 %4064  ;;  %4379 = vrot.lane.b32.xlu1 %v9555_v57, %s8322_s27  ;;  %3473 = vmatprep.mubr.bf16.mxu1 %v10780_v40  ;;  %v3691_v12 = vmul.f32 %v3627_v26, %v9151_v34  ;;  %v3660_v34 = vld [vmem:[#allocation8 + $0xc0] sm:$0xff] }
 0x244   : > { %7741 = vst [vmem:[%s9294_s17 + $0x50] sm:$0xff] %v7145_v27   ;;  %v4137_v47 = vadd.f32 %v4105_v13, %v4009_v41  ;;  %v2775_v49 = vpop.f32.mrf.mxu1  ;;  %v2584_v21 = vpop.f32.mrf.mxu0  ;;  %v3818_v39 = vadd.f32 %v3786_v58, %v3690_v25  ;;  %v4106_v5 = vmul.f32 %v4065_v61, %v3658_v19  ;;  %v10781_v13 = vld [vmem:[#allocation105_spill] sm:$0xff]  ;;  %v10784_v25 = vld [vmem:[#allocation34_spill] sm:$0xff] }
 0x245   : > { %v3747_v4 = vpop.permute.xlu1 %3746  ;;  %4381 = vrot.lane.b32.xlu0 %v9563_v11, %s8322_s27  ;;  %v9575_v8 = vadd.f32 %v2775_v49, %v2582_v43  ;;  %v4010_v40 = vmul.f32 %v3626_v53, %v10781_v13  ;;  %v4011_v49 = vmul.f32 %v3627_v26, %v9163_v0  ;;  %v10783_v61 = vld [vmem:[#allocation33_spill] sm:$0xff]  ;;  %v3628_v53 = vld [vmem:[#allocation7 + $0xc0] sm:$0xff] }
 0x246   : > { %v7225_v37 = vpack.c.bf16 %v4137_v47, %v4136_v45  ;;  %v3787_v38 = vmul.f32 %v3747_v4, %v3659_v15  ;;  %v2777_v44 = vpop.f32.mrf.mxu1  ;;  %v2586_v33 = vpop.f32.mrf.mxu0  ;;  %v10782_v47 = vld [vmem:[#allocation32_spill] sm:$0xff]  ;;  %v10785_v13 = vld [vmem:[#allocation35_spill] sm:$0xff] }
 0x247   : > { %v3749_v28 = vpop.permute.xlu0 %3748  ;;  %4700 = vrot.lane.b32.xlu1 %v9569_v1, %s8322_s27  ;;  %v9581_v18 = vadd.f32 %v2777_v44, %v2584_v21  ;;  %v3629_v21 = vld [vmem:[#allocation7 + $0xc8] sm:$0xff]  ;;  %v4138_v0 = vadd.f32 %v4106_v5, %v4010_v40 }
 0x248   : > { %7757 = vst [vmem:[%s9294_s17 + $0xd0] sm:$0xff] %v7225_v37   ;;  %v3819_v41 = vadd.f32 %v3787_v38, %v3691_v12  ;;  %v2779_v27 = vpop.f32.mrf.mxu1  ;;  %v2590_v43 = vpop.f32.mrf.mxu0  ;;  %v3661_v44 = vld [vmem:[#allocation8 + $0xc8] sm:$0xff]  ;;  %v3788_v26 = vmul.f32 %v3749_v28, %v3660_v34 }
 0x249   : > { %v4067_v45 = vpop.permute.xlu1 %4066  ;;  %4702 = vrot.lane.b32.xlu0 %v9575_v8, %s8322_s27  ;;  %3281 = vmatmul.mubr.bf16.gmra.mxu0 %v10782_v47  ;;  %v3692_v47 = vmul.f32 %v3628_v53, %v9158_v3 }
 0x24a   : > { %v7150_v58 = vpack.c.bf16 %v3819_v41, %v3818_v39  ;;  %v4107_v4 = vmul.f32 %v4067_v45, %v3659_v15  ;;  %v2783_v19 = vpop.f32.mrf.mxu1  ;;  %3474 = vmatmul.mubr.bf16.gmra.mxu1 %v10783_v61  ;;  %3290 = vmatprep.mubr.bf16.mxu0 %v10784_v25  ;;  %v2592_v38 = vpop.f32.mrf.mxu0  ;;  %v9595_v41 = vadd.f32 %v2779_v27, %v2586_v33 }
 0x24b   : > { %v9589_v12 = vadd.f32 %v2783_v19, %v2590_v43  ;;  %v4069_v37 = vpop.permute.xlu0 %4068  ;;  %4383 = vrot.lane.b32.xlu1 %v9581_v18, %s8322_s27  ;;  %3483 = vmatprep.mubr.bf16.mxu1 %v10785_v13  ;;  %v3693_v19 = vmul.f32 %v3629_v21, %v9171_v35  ;;  %v3820_v27 = vadd.f32 %v3788_v26, %v3692_v47  ;;  %v3662_v35 = vld [vmem:[#allocation8 + $0xd0] sm:$0xff] }
 0x24c   : > { %7742 = vst [vmem:[%s9294_s17 + $0x58] sm:$0xff] %v7150_v58   ;;  %v4139_v15 = vadd.f32 %v4107_v4, %v4011_v49  ;;  %v2785_v39 = vpop.f32.mrf.mxu1  ;;  %v2594_v43 = vpop.f32.mrf.mxu0  ;;  %v4108_v40 = vmul.f32 %v4069_v37, %v3660_v34  ;;  %v4012_v4 = vmul.f32 %v3628_v53, %v9167_v60  ;;  %v10786_v37 = vld [vmem:[#allocation36_spill] sm:$0xff]  ;;  %v3630_v60 = vld [vmem:[#allocation7 + $0xd0] sm:$0xff]  ;;  %v3631_v53 = vld [vmem:[#allocation7 + $0xd8] sm:$0xff] }
 0x24d   : > { %v3751_v45 = vpop.permute.xlu1 %3750  ;;  %4385 = vrot.lane.b32.xlu0 %v9589_v12, %s8322_s27  ;;  %v9601_v5 = vadd.f32 %v2785_v39, %v2592_v38 }
 0x24e   : > { %v7230_v61 = vpack.c.bf16 %v4139_v15, %v4138_v0  ;;  %v3789_v25 = vmul.f32 %v3751_v45, %v3661_v44  ;;  %v2787_v13 = vpop.f32.mrf.mxu1  ;;  %v2596_v33 = vpop.f32.mrf.mxu0  ;;  %v4013_v15 = vmul.f32 %v3629_v21, %v9183_v52  ;;  %v10787_v45 = vld [vmem:[#allocation37_spill] sm:$0xff]  ;;  %v4140_v52 = vadd.f32 %v4108_v40, %v4012_v4 }
 0x24f   : > { %v3753_v28 = vpop.permute.xlu0 %3752  ;;  %4704 = vrot.lane.b32.xlu1 %v9595_v41, %s8322_s27  ;;  %v9607_v3 = vadd.f32 %v2787_v13, %v2594_v43 }
 0x250   : > { %7758 = vst [vmem:[%s9294_s17 + $0xd8] sm:$0xff] %v7230_v61   ;;  %v3821_v49 = vadd.f32 %v3789_v25, %v3693_v19  ;;  %v2789_v58 = vpop.f32.mrf.mxu1  ;;  %v2600_v38 = vpop.f32.mrf.mxu0  ;;  %v10789_v61 = vld [vmem:[#allocation38_spill] sm:$0xff]  ;;  %v3790_v21 = vmul.f32 %v3753_v28, %v3662_v35 }
 0x251   : > { %v4071_v0 = vpop.permute.xlu1 %4070  ;;  %4706 = vrot.lane.b32.xlu0 %v9601_v5, %s8322_s27  ;;  %3291 = vmatmul.mubr.bf16.gmra.mxu0 %v8633_v29  ;;  %v3663_v29 = vld [vmem:[#allocation8 + $0xd8] sm:$0xff]  ;;  %v9621_v13 = vadd.f32 %v2789_v58, %v2596_v33 }
 0x252   : > { %v7155_v26 = vpack.c.bf16 %v3821_v49, %v3820_v27  ;;  %v4109_v39 = vmul.f32 %v4071_v0, %v3661_v44  ;;  %v2793_v34 = vpop.f32.mrf.mxu1  ;;  %3484 = vmatmul.mubr.bf16.gmra.mxu1 %v10786_v37  ;;  %3300 = vmatprep.mubr.bf16.mxu0 %v10787_v45  ;;  %v2602_v19 = vpop.f32.mrf.mxu0  ;;  %v3694_v0 = vmul.f32 %v3630_v60, %v9178_v62 }
 0x253   : > { %v9615_v43 = vadd.f32 %v2793_v34, %v2600_v38  ;;  %v4073_v47 = vpop.permute.xlu0 %4072  ;;  %4387 = vrot.lane.b32.xlu1 %v9607_v3, %s8322_s27  ;;  %3493 = vmatprep.mubr.bf16.mxu1 %v10789_v61  ;;  %v3695_v38 = vmul.f32 %v3631_v53, %v9195_v55  ;;  %v3664_v55 = vld [vmem:[#allocation8 + $0xe0] sm:$0xff] }
 0x254   : > { %7743 = vst [vmem:[%s9294_s17 + $0x60] sm:$0xff] %v7155_v26   ;;  %v4141_v44 = vadd.f32 %v4109_v39, %v4013_v15  ;;  %v2795_v25 = vpop.f32.mrf.mxu1  ;;  %v2604_v49 = vpop.f32.mrf.mxu0  ;;  %v3822_v58 = vadd.f32 %v3790_v21, %v3694_v0  ;;  %v4110_v4 = vmul.f32 %v4073_v47, %v3662_v35  ;;  %v10791_v39 = vld [vmem:[#allocation106_spill] sm:$0xff]  ;;  %v10795_v47 = vld [vmem:[#allocation40_spill] sm:$0xff] }
 0x255   : > { %10788 = vst [vmem:[#allocation98_spill] sm:$0xff] %v9615_v43  ;;  %v3755_v27 = vpop.permute.xlu1 %3754  ;;  %4389 = vrot.lane.b32.xlu0 %v9615_v43, %s8322_s27  ;;  %v9627_v40 = vadd.f32 %v2795_v25, %v2602_v19  ;;  %v4014_v61 = vmul.f32 %v3630_v60, %v10791_v39  ;;  %v10794_v25 = vld [vmem:[#allocation108_spill] sm:$0xff]  ;;  %v3632_v60 = vld [vmem:[#allocation7 + $0xe0] sm:$0xff] }
 0x256   : > { %v7235_v34 = vpack.c.bf16 %v4141_v44, %v4140_v52  ;;  %v3791_v37 = vmul.f32 %v3755_v27, %v3663_v29  ;;  %v2797_v45 = vpop.f32.mrf.mxu1  ;;  %v2606_v33 = vpop.f32.mrf.mxu0  ;;  %v10793_v44 = vld [vmem:[#allocation39_spill] sm:$0xff]  ;;  %v4015_v27 = vmul.f32 %v3631_v53, %v10794_v25  ;;  %v3665_v39 = vld [vmem:[#allocation8 + $0xe8] sm:$0xff] }
 0x257   : > { %10790 = vst [vmem:[#allocation97_spill] sm:$0xff] %v9627_v40  ;;  %v3757_v28 = vpop.permute.xlu0 %3756  ;;  %4708 = vrot.lane.b32.xlu1 %v9621_v13, %s8322_s27  ;;  %v9633_v62 = vadd.f32 %v2797_v45, %v2604_v49  ;;  %v3633_v49 = vld [vmem:[#allocation7 + $0xe8] sm:$0xff]  ;;  %v4142_v53 = vadd.f32 %v4110_v4, %v4014_v61 }
 0x258   : > { %7759 = vst [vmem:[%s9294_s17 + $0xe0] sm:$0xff] %v7235_v34   ;;  %v3823_v15 = vadd.f32 %v3791_v37, %v3695_v38  ;;  %v2799_v26 = vpop.f32.mrf.mxu1  ;;  %v2610_v19 = vpop.f32.mrf.mxu0  ;;  %v10796_v38 = vld [vmem:[#allocation41_spill] sm:$0xff] }
 0x259   : > { %10792 = vst [vmem:[#allocation100_spill] sm:$0xff] %v9633_v62  ;;  %v4075_v52 = vpop.permute.xlu1 %4074  ;;  %4710 = vrot.lane.b32.xlu0 %v9627_v40, %s8322_s27  ;;  %3301 = vmatmul.mubr.bf16.gmra.mxu0 %v10793_v44  ;;  %v10798_v44 = vld [vmem:[#allocation42_spill] sm:$0xff] }
 0x25a   : > { %v7160_v21 = vpack.c.bf16 %v3823_v15, %v3822_v58  ;;  %v4111_v0 = vmul.f32 %v4075_v52, %v3663_v29  ;;  %v2803_v35 = vpop.f32.mrf.mxu1  ;;  %3494 = vmatmul.mubr.bf16.gmra.mxu1 %v10795_v47  ;;  %3310 = vmatprep.mubr.bf16.mxu0 %v10796_v38  ;;  %v2612_v45 = vpop.f32.mrf.mxu0  ;;  %v3792_v29 = vmul.f32 %v3757_v28, %v3664_v55  ;;  %v10800_v38 = vld [vmem:[#allocation110_spill] sm:$0xff] }
 0x25b   : > { %v9641_v34 = vadd.f32 %v2803_v35, %v2610_v19  ;;  %v4077_v37 = vpop.permute.xlu0 %4076  ;;  %4391 = vrot.lane.b32.xlu1 %v9633_v62, %s8322_s27  ;;  %3503 = vmatprep.mubr.bf16.mxu1 %v10798_v44  ;;  %v9647_v52 = vadd.f32 %v2799_v26, %v2606_v33  ;;  %v10799_v35 = vld [vmem:[#allocation107_spill] sm:$0xff]  ;;  %v3697_v40 = vmul.f32 %v3633_v49, %v10800_v38  ;;  %v3666_v38 = vld [vmem:[#allocation8 + $0xf0] sm:$0xff] }
 0x25c   : > { %7744 = vst [vmem:[%s9294_s17 + $0x68] sm:$0xff] %v7160_v21   ;;  %v4143_v58 = vadd.f32 %v4111_v0, %v4015_v27  ;;  %v2805_v15 = vpop.f32.mrf.mxu1  ;;  %v2614_v19 = vpop.f32.mrf.mxu0  ;;  %v3696_v47 = vmul.f32 %v3632_v60, %v10799_v35  ;;  %v4112_v61 = vmul.f32 %v4077_v37, %v3664_v55  ;;  %v10802_v0 = vld [vmem:[#allocation109_spill] sm:$0xff]  ;;  %v3635_v37 = vld [vmem:[#allocation7 + $0xf8] sm:$0xff] }
 0x25d   : > { %10797 = vst [vmem:[#allocation99_spill] sm:$0xff] %v9641_v34  ;;  %v3759_v25 = vpop.permute.xlu1 %3758  ;;  %4393 = vrot.lane.b32.xlu0 %v9641_v34, %s8322_s27  ;;  %v9653_v4 = vadd.f32 %v2805_v15, %v2612_v45  ;;  %v4016_v34 = vmul.f32 %v3632_v60, %v10802_v0  ;;  %v10805_v15 = vld [vmem:[#allocation112_spill] sm:$0xff]  ;;  %v3634_v60 = vld [vmem:[#allocation7 + $0xf0] sm:$0xff]  ;;  %v3667_v0 = vld [vmem:[#allocation8 + $0xf8] sm:$0xff] }
 0x25e   : > { %v7240_v62 = vpack.c.bf16 %v4143_v58, %v4142_v53  ;;  %v3793_v43 = vmul.f32 %v3759_v25, %v3665_v39  ;;  %v2807_v44 = vpop.f32.mrf.mxu1  ;;  %v2616_v33 = vpop.f32.mrf.mxu0  ;;  %v3824_v26 = vadd.f32 %v3792_v29, %v3696_v47  ;;  %v10804_v58 = vld [vmem:[#allocation43_spill] sm:$0xff]  ;;  %v4017_v25 = vmul.f32 %v3633_v49, %v10805_v15 }
 0x25f   : > { %10801 = vst [vmem:[#allocation102_spill] sm:$0xff] %v9653_v4  ;;  %v3761_v28 = vpop.permute.xlu0 %3760  ;;  %4712 = vrot.lane.b32.xlu1 %v9647_v52, %s8322_s27  ;;  %v9659_v35 = vadd.f32 %v2807_v44, %v2614_v19  ;;  %v4144_v49 = vadd.f32 %v4112_v61, %v4016_v34 }
 0x260   : > { %7760 = vst [vmem:[%s9294_s17 + $0xe8] sm:$0xff] %v7240_v62   ;;  %v3825_v27 = vadd.f32 %v3793_v43, %v3697_v40  ;;  %v2809_v21 = vpop.f32.mrf.mxu1  ;;  %v2620_v45 = vpop.f32.mrf.mxu0  ;;  %v10806_v43 = vld [vmem:[#allocation44_spill] sm:$0xff]  ;;  %v10807_v40 = vld [vmem:[#allocation45_spill] sm:$0xff] }
 0x261   : > { %10803 = vst [vmem:[#allocation101_spill] sm:$0xff] %v9659_v35  ;;  %v4079_v53 = vpop.permute.xlu1 %4078  ;;  %4714 = vrot.lane.b32.xlu0 %v9653_v4, %s8322_s27  ;;  %3311 = vmatmul.mubr.bf16.gmra.mxu0 %v10804_v58  ;;  %v10808_v58 = vld [vmem:[#allocation46_spill] sm:$0xff] }
 0x262   : > { %v7165_v29 = vpack.c.bf16 %v3825_v27, %v3824_v26  ;;  %v4113_v62 = vmul.f32 %v4079_v53, %v3665_v39  ;;  %v2813_v55 = vpop.f32.mrf.mxu1  ;;  %3504 = vmatmul.mubr.bf16.gmra.mxu1 %v10806_v43  ;;  %3320 = vmatprep.mubr.bf16.mxu0 %v10807_v40  ;;  %v2622_v44 = vpop.f32.mrf.mxu0  ;;  %v3794_v39 = vmul.f32 %v3761_v28, %v3666_v38 }
 0x263   : > { %v9667_v19 = vadd.f32 %v2813_v55, %v2620_v45  ;;  %v4081_v47 = vpop.permute.xlu0 %4080  ;;  %4395 = vrot.lane.b32.xlu1 %v9659_v35, %s8322_s27  ;;  %3513 = vmatprep.mubr.bf16.mxu1 %v10808_v58  ;;  %v9673_v53 = vadd.f32 %v2809_v21, %v2616_v33  ;;  %v10809_v55 = vld [vmem:[#allocation111_spill] sm:$0xff]  ;;  %v3699_v40 = vmul.f32 %v3635_v37, %v9274_v32 }
 0x264   : > { %7745 = vst [vmem:[%s9294_s17 + $0x70] sm:$0xff] %v7165_v29   ;;  %v4145_v26 = vadd.f32 %v4113_v62, %v4017_v25  ;;  %v2815_v27 = vpop.f32.mrf.mxu1  ;;  %v2624_v45 = vpop.f32.mrf.mxu0  ;;  %v3698_v43 = vmul.f32 %v3634_v60, %v10809_v55  ;;  %v4114_v21 = vmul.f32 %v4081_v47, %v3666_v38  ;;  %v4018_v62 = vmul.f32 %v3634_v60, %v9260_v36  ;;  %v10811_v38 = vld [vmem:[#allocation48_spill] sm:$0xff] }
 0x265   : > { %v3763_v15 = vpop.permute.xlu1 %3762  ;;  %4397 = vrot.lane.b32.xlu0 %v9667_v19, %s8322_s27  ;;  %v9679_v34 = vadd.f32 %v2815_v27, %v2622_v44 }
 0x266   : > { %v7245_v4 = vpack.c.bf16 %v4145_v26, %v4144_v49  ;;  %v3795_v35 = vmul.f32 %v3763_v15, %v3667_v0  ;;  %v2817_v58 = vpop.f32.mrf.mxu1  ;;  %v2626_v33 = vpop.f32.mrf.mxu0  ;;  %v3826_v61 = vadd.f32 %v3794_v39, %v3698_v43  ;;  %v10810_v49 = vld [vmem:[#allocation47_spill] sm:$0xff]  ;;  %v4019_v26 = vmul.f32 %v3635_v37, %v9297_v16  ;;  %v10813_v15 = vld [vmem:[#allocation50_spill] sm:$0xff] }
 0x267   : > { %v4342_v28 = vpop.permute.xlu0 %4341  ;;  %4716 = vrot.lane.b32.xlu1 %v9673_v53, %s8322_s27  ;;  %v9685_v55 = vadd.f32 %v2817_v58, %v2624_v45  ;;  %v4146_v45 = vadd.f32 %v4114_v21, %v4018_v62  ;;  %v7950_v43 = vld [vmem:[#allocation8] sm:$0xff]  ;;  %v7953_v62 = vld [vmem:[#allocation8 + $0x8] sm:$0xff] }
 0x268   : > { %7761 = vst [vmem:[%s9294_s17 + $0xf0] sm:$0xff] %v7245_v4   ;;  %v3827_v25 = vadd.f32 %v3795_v35, %v3699_v40  ;;  %v2819_v29 = vpop.f32.mrf.mxu1  ;;  %v2630_v44 = vpop.f32.mrf.mxu0  ;;  %v10812_v35 = vld [vmem:[#allocation49_spill] sm:$0xff]  ;;  %v4405_v16 = vmul.f32 %v7950_v43, %v4342_v28 }
 0x269   : > { %4718 = vrot.lane.b32.xlu0 %v9679_v34, %s8322_s27  ;;  %v4083_v32 = vpop.permute.xlu1 %4082  ;;  %3321 = vmatmul.mubr.bf16.gmra.mxu0 %v10810_v49  ;;  %v9699_v40 = vadd.f32 %v2819_v29, %v2626_v33 }
 0x26a   : > { %v7170_v27 = vpack.c.bf16 %v3827_v25, %v3826_v61  ;;  %v4115_v39 = vmul.f32 %v4083_v32, %v3667_v0  ;;  %v2823_v4 = vpop.f32.mrf.mxu1  ;;  %3514 = vmatmul.mubr.bf16.gmra.mxu1 %v10811_v38  ;;  %3330 = vmatprep.mubr.bf16.mxu0 %v10812_v35  ;;  %v2632_v47 = vpop.f32.mrf.mxu0  ;;  %v7951_v25 = vld [vmem:[#allocation7] sm:$0xff] }
 0x26b   : > { %v9693_v36 = vadd.f32 %v2823_v4, %v2630_v44  ;;  %v4663_v60 = vpop.permute.xlu0 %4662  ;;  %4399 = vrot.lane.b32.xlu1 %v9685_v55, %s8322_s27  ;;  %3523 = vmatprep.mubr.bf16.mxu1 %v10813_v15  ;;  %v4309_v32 = vmul.f32 %v7951_v25, %v9285_v54  ;;  %v7952_v44 = vld [vmem:[#allocation7 + $0x8] sm:$0xff]  ;;  %v4630_v54 = vmul.f32 %v7951_v25, %v9309_v31 }
 0x26c   : > { %7746 = vst [vmem:[%s9294_s17 + $0x78] sm:$0xff] %v7170_v27   ;;  %v4147_v37 = vadd.f32 %v4115_v39, %v4019_v26  ;;  %v2825_v0 = vpop.f32.mrf.mxu1  ;;  %v2634_v61 = vpop.f32.mrf.mxu0  ;;  %v4310_v49 = vmul.f32 %v7952_v44, %v9318_v20  ;;  %v4726_v4 = vmul.f32 %v7950_v43, %v4663_v60  ;;  %v10815_v60 = vld [vmem:[#allocation52_spill] sm:$0xff]  ;;  %v10816_v43 = vld [vmem:[#allocation53_spill] sm:$0xff] }
 0x26d   : > { %4401 = vrot.lane.b32.xlu0 %v9693_v36, %s8322_s27  ;;  %v4344_v58 = vpop.permute.xlu1 %4343  ;;  %v9705_v26 = vadd.f32 %v2825_v0, %v2632_v47  ;;  %v4437_v39 = vadd.f32 %v4405_v16, %v4309_v32  ;;  %v10817_v32 = vld [vmem:[#allocation54_spill] sm:$0xff] }
 0x26e   : > { %v7250_v21 = vpack.c.bf16 %v4147_v37, %v4146_v45  ;;  %v4406_v27 = vmul.f32 %v7953_v62, %v4344_v58  ;;  %v2827_v28 = vpop.f32.mrf.mxu1  ;;  %v2636_v29 = vpop.f32.mrf.mxu0  ;;  %v10814_v45 = vld [vmem:[#allocation51_spill] sm:$0xff]  ;;  %v4631_v37 = vmul.f32 %v7952_v44, %v9335_v50 }
 0x26f   : > { %v4346_v33 = vpop.permute.xlu0 %4345  ;;  %4720 = vrot.lane.b32.xlu1 %v9699_v40, %s8322_s27  ;;  %v9711_v15 = vadd.f32 %v2827_v28, %v2634_v61 }
 0x270   : > { %7762 = vst [vmem:[%s9294_s17 + $0xf8] sm:$0xff] %v7250_v21   ;;  %v4438_v38 = vadd.f32 %v4406_v27, %v4310_v49  ;;  %v2829_v35 = vpop.f32.mrf.mxu1  ;;  %v2866_v47 = vpop.f32.mrf.mxu0  ;;  %v4758_v49 = vadd.f32 %v4726_v4, %v4630_v54  ;;  %v7954_v21 = vld [vmem:[#allocation8 + $0x10] sm:$0xff]  ;;  %v7957_v54 = vld [vmem:[#allocation8 + $0x18] sm:$0xff] }
 0x271   : > { %4722 = vrot.lane.b32.xlu0 %v9705_v26, %s8322_s27  ;;  %v4665_v20 = vpop.permute.xlu1 %4664  ;;  %3331 = vmatmul.mubr.bf16.gmra.mxu0 %v10814_v45  ;;  %v4407_v50 = vmul.f32 %v7954_v21, %v4346_v33  ;;  %v9725_v27 = vadd.f32 %v2829_v35, %v2636_v29 }
 0x272   : > { %v7255_v0 = vpack.c.bf16 %v4438_v38, %v4437_v39  ;;  %v4727_v16 = vmul.f32 %v7953_v62, %v4665_v20  ;;  %v3059_v58 = vpop.f32.mrf.mxu1  ;;  %3524 = vmatmul.mubr.bf16.gmra.mxu1 %v10815_v60  ;;  %3340 = vmatprep.mubr.bf16.mxu0 %v10816_v43  ;;  %v2868_v25 = vpop.f32.mrf.mxu0  ;;  %v7955_v38 = vld [vmem:[#allocation7 + $0x10] sm:$0xff] }
 0x273   : > { %v9719_v31 = vadd.f32 %v3059_v58, %v2866_v47  ;;  %v4667_v61 = vpop.permute.xlu0 %4666  ;;  %4403 = vrot.lane.b32.xlu1 %v9711_v15, %s8322_s27  ;;  %3533 = vmatprep.mubr.bf16.mxu1 %v10817_v32  ;;  %v4311_v20 = vmul.f32 %v7955_v38, %v9327_v56  ;;  %v7956_v47 = vld [vmem:[#allocation7 + $0x18] sm:$0xff]  ;;  %v4632_v56 = vmul.f32 %v7955_v38, %v9341_v6 }
 0x274   : > { %7763 = vst [vmem:[%s9294_s17 + $0x100] sm:$0xff] %v7255_v0   ;;  %v4759_v44 = vadd.f32 %v4727_v16, %v4631_v37  ;;  %v3061_v62 = vpop.f32.mrf.mxu1  ;;  %v2870_v39 = vpop.f32.mrf.mxu0  ;;  %v4312_v45 = vmul.f32 %v7956_v47, %v9347_v48  ;;  %v4728_v58 = vmul.f32 %v7954_v21, %v4667_v61  ;;  %v10821_v61 = vld [vmem:[#allocation56_spill] sm:$0xff]  ;;  %v10822_v21 = vld [vmem:[#allocation57_spill] sm:$0xff] }
 0x275   : > { %4983 = vrot.lane.b32.xlu0 %v9719_v31, %s8322_s27  ;;  %v4348_v28 = vpop.permute.xlu1 %4347  ;;  %v9731_v37 = vadd.f32 %v3061_v62, %v2868_v25  ;;  %v4439_v16 = vadd.f32 %v4407_v50, %v4311_v20  ;;  %v10824_v20 = vld [vmem:[#allocation58_spill] sm:$0xff] }
 0x276   : > { %v7335_v4 = vpack.c.bf16 %v4759_v44, %v4758_v49  ;;  %v4408_v0 = vmul.f32 %v7957_v54, %v4348_v28  ;;  %v3063_v33 = vpop.f32.mrf.mxu1  ;;  %v2872_v35 = vpop.f32.mrf.mxu0  ;;  %v10820_v49 = vld [vmem:[#allocation55_spill] sm:$0xff]  ;;  %v4633_v44 = vmul.f32 %v7956_v47, %v9361_v30 }
 0x277   : > { %10818 = vst [vmem:[#allocation103_spill] sm:$0xff] %v9731_v37  ;;  %v4350_v29 = vpop.permute.xlu0 %4349  ;;  %4724 = vrot.lane.b32.xlu1 %v9725_v27, %s8322_s27  ;;  %v9737_v32 = vadd.f32 %v3063_v33, %v2870_v39 }
 0x278   : > { %7779 = vst [vmem:[%s9294_s17 + $0x180] sm:$0xff] %v7335_v4   ;;  %v4440_v60 = vadd.f32 %v4408_v0, %v4312_v45  ;;  %v3065_v43 = vpop.f32.mrf.mxu1  ;;  %v4760_v45 = vadd.f32 %v4728_v58, %v4632_v56  ;;  %v7958_v4 = vld [vmem:[#allocation8 + $0x20] sm:$0xff]  ;;  %v7961_v56 = vld [vmem:[#allocation8 + $0x28] sm:$0xff] }
 0x279   : > { %10819 = vst [vmem:[#allocation19_spill] sm:$0xff] %v9737_v32  ;;  %5463 = vrot.lane.b32.xlu0 %v9731_v37, %s8322_s27  ;;  %v4669_v48 = vpop.permute.xlu1 %4668  ;;  %v2876_v25 = vpop.f32.mrf.mxu0  ;;  %3341 = vmatmul.mubr.bf16.gmra.mxu0 %v10820_v49  ;;  %v4409_v30 = vmul.f32 %v7958_v4, %v4350_v29  ;;  %v9751_v0 = vadd.f32 %v3065_v43, %v2872_v35  ;;  %v7960_v49 = vld [vmem:[#allocation7 + $0x28] sm:$0xff] }
 0x27a   : > { %v7260_v62 = vpack.c.bf16 %v4440_v60, %v4439_v16  ;;  %v4729_v50 = vmul.f32 %v7957_v54, %v4669_v48  ;;  %v3069_v28 = vpop.f32.mrf.mxu1  ;;  %3534 = vmatmul.mubr.bf16.gmra.mxu1 %v10821_v61  ;;  %3350 = vmatprep.mubr.bf16.mxu0 %v10822_v21  ;;  %v7959_v60 = vld [vmem:[#allocation7 + $0x20] sm:$0xff]  ;;  %v10826_v48 = vld [vmem:[#allocation82_spill] sm:$0xff] }
 0x27b   : > { %v9745_v6 = vadd.f32 %v3069_v28, %v2876_v25  ;;  %v4671_v39 = vpop.permute.xlu0 %4670  ;;  %4985 = vrot.lane.b32.xlu1 %v9737_v32, %s8322_s27  ;;  %v2878_v38 = vpop.f32.mrf.mxu0  ;;  %3543 = vmatprep.mubr.bf16.mxu1 %v10824_v20  ;;  %10825 = vst [vmem:[#allocation104_spill] sm:$0xff] %v9751_v0  ;;  %v4313_v25 = vmul.f32 %v7959_v60, %v10826_v48  ;;  %v10827_v28 = vld [vmem:[#allocation84_spill] sm:$0xff]  ;;  %v10829_v48 = vld [vmem:[#allocation81_spill] sm:$0xff] }
 0x27c   : > { %7764 = vst [vmem:[%s9294_s17 + $0x108] sm:$0xff] %v7260_v62   ;;  %v4761_v47 = vadd.f32 %v4729_v50, %v4633_v44  ;;  %v3071_v54 = vpop.f32.mrf.mxu1  ;;  %v4314_v61 = vmul.f32 %v7960_v49, %v10827_v28  ;;  %v4730_v21 = vmul.f32 %v7958_v4, %v4671_v39  ;;  %v4634_v37 = vmul.f32 %v7959_v60, %v10829_v48  ;;  %v10833_v39 = vld [vmem:[#allocation60_spill] sm:$0xff]  ;;  %v10834_v4 = vld [vmem:[#allocation61_spill] sm:$0xff] }
 0x27d   : > { %10823 = vst [vmem:[#allocation20_spill] sm:$0xff] %v9745_v6  ;;  %4987 = vrot.lane.b32.xlu0 %v9745_v6, %s8322_s27  ;;  %v4352_v33 = vpop.permute.xlu1 %4351  ;;  %v2880_v16 = vpop.f32.mrf.mxu0  ;;  %v9757_v44 = vadd.f32 %v3071_v54, %v2878_v38  ;;  %v4441_v50 = vadd.f32 %v4409_v30, %v4313_v25  ;;  %v10832_v54 = vld [vmem:[#allocation86_spill] sm:$0xff] }
 0x27e   : > { %v7340_v58 = vpack.c.bf16 %v4761_v47, %v4760_v45  ;;  %v4410_v62 = vmul.f32 %v7961_v56, %v4352_v33  ;;  %v3073_v29 = vpop.f32.mrf.mxu1  ;;  %v10831_v47 = vld [vmem:[#allocation59_spill] sm:$0xff]  ;;  %v4635_v33 = vmul.f32 %v7960_v49, %v10832_v54 }
 0x27f   : > { %10828 = vst [vmem:[#allocation21_spill] sm:$0xff] %v9757_v44  ;;  %v4354_v35 = vpop.permute.xlu0 %4353  ;;  %5465 = vrot.lane.b32.xlu1 %v9751_v0, %s8322_s27  ;;  %v2882_v43 = vpop.f32.mrf.mxu0  ;;  %v9763_v32 = vadd.f32 %v3073_v29, %v2880_v16  ;;  %v7962_v29 = vld [vmem:[#allocation8 + $0x30] sm:$0xff] }
 0x280   : > { %7780 = vst [vmem:[%s9294_s17 + $0x188] sm:$0xff] %v7340_v58   ;;  %v4442_v20 = vadd.f32 %v4410_v62, %v4314_v61  ;;  %v3075_v6 = vpop.f32.mrf.mxu1  ;;  %v10836_v58 = vld [vmem:[#allocation62_spill] sm:$0xff]  ;;  %v4762_v62 = vadd.f32 %v4730_v21, %v4634_v37  ;;  %v4411_v49 = vmul.f32 %v7962_v29, %v4354_v35 }
 0x281   : > { %10830 = vst [vmem:[#allocation22_spill] sm:$0xff] %v9763_v32  ;;  %5467 = vrot.lane.b32.xlu0 %v9757_v44, %s8322_s27  ;;  %v4673_v38 = vpop.permute.xlu1 %4672  ;;  %v2886_v45 = vpop.f32.mrf.mxu0  ;;  %3351 = vmatmul.mubr.bf16.gmra.mxu0 %v10831_v47  ;;  %v10838_v47 = vld [vmem:[#allocation83_spill] sm:$0xff]  ;;  %v7965_v21 = vld [vmem:[#allocation8 + $0x38] sm:$0xff] }
 0x282   : > { %v7265_v28 = vpack.c.bf16 %v4442_v20, %v4441_v50  ;;  %v4731_v30 = vmul.f32 %v7961_v56, %v4673_v38  ;;  %v3079_v25 = vpop.f32.mrf.mxu1  ;;  %3544 = vmatmul.mubr.bf16.gmra.mxu1 %v10833_v39  ;;  %3360 = vmatprep.mubr.bf16.mxu0 %v10834_v4  ;;  %v9777_v20 = vadd.f32 %v3075_v6, %v2882_v43  ;;  %v10839_v39 = vld [vmem:[#allocation88_spill] sm:$0xff] }
 0x283   : > { %v9771_v60 = vadd.f32 %v3079_v25, %v2886_v45  ;;  %v4675_v16 = vpop.permute.xlu0 %4674  ;;  %4989 = vrot.lane.b32.xlu1 %v9763_v32, %s8322_s27  ;;  %v2888_v61 = vpop.f32.mrf.mxu0  ;;  %3553 = vmatprep.mubr.bf16.mxu1 %v10836_v58  ;;  %v7963_v45 = vld [vmem:[#allocation7 + $0x30] sm:$0xff]  ;;  %v7964_v25 = vld [vmem:[#allocation7 + $0x38] sm:$0xff] }
 0x284   : > { %7765 = vst [vmem:[%s9294_s17 + $0x110] sm:$0xff] %v7265_v28   ;;  %v4763_v50 = vadd.f32 %v4731_v30, %v4635_v33  ;;  %v3081_v56 = vpop.f32.mrf.mxu1  ;;  %10837 = vst [vmem:[#allocation24_spill] sm:$0xff] %v9777_v20  ;;  %v4315_v54 = vmul.f32 %v7963_v45, %v10838_v47  ;;  %v4316_v4 = vmul.f32 %v7964_v25, %v10839_v39  ;;  %v10841_v47 = vld [vmem:[#allocation85_spill] sm:$0xff] }
 0x285   : > { %10835 = vst [vmem:[#allocation23_spill] sm:$0xff] %v9771_v60  ;;  %4991 = vrot.lane.b32.xlu0 %v9771_v60, %s8322_s27  ;;  %v4356_v48 = vpop.permute.xlu1 %4355  ;;  %v2890_v38 = vpop.f32.mrf.mxu0  ;;  %v9783_v33 = vadd.f32 %v3081_v56, %v2888_v61  ;;  %v4732_v58 = vmul.f32 %v7962_v29, %v4675_v16  ;;  %v4636_v32 = vmul.f32 %v7963_v45, %v10841_v47  ;;  %v10844_v56 = vld [vmem:[#allocation90_spill] sm:$0xff]  ;;  %v10845_v16 = vld [vmem:[#allocation64_spill] sm:$0xff]  ;;  %v10846_v29 = vld [vmem:[#allocation65_spill] sm:$0xff] }
 0x286   : > { %v7345_v37 = vpack.c.bf16 %v4763_v50, %v4762_v62  ;;  %v4412_v28 = vmul.f32 %v7965_v21, %v4356_v48  ;;  %v3083_v35 = vpop.f32.mrf.mxu1  ;;  %v4443_v30 = vadd.f32 %v4411_v49, %v4315_v54  ;;  %v10843_v50 = vld [vmem:[#allocation63_spill] sm:$0xff]  ;;  %v4637_v48 = vmul.f32 %v7964_v25, %v10844_v56 }
 0x287   : > { %10840 = vst [vmem:[#allocation25_spill] sm:$0xff] %v9783_v33  ;;  %v4358_v6 = vpop.permute.xlu0 %4357  ;;  %5469 = vrot.lane.b32.xlu1 %v9777_v20, %s8322_s27  ;;  %v2892_v43 = vpop.f32.mrf.mxu0  ;;  %v9789_v0 = vadd.f32 %v3083_v35, %v2890_v38  ;;  %v7966_v35 = vld [vmem:[#allocation8 + $0x40] sm:$0xff] }
 0x288   : > { %7781 = vst [vmem:[%s9294_s17 + $0x190] sm:$0xff] %v7345_v37   ;;  %v4444_v60 = vadd.f32 %v4412_v28, %v4316_v4  ;;  %v3085_v44 = vpop.f32.mrf.mxu1  ;;  %v10848_v37 = vld [vmem:[#allocation66_spill] sm:$0xff]  ;;  %v4764_v28 = vadd.f32 %v4732_v58, %v4636_v32  ;;  %v4413_v25 = vmul.f32 %v7966_v35, %v4358_v6  ;;  %v7969_v58 = vld [vmem:[#allocation8 + $0x48] sm:$0xff] }
 0x289   : > { %10842 = vst [vmem:[#allocation26_spill] sm:$0xff] %v9789_v0  ;;  %5471 = vrot.lane.b32.xlu0 %v9783_v33, %s8322_s27  ;;  %v4677_v61 = vpop.permute.xlu1 %4676  ;;  %v2896_v62 = vpop.f32.mrf.mxu0  ;;  %3361 = vmatmul.mubr.bf16.gmra.mxu0 %v10843_v50  ;;  %v10849_v50 = vld [vmem:[#allocation87_spill] sm:$0xff] }
 0x28a   : > { %v7270_v39 = vpack.c.bf16 %v4444_v60, %v4443_v30  ;;  %v4733_v49 = vmul.f32 %v7965_v21, %v4677_v61  ;;  %v3089_v54 = vpop.f32.mrf.mxu1  ;;  %3554 = vmatmul.mubr.bf16.gmra.mxu1 %v10845_v16  ;;  %3370 = vmatprep.mubr.bf16.mxu0 %v10846_v29  ;;  %v9803_v30 = vadd.f32 %v3085_v44, %v2892_v43  ;;  %v10850_v16 = vld [vmem:[#allocation92_spill] sm:$0xff] }
 0x28b   : > { %v9797_v45 = vadd.f32 %v3089_v54, %v2896_v62  ;;  %v4679_v38 = vpop.permute.xlu0 %4678  ;;  %4993 = vrot.lane.b32.xlu1 %v9789_v0, %s8322_s27  ;;  %v2898_v4 = vpop.f32.mrf.mxu0  ;;  %3563 = vmatprep.mubr.bf16.mxu1 %v10848_v37  ;;  %v7967_v62 = vld [vmem:[#allocation7 + $0x40] sm:$0xff]  ;;  %v7968_v54 = vld [vmem:[#allocation7 + $0x48] sm:$0xff] }
 0x28c   : > { %7766 = vst [vmem:[%s9294_s17 + $0x118] sm:$0xff] %v7270_v39   ;;  %v4765_v60 = vadd.f32 %v4733_v49, %v4637_v48  ;;  %v3091_v21 = vpop.f32.mrf.mxu1  ;;  %v4317_v56 = vmul.f32 %v7967_v62, %v10849_v50  ;;  %v4318_v29 = vmul.f32 %v7968_v54, %v10850_v16  ;;  %v4734_v37 = vmul.f32 %v7966_v35, %v4679_v38  ;;  %v10852_v50 = vld [vmem:[#allocation89_spill] sm:$0xff]  ;;  %v10855_v38 = vld [vmem:[#allocation68_spill] sm:$0xff] }
 0x28d   : > { %10847 = vst [vmem:[#allocation27_spill] sm:$0xff] %v9797_v45  ;;  %4995 = vrot.lane.b32.xlu0 %v9797_v45, %s8322_s27  ;;  %v4360_v47 = vpop.permute.xlu1 %4359  ;;  %v2900_v61 = vpop.f32.mrf.mxu0  ;;  %v9809_v48 = vadd.f32 %v3091_v21, %v2898_v4  ;;  %v4638_v0 = vmul.f32 %v7967_v62, %v10852_v50  ;;  %v4639_v21 = vmul.f32 %v7968_v54, %v9439_v59  ;;  %v10856_v35 = vld [vmem:[#allocation69_spill] sm:$0xff] }
 0x28e   : > { %v7350_v32 = vpack.c.bf16 %v4765_v60, %v4764_v28  ;;  %v4414_v39 = vmul.f32 %v7969_v58, %v4360_v47  ;;  %v3093_v6 = vpop.f32.mrf.mxu1  ;;  %v4445_v49 = vadd.f32 %v4413_v25, %v4317_v56  ;;  %v10854_v60 = vld [vmem:[#allocation67_spill] sm:$0xff]  ;;  %v7971_v50 = vld [vmem:[#allocation7 + $0x50] sm:$0xff] }
 0x28f   : > { %10851 = vst [vmem:[#allocation28_spill] sm:$0xff] %v9809_v48  ;;  %v4362_v44 = vpop.permute.xlu0 %4361  ;;  %5473 = vrot.lane.b32.xlu1 %v9803_v30, %s8322_s27  ;;  %v2902_v43 = vpop.f32.mrf.mxu0  ;;  %v9815_v20 = vadd.f32 %v3093_v6, %v2900_v61 }
 0x290   : > { %7782 = vst [vmem:[%s9294_s17 + $0x198] sm:$0xff] %v7350_v32   ;;  %v4446_v45 = vadd.f32 %v4414_v39, %v4318_v29  ;;  %v3095_v33 = vpop.f32.mrf.mxu1  ;;  %v10858_v29 = vld [vmem:[#allocation70_spill] sm:$0xff]  ;;  %v4766_v32 = vadd.f32 %v4734_v37, %v4638_v0  ;;  %v7970_v39 = vld [vmem:[#allocation8 + $0x50] sm:$0xff] }
 0x291   : > { %10853 = vst [vmem:[#allocation29_spill] sm:$0xff] %v9815_v20  ;;  %5475 = vrot.lane.b32.xlu0 %v9809_v48, %s8322_s27  ;;  %v4681_v4 = vpop.permute.xlu1 %4680  ;;  %v2906_v28 = vpop.f32.mrf.mxu0  ;;  %3371 = vmatmul.mubr.bf16.gmra.mxu0 %v10854_v60  ;;  %v4415_v59 = vmul.f32 %v7970_v39, %v4362_v44  ;;  %v7972_v60 = vld [vmem:[#allocation7 + $0x58] sm:$0xff] }
 0x292   : > { %v7275_v47 = vpack.c.bf16 %v4446_v45, %v4445_v49  ;;  %v4735_v25 = vmul.f32 %v7969_v58, %v4681_v4  ;;  %v3099_v56 = vpop.f32.mrf.mxu1  ;;  %3564 = vmatmul.mubr.bf16.gmra.mxu1 %v10855_v38  ;;  %3380 = vmatprep.mubr.bf16.mxu0 %v10856_v35  ;;  %v9829_v58 = vadd.f32 %v3095_v33, %v2902_v43  ;;  %v10859_v4 = vld [vmem:[#allocation91_spill] sm:$0xff]  ;;  %v7973_v37 = vld [vmem:[#allocation8 + $0x58] sm:$0xff] }
 0x293   : > { %v9823_v62 = vadd.f32 %v3099_v56, %v2906_v28  ;;  %v4683_v61 = vpop.permute.xlu0 %4682  ;;  %4997 = vrot.lane.b32.xlu1 %v9815_v20, %s8322_s27  ;;  %v2908_v16 = vpop.f32.mrf.mxu0  ;;  %3573 = vmatprep.mubr.bf16.mxu1 %v10858_v29  ;;  %v4319_v28 = vmul.f32 %v7971_v50, %v10859_v4  ;;  %v10860_v56 = vld [vmem:[#allocation93_spill] sm:$0xff]  ;;  %v10862_v4 = vld [vmem:[#allocation94_spill] sm:$0xff] }
 0x294   : > { %7767 = vst [vmem:[%s9294_s17 + $0x120] sm:$0xff] %v7275_v47   ;;  %v4767_v45 = vadd.f32 %v4735_v25, %v4639_v21  ;;  %v3101_v54 = vpop.f32.mrf.mxu1  ;;  %v4320_v38 = vmul.f32 %v7972_v60, %v10860_v56  ;;  %v4736_v35 = vmul.f32 %v7970_v39, %v4683_v61  ;;  %v4640_v48 = vmul.f32 %v7971_v50, %v10862_v4  ;;  %v10864_v61 = vld [vmem:[#allocation72_spill] sm:$0xff]  ;;  %v10865_v39 = vld [vmem:[#allocation73_spill] sm:$0xff]  ;;  %v7975_v4 = vld [vmem:[#allocation7 + $0x60] sm:$0xff] }
 0x295   : > { %10857 = vst [vmem:[#allocation30_spill] sm:$0xff] %v9823_v62  ;;  %4999 = vrot.lane.b32.xlu0 %v9823_v62, %s8322_s27  ;;  %v4364_v6 = vpop.permute.xlu1 %4363  ;;  %v2910_v49 = vpop.f32.mrf.mxu0  ;;  %v9835_v21 = vadd.f32 %v3101_v54, %v2908_v16  ;;  %v4447_v25 = vadd.f32 %v4415_v59, %v4319_v28  ;;  %v4641_v54 = vmul.f32 %v7972_v60, %v9465_v46 }
 0x296   : > { %v7355_v0 = vpack.c.bf16 %v4767_v45, %v4766_v32  ;;  %v4416_v47 = vmul.f32 %v7973_v37, %v4364_v6  ;;  %v3103_v44 = vpop.f32.mrf.mxu1  ;;  %v10863_v45 = vld [vmem:[#allocation71_spill] sm:$0xff] }
 0x297   : > { %10861 = vst [vmem:[#allocation31_spill] sm:$0xff] %v9835_v21  ;;  %v4366_v33 = vpop.permute.xlu0 %4365  ;;  %5477 = vrot.lane.b32.xlu1 %v9829_v58, %s8322_s27  ;;  %v2912_v43 = vpop.f32.mrf.mxu0  ;;  %v9841_v20 = vadd.f32 %v3103_v44, %v2910_v49 }
 0x298   : > { %7783 = vst [vmem:[%s9294_s17 + $0x1a0] sm:$0xff] %v7355_v0   ;;  %v4448_v29 = vadd.f32 %v4416_v47, %v4320_v38  ;;  %v3105_v62 = vpop.f32.mrf.mxu1  ;;  %v10867_v38 = vld [vmem:[#allocation74_spill] sm:$0xff]  ;;  %v4768_v0 = vadd.f32 %v4736_v35, %v4640_v48  ;;  %v7974_v47 = vld [vmem:[#allocation8 + $0x60] sm:$0xff]  ;;  %v7977_v35 = vld [vmem:[#allocation8 + $0x68] sm:$0xff] }
 0x299   : > { %5479 = vrot.lane.b32.xlu0 %v9835_v21, %s8322_s27  ;;  %v4685_v16 = vpop.permute.xlu1 %4684  ;;  %v2916_v32 = vpop.f32.mrf.mxu0  ;;  %3381 = vmatmul.mubr.bf16.gmra.mxu0 %v10863_v45  ;;  %v4417_v46 = vmul.f32 %v7974_v47, %v4366_v33  ;;  %v9855_v44 = vadd.f32 %v3105_v62, %v2912_v43  ;;  %v7976_v45 = vld [vmem:[#allocation7 + $0x68] sm:$0xff] }
 0x29a   : > { %v7280_v6 = vpack.c.bf16 %v4448_v29, %v4447_v25  ;;  %v4737_v59 = vmul.f32 %v7973_v37, %v4685_v16  ;;  %v3109_v28 = vpop.f32.mrf.mxu1  ;;  %3574 = vmatmul.mubr.bf16.gmra.mxu1 %v10864_v61  ;;  %3390 = vmatprep.mubr.bf16.mxu0 %v10865_v39  ;;  %v10868_v16 = vld [vmem:[#allocation96_spill] sm:$0xff] }
 0x29b   : > { %v9849_v50 = vadd.f32 %v3109_v28, %v2916_v32  ;;  %v4687_v49 = vpop.permute.xlu0 %4686  ;;  %5001 = vrot.lane.b32.xlu1 %v9841_v20, %s8322_s27  ;;  %v2918_v56 = vpop.f32.mrf.mxu0  ;;  %3583 = vmatprep.mubr.bf16.mxu1 %v10867_v38  ;;  %v4321_v32 = vmul.f32 %v7975_v4, %v10868_v16  ;;  %v4322_v28 = vmul.f32 %v7976_v45, %v9477_v7  ;;  %v10869_v16 = vld [vmem:[#allocation95_spill] sm:$0xff] }
 0x29c   : > { %7768 = vst [vmem:[%s9294_s17 + $0x128] sm:$0xff] %v7280_v6   ;;  %v4769_v60 = vadd.f32 %v4737_v59, %v4641_v54  ;;  %v3111_v37 = vpop.f32.mrf.mxu1  ;;  %v4738_v61 = vmul.f32 %v7974_v47, %v4687_v49  ;;  %v10871_v49 = vld [vmem:[#allocation76_spill] sm:$0xff]  ;;  %v10872_v47 = vld [vmem:[#allocation77_spill] sm:$0xff] }
 0x29d   : > { %10866 = vst [vmem:[#allocation105_spill] sm:$0xff] %v9849_v50  ;;  %5003 = vrot.lane.b32.xlu0 %v9849_v50, %s8322_s27  ;;  %v4368_v25 = vpop.permute.xlu1 %4367  ;;  %v2920_v29 = vpop.f32.mrf.mxu0  ;;  %v9861_v54 = vadd.f32 %v3111_v37, %v2918_v56  ;;  %v4449_v59 = vadd.f32 %v4417_v46, %v4321_v32  ;;  %v4642_v50 = vmul.f32 %v7975_v4, %v10869_v16  ;;  %v7979_v16 = vld [vmem:[#allocation7 + $0x70] sm:$0xff] }
 0x29e   : > { %v7360_v48 = vpack.c.bf16 %v4769_v60, %v4768_v0  ;;  %v4418_v6 = vmul.f32 %v7977_v35, %v4368_v25  ;;  %v3113_v33 = vpop.f32.mrf.mxu1  ;;  %v10870_v0 = vld [vmem:[#allocation75_spill] sm:$0xff]  ;;  %v4643_v60 = vmul.f32 %v7976_v45, %v9491_v10 }
 0x29f   : > { %v4370_v62 = vpop.permute.xlu0 %4369  ;;  %5481 = vrot.lane.b32.xlu1 %v9855_v44, %s8322_s27  ;;  %v2922_v43 = vpop.f32.mrf.mxu0  ;;  %v9867_v21 = vadd.f32 %v3113_v33, %v2920_v29 }
 0x2a0   : > { %7784 = vst [vmem:[%s9294_s17 + $0x1a8] sm:$0xff] %v7360_v48   ;;  %v4450_v39 = vadd.f32 %v4418_v6, %v4322_v28  ;;  %v3115_v38 = vpop.f32.mrf.mxu1  ;;  %v10873_v28 = vld [vmem:[#allocation78_spill] sm:$0xff]  ;;  %v4770_v48 = vadd.f32 %v4738_v61, %v4642_v50  ;;  %v7978_v6 = vld [vmem:[#allocation8 + $0x70] sm:$0xff] }
 0x2a1   : > { %5483 = vrot.lane.b32.xlu0 %v9861_v54, %s8322_s27  ;;  %v4689_v7 = vpop.permute.xlu1 %4688  ;;  %v2926_v56 = vpop.f32.mrf.mxu0  ;;  %3391 = vmatmul.mubr.bf16.gmra.mxu0 %v10870_v0  ;;  %v4419_v10 = vmul.f32 %v7978_v6, %v4370_v62  ;;  %v9881_v33 = vadd.f32 %v3115_v38, %v2922_v43  ;;  %v7981_v61 = vld [vmem:[#allocation8 + $0x78] sm:$0xff] }
 0x2a2   : > { %v7285_v37 = vpack.c.bf16 %v4450_v39, %v4449_v59  ;;  %v4739_v46 = vmul.f32 %v7977_v35, %v4689_v7  ;;  %v3119_v25 = vpop.f32.mrf.mxu1  ;;  %3584 = vmatmul.mubr.bf16.gmra.mxu1 %v10871_v49  ;;  %3400 = vmatprep.mubr.bf16.mxu0 %v10872_v47  ;;  %v4323_v7 = vmul.f32 %v7979_v16, %v9485_v51 }
 0x2a3   : > { %v9875_v4 = vadd.f32 %v3119_v25, %v2926_v56  ;;  %v4691_v29 = vpop.permute.xlu0 %4690  ;;  %5005 = vrot.lane.b32.xlu1 %v9867_v21, %s8322_s27  ;;  %v2928_v32 = vpop.f32.mrf.mxu0  ;;  %3593 = vmatprep.mubr.bf16.mxu1 %v10873_v28  ;;  %v7980_v56 = vld [vmem:[#allocation7 + $0x78] sm:$0xff] }
 0x2a4   : > { %7769 = vst [vmem:[%s9294_s17 + $0x130] sm:$0xff] %v7285_v37   ;;  %v4771_v45 = vadd.f32 %v4739_v46, %v4643_v60  ;;  %v3121_v35 = vpop.f32.mrf.mxu1  ;;  %v4324_v0 = vmul.f32 %v7980_v56, %v9503_v24  ;;  %v4451_v46 = vadd.f32 %v4419_v10, %v4323_v7  ;;  %v4740_v25 = vmul.f32 %v7978_v6, %v4691_v29  ;;  %v10875_v29 = vld [vmem:[#allocation80_spill] sm:$0xff] }
 0x2a5   : > { %5007 = vrot.lane.b32.xlu0 %v9875_v4, %s8322_s27  ;;  %v4372_v59 = vpop.permute.xlu1 %4371  ;;  %v2930_v39 = vpop.f32.mrf.mxu0  ;;  %v9887_v60 = vadd.f32 %v3121_v35, %v2928_v32  ;;  %v10874_v32 = vld [vmem:[#allocation79_spill] sm:$0xff] }
 0x2a6   : > { %v7365_v50 = vpack.c.bf16 %v4771_v45, %v4770_v48  ;;  %v4420_v37 = vmul.f32 %v7981_v61, %v4372_v59  ;;  %v3123_v62 = vpop.f32.mrf.mxu1  ;;  %v4644_v48 = vmul.f32 %v7979_v16, %v9497_v2  ;;  %v4645_v45 = vmul.f32 %v7980_v56, %v9517_v42 }
 0x2a7   : > { %v4374_v43 = vpop.permute.xlu0 %4373  ;;  %5485 = vrot.lane.b32.xlu1 %v9881_v33, %s8322_s27  ;;  %v2932_v38 = vpop.f32.mrf.mxu0  ;;  %v9892_v51 = vadd.f32 %v3123_v62, %v2930_v39 }
 0x2a8   : > { %7785 = vst [vmem:[%s9294_s17 + $0x1b0] sm:$0xff] %v7365_v50   ;;  %v4452_v49 = vadd.f32 %v4420_v37, %v4324_v0  ;;  %v3125_v47 = vpop.f32.mrf.mxu1  ;;  %v4772_v0 = vadd.f32 %v4740_v25, %v4644_v48  ;;  %v7982_v50 = vld [vmem:[#allocation8 + $0x80] sm:$0xff] }
 0x2a9   : > { %5487 = vrot.lane.b32.xlu0 %v9887_v60, %s8322_s27  ;;  %v4693_v24 = vpop.permute.xlu1 %4692  ;;  %v2936_v28 = vpop.f32.mrf.mxu0  ;;  %3401 = vmatmul.mubr.bf16.gmra.mxu0 %v10874_v32  ;;  %v4421_v37 = vmul.f32 %v7982_v50, %v4374_v43  ;;  %v9905_v16 = vadd.f32 %v3125_v47, %v2932_v38 }
 0x2aa   : > { %v7290_v35 = vpack.c.bf16 %v4452_v49, %v4451_v46  ;;  %v4741_v10 = vmul.f32 %v7981_v61, %v4693_v24  ;;  %v3129_v59 = vpop.f32.mrf.mxu1  ;;  %3594 = vmatmul.mubr.bf16.gmra.mxu1 %v10875_v29  ;;  %v7983_v61 = vld [vmem:[#allocation7 + $0x80] sm:$0xff]  ;;  %v7984_v49 = vld [vmem:[#allocation7 + $0x88] sm:$0xff] }
 0x2ab   : > { %v9900_v6 = vadd.f32 %v3129_v59, %v2936_v28  ;;  %v4695_v39 = vpop.permute.xlu0 %4694  ;;  %5009 = vrot.lane.b32.xlu1 %v9892_v51, %s8322_s27  ;;  %v2938_v7 = vpop.f32.mrf.mxu0  ;;  %v4325_v46 = vmul.f32 %v7983_v61, %v9511_v22  ;;  %v4326_v24 = vmul.f32 %v7984_v49, %v9529_v63  ;;  %v7985_v28 = vld [vmem:[#allocation8 + $0x88] sm:$0xff] }
 0x2ac   : > { %7770 = vst [vmem:[%s9294_s17 + $0x138] sm:$0xff] %v7290_v35   ;;  %v4773_v62 = vadd.f32 %v4741_v10, %v4645_v45  ;;  %v3131_v2 = vpop.f32.mrf.mxu1  ;;  %v4742_v35 = vmul.f32 %v7982_v50, %v4695_v39 }
 0x2ad   : > { %5011 = vrot.lane.b32.xlu0 %v9900_v6, %s8322_s27  ;;  %v4376_v42 = vpop.permute.xlu1 %4375  ;;  %v2940_v56 = vpop.f32.mrf.mxu0  ;;  %v9911_v48 = vadd.f32 %v3131_v2, %v2938_v7  ;;  %v4453_v45 = vadd.f32 %v4421_v37, %v4325_v46  ;;  %v4646_v7 = vmul.f32 %v7983_v61, %v9523_v14  ;;  %v7986_v46 = vld [vmem:[#allocation8 + $0x90] sm:$0xff] }
 0x2ae   : > { %v7370_v25 = vpack.c.bf16 %v4773_v62, %v4772_v0  ;;  %v4422_v32 = vmul.f32 %v7985_v28, %v4376_v42  ;;  %v3133_v43 = vpop.f32.mrf.mxu1  ;;  %v4647_v0 = vmul.f32 %v7984_v49, %v9543_v17  ;;  %v7987_v61 = vld [vmem:[#allocation7 + $0x90] sm:$0xff] }
 0x2af   : > { %v4378_v38 = vpop.permute.xlu0 %4377  ;;  %5489 = vrot.lane.b32.xlu1 %v9905_v16, %s8322_s27  ;;  %v2942_v47 = vpop.f32.mrf.mxu0  ;;  %v9916_v59 = vadd.f32 %v3133_v43, %v2940_v56  ;;  %v4774_v56 = vadd.f32 %v4742_v35, %v4646_v7  ;;  %v4327_v49 = vmul.f32 %v7987_v61, %v9537_v9 }
 0x2b0   : > { %7786 = vst [vmem:[%s9294_s17 + $0x1b8] sm:$0xff] %v7370_v25   ;;  %v4454_v10 = vadd.f32 %v4422_v32, %v4326_v24  ;;  %v3135_v22 = vpop.f32.mrf.mxu1  ;;  %v4423_v24 = vmul.f32 %v7986_v46, %v4378_v38 }
 0x2b1   : > { %5491 = vrot.lane.b32.xlu0 %v9911_v48, %s8322_s27  ;;  %v4697_v63 = vpop.permute.xlu1 %4696  ;;  %v2946_v29 = vpop.f32.mrf.mxu0  ;;  %v9927_v43 = vadd.f32 %v3135_v22, %v2942_v47 }
 0x2b2   : > { %v7295_v62 = vpack.c.bf16 %v4454_v10, %v4453_v45  ;;  %v4743_v2 = vmul.f32 %v7985_v28, %v4697_v63  ;;  %v3139_v42 = vpop.f32.mrf.mxu1  ;;  %v7988_v28 = vld [vmem:[#allocation7 + $0x98] sm:$0xff]  ;;  %v4455_v7 = vadd.f32 %v4423_v24, %v4327_v49  ;;  %v7990_v49 = vld [vmem:[#allocation8 + $0xa0] sm:$0xff] }
 0x2b3   : > { %v9922_v37 = vadd.f32 %v3139_v42, %v2946_v29  ;;  %v4699_v39 = vpop.permute.xlu0 %4698  ;;  %5013 = vrot.lane.b32.xlu1 %v9916_v59, %s8322_s27  ;;  %v2948_v50 = vpop.f32.mrf.mxu0  ;;  %v4328_v45 = vmul.f32 %v7988_v28, %v9555_v57  ;;  %v7989_v10 = vld [vmem:[#allocation8 + $0x98] sm:$0xff] }
 0x2b4   : > { %7771 = vst [vmem:[%s9294_s17 + $0x140] sm:$0xff] %v7295_v62   ;;  %v4775_v25 = vadd.f32 %v4743_v2, %v4647_v0  ;;  %v3141_v32 = vpop.f32.mrf.mxu1  ;;  %v4744_v0 = vmul.f32 %v7986_v46, %v4699_v39 }
 0x2b5   : > { %5015 = vrot.lane.b32.xlu0 %v9922_v37, %s8322_s27  ;;  %v4380_v14 = vpop.permute.xlu1 %4379  ;;  %v2950_v17 = vpop.f32.mrf.mxu0  ;;  %v9933_v29 = vadd.f32 %v3141_v32, %v2948_v50  ;;  %v4648_v50 = vmul.f32 %v7987_v61, %v9549_v23  ;;  %v7991_v61 = vld [vmem:[#allocation7 + $0xa0] sm:$0xff] }
 0x2b6   : > { %v7375_v35 = vpack.c.bf16 %v4775_v25, %v4774_v56  ;;  %v4424_v63 = vmul.f32 %v7989_v10, %v4380_v14  ;;  %v3143_v38 = vpop.f32.mrf.mxu1  ;;  %v4649_v56 = vmul.f32 %v7988_v28, %v9569_v1  ;;  %v4329_v28 = vmul.f32 %v7991_v61, %v9563_v11 }
 0x2b7   : > { %v4382_v47 = vpop.permute.xlu0 %4381  ;;  %5493 = vrot.lane.b32.xlu1 %v9927_v43, %s8322_s27  ;;  %v2952_v22 = vpop.f32.mrf.mxu0  ;;  %v9938_v2 = vadd.f32 %v3143_v38, %v2950_v17  ;;  %v4776_v17 = vadd.f32 %v4744_v0, %v4648_v50 }
 0x2b8   : > { %7787 = vst [vmem:[%s9294_s17 + $0x1c0] sm:$0xff] %v7375_v35   ;;  %v4456_v62 = vadd.f32 %v4424_v63, %v4328_v45  ;;  %v3145_v9 = vpop.f32.mrf.mxu1  ;;  %v4425_v45 = vmul.f32 %v7990_v49, %v4382_v47 }
 0x2b9   : > { %5495 = vrot.lane.b32.xlu0 %v9933_v29, %s8322_s27  ;;  %v4701_v57 = vpop.permute.xlu1 %4700  ;;  %v2956_v42 = vpop.f32.mrf.mxu0  ;;  %v9949_v38 = vadd.f32 %v3145_v9, %v2952_v22 }
 0x2ba   : > { %v7300_v25 = vpack.c.bf16 %v4456_v62, %v4455_v7  ;;  %v4745_v32 = vmul.f32 %v7989_v10, %v4701_v57  ;;  %v3149_v14 = vpop.f32.mrf.mxu1  ;;  %v7992_v10 = vld [vmem:[#allocation7 + $0xa8] sm:$0xff]  ;;  %v4457_v50 = vadd.f32 %v4425_v45, %v4329_v28  ;;  %v7994_v28 = vld [vmem:[#allocation8 + $0xb0] sm:$0xff] }
 0x2bb   : > { %v9944_v24 = vadd.f32 %v3149_v14, %v2956_v42  ;;  %v4703_v39 = vpop.permute.xlu0 %4702  ;;  %5017 = vrot.lane.b32.xlu1 %v9938_v2, %s8322_s27  ;;  %v2958_v46 = vpop.f32.mrf.mxu0  ;;  %v4330_v7 = vmul.f32 %v7992_v10, %v9581_v18  ;;  %v7993_v62 = vld [vmem:[#allocation8 + $0xa8] sm:$0xff] }
 0x2bc   : > { %7772 = vst [vmem:[%s9294_s17 + $0x148] sm:$0xff] %v7300_v25   ;;  %v4777_v35 = vadd.f32 %v4745_v32, %v4649_v56  ;;  %v3151_v63 = vpop.f32.mrf.mxu1  ;;  %v4746_v56 = vmul.f32 %v7990_v49, %v4703_v39 }
 0x2bd   : > { %5019 = vrot.lane.b32.xlu0 %v9944_v24, %s8322_s27  ;;  %v4384_v23 = vpop.permute.xlu1 %4383  ;;  %v2960_v1 = vpop.f32.mrf.mxu0  ;;  %v9955_v42 = vadd.f32 %v3151_v63, %v2958_v46  ;;  %v4650_v46 = vmul.f32 %v7991_v61, %v9575_v8  ;;  %v7995_v61 = vld [vmem:[#allocation7 + $0xb0] sm:$0xff] }
 0x2be   : > { %v7380_v0 = vpack.c.bf16 %v4777_v35, %v4776_v17  ;;  %v4426_v57 = vmul.f32 %v7993_v62, %v4384_v23  ;;  %v3153_v47 = vpop.f32.mrf.mxu1  ;;  %v4651_v17 = vmul.f32 %v7992_v10, %v9595_v41  ;;  %v4331_v10 = vmul.f32 %v7995_v61, %v9589_v12 }
 0x2bf   : > { %v4386_v22 = vpop.permute.xlu0 %4385  ;;  %5497 = vrot.lane.b32.xlu1 %v9949_v38, %s8322_s27  ;;  %v2962_v9 = vpop.f32.mrf.mxu0  ;;  %v9960_v32 = vadd.f32 %v3153_v47, %v2960_v1  ;;  %v4778_v1 = vadd.f32 %v4746_v56, %v4650_v46 }
 0x2c0   : > { %7788 = vst [vmem:[%s9294_s17 + $0x1c8] sm:$0xff] %v7380_v0   ;;  %v4458_v25 = vadd.f32 %v4426_v57, %v4330_v7  ;;  %v3155_v11 = vpop.f32.mrf.mxu1  ;;  %v4427_v7 = vmul.f32 %v7994_v28, %v4386_v22 }
 0x2c1   : > { %5499 = vrot.lane.b32.xlu0 %v9955_v42, %s8322_s27  ;;  %v4705_v18 = vpop.permute.xlu1 %4704  ;;  %v2966_v14 = vpop.f32.mrf.mxu0  ;;  %v9971_v47 = vadd.f32 %v3155_v11, %v2962_v9 }
 0x2c2   : > { %v7305_v35 = vpack.c.bf16 %v4458_v25, %v4457_v50  ;;  %v4747_v63 = vmul.f32 %v7993_v62, %v4705_v18  ;;  %v3159_v23 = vpop.f32.mrf.mxu1  ;;  %v7996_v62 = vld [vmem:[#allocation7 + $0xb8] sm:$0xff]  ;;  %v4459_v46 = vadd.f32 %v4427_v7, %v4331_v10  ;;  %v7998_v10 = vld [vmem:[#allocation8 + $0xc0] sm:$0xff] }
 0x2c3   : > { %v9966_v45 = vadd.f32 %v3159_v23, %v2966_v14  ;;  %v4707_v39 = vpop.permute.xlu0 %4706  ;;  %5021 = vrot.lane.b32.xlu1 %v9960_v32, %s8322_s27  ;;  %v2968_v49 = vpop.f32.mrf.mxu0  ;;  %v4332_v50 = vmul.f32 %v7996_v62, %v9607_v3  ;;  %v7997_v25 = vld [vmem:[#allocation8 + $0xb8] sm:$0xff] }
 0x2c4   : > { %7773 = vst [vmem:[%s9294_s17 + $0x150] sm:$0xff] %v7305_v35   ;;  %v4779_v0 = vadd.f32 %v4747_v63, %v4651_v17  ;;  %v3161_v57 = vpop.f32.mrf.mxu1  ;;  %v4748_v17 = vmul.f32 %v7994_v28, %v4707_v39 }
 0x2c5   : > { %5023 = vrot.lane.b32.xlu0 %v9966_v45, %s8322_s27  ;;  %v4388_v8 = vpop.permute.xlu1 %4387  ;;  %v2970_v41 = vpop.f32.mrf.mxu0  ;;  %v9977_v14 = vadd.f32 %v3161_v57, %v2968_v49  ;;  %v4652_v49 = vmul.f32 %v7995_v61, %v9601_v5  ;;  %v7999_v61 = vld [vmem:[#allocation7 + $0xc0] sm:$0xff] }
 0x2c6   : > { %v7385_v56 = vpack.c.bf16 %v4779_v0, %v4778_v1  ;;  %v4428_v18 = vmul.f32 %v7997_v25, %v4388_v8  ;;  %v3163_v22 = vpop.f32.mrf.mxu1  ;;  %v4653_v1 = vmul.f32 %v7996_v62, %v9621_v13  ;;  %v10879_v62 = vld [vmem:[#allocation98_spill] sm:$0xff] }
 0x2c7   : > { %10876 = vst [vmem:[#allocation32_spill] sm:$0xff] %v9977_v14  ;;  %v4390_v9 = vpop.permute.xlu0 %4389  ;;  %5501 = vrot.lane.b32.xlu1 %v9971_v47, %s8322_s27  ;;  %v2972_v11 = vpop.f32.mrf.mxu0  ;;  %v9982_v63 = vadd.f32 %v3163_v22, %v2970_v41  ;;  %v4780_v41 = vadd.f32 %v4748_v17, %v4652_v49 }
 0x2c8   : > { %7789 = vst [vmem:[%s9294_s17 + $0x1d0] sm:$0xff] %v7385_v56   ;;  %v4460_v35 = vadd.f32 %v4428_v18, %v4332_v50  ;;  %v3165_v12 = vpop.f32.mrf.mxu1  ;;  %v4429_v50 = vmul.f32 %v7998_v10, %v4390_v9 }
 0x2c9   : > { %5503 = vrot.lane.b32.xlu0 %v9977_v14, %s8322_s27  ;;  %v4709_v3 = vpop.permute.xlu1 %4708  ;;  %v2976_v23 = vpop.f32.mrf.mxu0  ;;  %v9993_v22 = vadd.f32 %v3165_v12, %v2972_v11 }
 0x2ca   : > { %v7310_v0 = vpack.c.bf16 %v4460_v35, %v4459_v46  ;;  %v4749_v57 = vmul.f32 %v7997_v25, %v4709_v3  ;;  %v3169_v8 = vpop.f32.mrf.mxu1  ;;  %v4333_v25 = vmul.f32 %v7999_v61, %v10879_v62  ;;  %v8000_v46 = vld [vmem:[#allocation7 + $0xc8] sm:$0xff] }
 0x2cb   : > { %v9988_v7 = vadd.f32 %v3169_v8, %v2976_v23  ;;  %v4711_v39 = vpop.permute.xlu0 %4710  ;;  %5025 = vrot.lane.b32.xlu1 %v9982_v63, %s8322_s27  ;;  %v2978_v28 = vpop.f32.mrf.mxu0  ;;  %10878 = vst [vmem:[#allocation34_spill] sm:$0xff] %v9993_v22  ;;  %v10880_v35 = vld [vmem:[#allocation100_spill] sm:$0xff] }
 0x2cc   : > { %7774 = vst [vmem:[%s9294_s17 + $0x158] sm:$0xff] %v7310_v0   ;;  %v4781_v56 = vadd.f32 %v4749_v57, %v4653_v1  ;;  %v3171_v18 = vpop.f32.mrf.mxu1  ;;  %v4334_v3 = vmul.f32 %v8000_v46, %v10880_v35  ;;  %v8001_v23 = vld [vmem:[#allocation8 + $0xc8] sm:$0xff]  ;;  %v4461_v0 = vadd.f32 %v4429_v50, %v4333_v25  ;;  %v4750_v57 = vmul.f32 %v7998_v10, %v4711_v39  ;;  %v8002_v25 = vld [vmem:[#allocation8 + $0xd0] sm:$0xff] }
 0x2cd   : > { %10877 = vst [vmem:[#allocation33_spill] sm:$0xff] %v9988_v7  ;;  %5027 = vrot.lane.b32.xlu0 %v9988_v7, %s8322_s27  ;;  %v4392_v5 = vpop.permute.xlu1 %4391  ;;  %v2980_v13 = vpop.f32.mrf.mxu0  ;;  %v9999_v1 = vadd.f32 %v3171_v18, %v2978_v28  ;;  %v10882_v28 = vld [vmem:[#allocation97_spill] sm:$0xff] }
 0x2ce   : > { %v7390_v17 = vpack.c.bf16 %v4781_v56, %v4780_v41  ;;  %v4430_v49 = vmul.f32 %v8001_v23, %v4392_v5  ;;  %v3173_v9 = vpop.f32.mrf.mxu1  ;;  %v4654_v18 = vmul.f32 %v7999_v61, %v10882_v28  ;;  %v4655_v5 = vmul.f32 %v8000_v46, %v9647_v52  ;;  %v8003_v61 = vld [vmem:[#allocation7 + $0xd0] sm:$0xff]  ;;  %v10885_v46 = vld [vmem:[#allocation99_spill] sm:$0xff] }
 0x2cf   : > { %10881 = vst [vmem:[#allocation35_spill] sm:$0xff] %v9999_v1  ;;  %v4394_v11 = vpop.permute.xlu0 %4393  ;;  %5505 = vrot.lane.b32.xlu1 %v9993_v22, %s8322_s27  ;;  %v2982_v12 = vpop.f32.mrf.mxu0  ;;  %v10004_v7 = vadd.f32 %v3173_v9, %v2980_v13 }
 0x2d0   : > { %7790 = vst [vmem:[%s9294_s17 + $0x1d8] sm:$0xff] %v7390_v17   ;;  %v4462_v8 = vadd.f32 %v4430_v49, %v4334_v3  ;;  %v3175_v62 = vpop.f32.mrf.mxu1  ;;  %v4782_v13 = vadd.f32 %v4750_v57, %v4654_v18  ;;  %v4431_v3 = vmul.f32 %v8002_v25, %v4394_v11 }
 0x2d1   : > { %5507 = vrot.lane.b32.xlu0 %v9999_v1, %s8322_s27  ;;  %v4713_v41 = vpop.permute.xlu1 %4712  ;;  %v2986_v56 = vpop.f32.mrf.mxu0  ;;  %v10015_v9 = vadd.f32 %v3175_v62, %v2982_v12 }
 0x2d2   : > { %v7315_v35 = vpack.c.bf16 %v4462_v8, %v4461_v0  ;;  %v4751_v22 = vmul.f32 %v8001_v23, %v4713_v41  ;;  %v3179_v14 = vpop.f32.mrf.mxu1  ;;  %v4335_v23 = vmul.f32 %v8003_v61, %v10885_v46  ;;  %v8004_v0 = vld [vmem:[#allocation7 + $0xd8] sm:$0xff]  ;;  %v10886_v8 = vld [vmem:[#allocation101_spill] sm:$0xff] }
 0x2d3   : > { %v10010_v50 = vadd.f32 %v3179_v14, %v2986_v56  ;;  %v4715_v39 = vpop.permute.xlu0 %4714  ;;  %5029 = vrot.lane.b32.xlu1 %v10004_v7, %s8322_s27  ;;  %v2988_v10 = vpop.f32.mrf.mxu0  ;;  %10884 = vst [vmem:[#allocation37_spill] sm:$0xff] %v10015_v9  ;;  %v4336_v41 = vmul.f32 %v8004_v0, %v10886_v8  ;;  %v8005_v56 = vld [vmem:[#allocation8 + $0xd8] sm:$0xff] }
 0x2d4   : > { %7775 = vst [vmem:[%s9294_s17 + $0x160] sm:$0xff] %v7315_v35   ;;  %v4783_v17 = vadd.f32 %v4751_v22, %v4655_v5  ;;  %v3181_v49 = vpop.f32.mrf.mxu1  ;;  %v4463_v18 = vadd.f32 %v4431_v3, %v4335_v23  ;;  %v4752_v5 = vmul.f32 %v8002_v25, %v4715_v39  ;;  %v8006_v23 = vld [vmem:[#allocation8 + $0xe0] sm:$0xff] }
 0x2d5   : > { %10883 = vst [vmem:[#allocation36_spill] sm:$0xff] %v10010_v50  ;;  %5031 = vrot.lane.b32.xlu0 %v10010_v50, %s8322_s27  ;;  %v4396_v52 = vpop.permute.xlu1 %4395  ;;  %v2990_v14 = vpop.f32.mrf.mxu0  ;;  %v10021_v22 = vadd.f32 %v3181_v49, %v2988_v10  ;;  %v10887_v10 = vld [vmem:[#allocation102_spill] sm:$0xff] }
 0x2d6   : > { %v7395_v57 = vpack.c.bf16 %v4783_v17, %v4782_v13  ;;  %v4432_v28 = vmul.f32 %v8005_v56, %v4396_v52  ;;  %v3183_v11 = vpop.f32.mrf.mxu1  ;;  %v4656_v49 = vmul.f32 %v8003_v61, %v10887_v10  ;;  %v4657_v52 = vmul.f32 %v8004_v0, %v9673_v53  ;;  %v8007_v61 = vld [vmem:[#allocation7 + $0xe0] sm:$0xff] }
 0x2d7   : > { %v4398_v12 = vpop.permute.xlu0 %4397  ;;  %5509 = vrot.lane.b32.xlu1 %v10015_v9, %s8322_s27  ;;  %v2992_v62 = vpop.f32.mrf.mxu0  ;;  %v10026_v50 = vadd.f32 %v3183_v11, %v2990_v14  ;;  %v4337_v0 = vmul.f32 %v8007_v61, %v9667_v19 }
 0x2d8   : > { %7791 = vst [vmem:[%s9294_s17 + $0x1e0] sm:$0xff] %v7395_v57   ;;  %v4464_v35 = vadd.f32 %v4432_v28, %v4336_v41  ;;  %v3185_v46 = vpop.f32.mrf.mxu1  ;;  %v4784_v14 = vadd.f32 %v4752_v5, %v4656_v49  ;;  %v4433_v41 = vmul.f32 %v8006_v23, %v4398_v12 }
 0x2d9   : > { %5511 = vrot.lane.b32.xlu0 %v10021_v22, %s8322_s27  ;;  %v4717_v13 = vpop.permute.xlu1 %4716  ;;  %v2996_v17 = vpop.f32.mrf.mxu0  ;;  %v10037_v11 = vadd.f32 %v3185_v46, %v2992_v62 }
 0x2da   : > { %v7320_v8 = vpack.c.bf16 %v4464_v35, %v4463_v18  ;;  %v4753_v9 = vmul.f32 %v8005_v56, %v4717_v13  ;;  %v3189_v1 = vpop.f32.mrf.mxu1  ;;  %v8008_v56 = vld [vmem:[#allocation7 + $0xe8] sm:$0xff] }
 0x2db   : > { %v10032_v3 = vadd.f32 %v3189_v1, %v2996_v17  ;;  %v4719_v39 = vpop.permute.xlu0 %4718  ;;  %5033 = vrot.lane.b32.xlu1 %v10026_v50, %s8322_s27  ;;  %v2998_v25 = vpop.f32.mrf.mxu0  ;;  %v4338_v18 = vmul.f32 %v8008_v56, %v9685_v55  ;;  %v8009_v35 = vld [vmem:[#allocation8 + $0xe8] sm:$0xff]  ;;  %v4465_v17 = vadd.f32 %v4433_v41, %v4337_v0  ;;  %v8010_v0 = vld [vmem:[#allocation8 + $0xf0] sm:$0xff] }
 0x2dc   : > { %7776 = vst [vmem:[%s9294_s17 + $0x168] sm:$0xff] %v7320_v8   ;;  %v4785_v57 = vadd.f32 %v4753_v9, %v4657_v52  ;;  %v3191_v28 = vpop.f32.mrf.mxu1  ;;  %v4754_v10 = vmul.f32 %v8006_v23, %v4719_v39 }
 0x2dd   : > { %5035 = vrot.lane.b32.xlu0 %v10032_v3, %s8322_s27  ;;  %v4400_v53 = vpop.permute.xlu1 %4399  ;;  %v3000_v1 = vpop.f32.mrf.mxu0  ;;  %v10043_v9 = vadd.f32 %v3191_v28, %v2998_v25  ;;  %v4658_v25 = vmul.f32 %v8007_v61, %v9679_v34  ;;  %v8011_v61 = vld [vmem:[#allocation7 + $0xf0] sm:$0xff] }
 0x2de   : > { %v7400_v5 = vpack.c.bf16 %v4785_v57, %v4784_v14  ;;  %v4434_v13 = vmul.f32 %v8009_v35, %v4400_v53  ;;  %v3193_v12 = vpop.f32.mrf.mxu1  ;;  %v4659_v14 = vmul.f32 %v8008_v56, %v9699_v40  ;;  %v4339_v56 = vmul.f32 %v8011_v61, %v9693_v36 }
 0x2df   : > { %v4402_v62 = vpop.permute.xlu0 %4401  ;;  %5513 = vrot.lane.b32.xlu1 %v10037_v11, %s8322_s27  ;;  %v3002_v46 = vpop.f32.mrf.mxu0  ;;  %v10048_v52 = vadd.f32 %v3193_v12, %v3000_v1  ;;  %v4786_v1 = vadd.f32 %v4754_v10, %v4658_v25 }
 0x2e0   : > { %7792 = vst [vmem:[%s9294_s17 + $0x1e8] sm:$0xff] %v7400_v5   ;;  %v4466_v49 = vadd.f32 %v4434_v13, %v4338_v18  ;;  %v3195_v19 = vpop.f32.mrf.mxu1  ;;  %v4435_v18 = vmul.f32 %v8010_v0, %v4402_v62 }
 0x2e1   : > { %5515 = vrot.lane.b32.xlu0 %v10043_v9, %s8322_s27  ;;  %v4721_v55 = vpop.permute.xlu1 %4720  ;;  %v3006_v8 = vpop.f32.mrf.mxu0  ;;  %v10059_v12 = vadd.f32 %v3195_v19, %v3002_v46 }
 0x2e2   : > { %v7325_v57 = vpack.c.bf16 %v4466_v49, %v4465_v17  ;;  %v4755_v28 = vmul.f32 %v8009_v35, %v4721_v55  ;;  %v3199_v53 = vpop.f32.mrf.mxu1  ;;  %v8012_v35 = vld [vmem:[#allocation7 + $0xf8] sm:$0xff]  ;;  %v4467_v25 = vadd.f32 %v4435_v18, %v4339_v56  ;;  %v8014_v56 = vld [vmem:[#allocation8] sm:$0xff] }
 0x2e3   : > { %v10054_v41 = vadd.f32 %v3199_v53, %v3006_v8  ;;  %v4723_v39 = vpop.permute.xlu0 %4722  ;;  %5037 = vrot.lane.b32.xlu1 %v10048_v52, %s8322_s27  ;;  %v3008_v23 = vpop.f32.mrf.mxu0  ;;  %10889 = vst [vmem:[#allocation106_spill] sm:$0xff] %v10059_v12  ;;  %v4340_v17 = vmul.f32 %v8012_v35, %v9711_v15  ;;  %v8013_v49 = vld [vmem:[#allocation8 + $0xf8] sm:$0xff] }
 0x2e4   : > { %7777 = vst [vmem:[%s9294_s17 + $0x170] sm:$0xff] %v7325_v57   ;;  %v4787_v5 = vadd.f32 %v4755_v28, %v4659_v14  ;;  %v3201_v13 = vpop.f32.mrf.mxu1  ;;  %v4756_v14 = vmul.f32 %v8010_v0, %v4723_v39 }
 0x2e5   : > { %10888 = vst [vmem:[#allocation38_spill] sm:$0xff] %v10054_v41  ;;  %5039 = vrot.lane.b32.xlu0 %v10054_v41, %s8322_s27  ;;  %v4404_v34 = vpop.permute.xlu1 %4403  ;;  %v3010_v40 = vpop.f32.mrf.mxu0  ;;  %v10065_v8 = vadd.f32 %v3201_v13, %v3008_v23  ;;  %v4660_v23 = vmul.f32 %v8011_v61, %v9705_v26 }
 0x2e6   : > { %v7405_v10 = vpack.c.bf16 %v4787_v5, %v4786_v1  ;;  %v4436_v55 = vmul.f32 %v8013_v49, %v4404_v34  ;;  %v3203_v62 = vpop.f32.mrf.mxu1  ;;  %v4661_v1 = vmul.f32 %v8012_v35, %v9725_v27  ;;  %v8015_v35 = vld [vmem:[#allocation7] sm:$0xff] }
 0x2e7   : > { %10890 = vst [vmem:[#allocation39_spill] sm:$0xff] %v10065_v8  ;;  %v4984_v46 = vpop.permute.xlu0 %4983  ;;  %5517 = vrot.lane.b32.xlu1 %v10059_v12, %s8322_s27  ;;  %v3012_v19 = vpop.f32.mrf.mxu0  ;;  %v10070_v28 = vadd.f32 %v3203_v62, %v3010_v40  ;;  %v4788_v40 = vadd.f32 %v4756_v14, %v4660_v23  ;;  %v8016_v62 = vld [vmem:[#allocation7 + $0x8] sm:$0xff] }
 0x2e8   : > { %7793 = vst [vmem:[%s9294_s17 + $0x1f0] sm:$0xff] %v7405_v10   ;;  %v4468_v57 = vadd.f32 %v4436_v55, %v4340_v17  ;;  %v3205_v36 = vpop.f32.mrf.mxu1  ;;  %v5047_v17 = vmul.f32 %v8014_v56, %v4984_v46 }
 0x2e9   : > { %10891 = vst [vmem:[#allocation108_spill] sm:$0xff] %v10070_v28  ;;  %5519 = vrot.lane.b32.xlu0 %v10065_v8, %s8322_s27  ;;  %v4725_v15 = vpop.permute.xlu1 %4724  ;;  %v3016_v53 = vpop.f32.mrf.mxu0  ;;  %v10081_v26 = vadd.f32 %v3205_v36, %v3012_v19 }
 0x2ea   : > { %v7330_v5 = vpack.c.bf16 %v4468_v57, %v4467_v25  ;;  %v4757_v13 = vmul.f32 %v8013_v49, %v4725_v15  ;;  %v3209_v34 = vpop.f32.mrf.mxu1  ;;  %v4951_v49 = vmul.f32 %v8015_v35, %v9719_v31  ;;  %v10894_v25 = vld [vmem:[#allocation19_spill] sm:$0xff]  ;;  %v8017_v15 = vld [vmem:[#allocation8 + $0x8] sm:$0xff] }
 0x2eb   : > { %v10076_v18 = vadd.f32 %v3209_v34, %v3016_v53  ;;  %v5464_v39 = vpop.permute.xlu0 %5463  ;;  %5041 = vrot.lane.b32.xlu1 %v10070_v28, %s8322_s27  ;;  %v3018_v0 = vpop.f32.mrf.mxu0  ;;  %10893 = vst [vmem:[#allocation41_spill] sm:$0xff] %v10081_v26  ;;  %v4952_v57 = vmul.f32 %v8016_v62, %v10894_v25 }
 0x2ec   : > { %7778 = vst [vmem:[%s9294_s17 + $0x178] sm:$0xff] %v7330_v5   ;;  %v4789_v10 = vadd.f32 %v4757_v13, %v4661_v1  ;;  %v3211_v55 = vpop.f32.mrf.mxu1  ;;  %v5079_v1 = vadd.f32 %v5047_v17, %v4951_v49  ;;  %v5527_v5 = vmul.f32 %v8014_v56, %v5464_v39 }
 0x2ed   : > { %10892 = vst [vmem:[#allocation40_spill] sm:$0xff] %v10076_v18  ;;  %5043 = vrot.lane.b32.xlu0 %v10076_v18, %s8322_s27  ;;  %v4986_v27 = vpop.permute.xlu1 %4985  ;;  %v3020_v61 = vpop.f32.mrf.mxu0  ;;  %v10088_v23 = vadd.f32 %v3211_v55, %v3018_v0  ;;  %v10897_v0 = vld [vmem:[#allocation103_spill] sm:$0xff] }
 0x2ee   : > { %v7410_v14 = vpack.c.bf16 %v4789_v10, %v4788_v40  ;;  %v5048_v46 = vmul.f32 %v8017_v15, %v4986_v27  ;;  %v3213_v53 = vpop.f32.mrf.mxu1  ;;  %v5431_v55 = vmul.f32 %v8015_v35, %v10897_v0  ;;  %v10898_v27 = vld [vmem:[#allocation104_spill] sm:$0xff] }
 0x2ef   : > { %10895 = vst [vmem:[#allocation42_spill] sm:$0xff] %v10088_v23  ;;  %v4988_v19 = vpop.permute.xlu0 %4987  ;;  %5521 = vrot.lane.b32.xlu1 %v10081_v26, %s8322_s27  ;;  %v3022_v36 = vpop.f32.mrf.mxu0  ;;  %v10093_v34 = vadd.f32 %v3213_v53, %v3020_v61  ;;  %v5432_v25 = vmul.f32 %v8016_v62, %v10898_v27  ;;  %v8018_v61 = vld [vmem:[#allocation8 + $0x10] sm:$0xff]  ;;  %v10900_v53 = vld [vmem:[#allocation20_spill] sm:$0xff] }
 0x2f0   : > { %7794 = vst [vmem:[%s9294_s17 + $0x1f8] sm:$0xff] %v7410_v14   ;;  %v5080_v31 = vadd.f32 %v5048_v46, %v4952_v57  ;;  %v3215_v13 = vpop.f32.mrf.mxu1  ;;  %v5559_v56 = vadd.f32 %v5527_v5, %v5431_v55  ;;  %v5049_v49 = vmul.f32 %v8018_v61, %v4988_v19  ;;  %v8019_v46 = vld [vmem:[#allocation7 + $0x10] sm:$0xff]  ;;  %v10901_v5 = vld [vmem:[#allocation22_spill] sm:$0xff] }
 0x2f1   : > { %10896 = vst [vmem:[#allocation107_spill] sm:$0xff] %v10093_v34  ;;  %5523 = vrot.lane.b32.xlu0 %v10088_v23, %s8322_s27  ;;  %v5466_v40 = vpop.permute.xlu1 %5465  ;;  %v3252_v10 = vpop.f32.mrf.mxu0  ;;  %v10106_v14 = vadd.f32 %v3215_v13, %v3022_v36  ;;  %v8021_v55 = vld [vmem:[#allocation8 + $0x18] sm:$0xff] }
 0x2f2   : > { %v7415_v18 = vpack.c.bf16 %v5080_v31, %v5079_v1  ;;  %v5528_v26 = vmul.f32 %v8017_v15, %v5466_v40  ;;  %v3445_v8 = vpop.f32.mrf.mxu1  ;;  %v4953_v1 = vmul.f32 %v8019_v46, %v10900_v53  ;;  %v8020_v31 = vld [vmem:[#allocation7 + $0x18] sm:$0xff] }
 0x2f3   : > { %v5468_v17 = vpop.permute.xlu0 %5467  ;;  %5045 = vrot.lane.b32.xlu1 %v10093_v34, %s8322_s27  ;;  %v3254_v39 = vpop.f32.mrf.mxu0  ;;  %10899 = vst [vmem:[#allocation110_spill] sm:$0xff] %v10106_v14  ;;  %v4954_v40 = vmul.f32 %v8020_v31, %v10901_v5  ;;  %v3446_v19 = vadd.f32 %v3445_v8, %v3252_v10 }
 0x2f4   : > { %7416 = vst [vmem:[%s10103_s15] sm:$0xff] %v7415_v18   ;;  %v5560_v57 = vadd.f32 %v5528_v26, %v5432_v25  ;;  %v3447_v35 = vpop.f32.mrf.mxu1  ;;  %v5081_v13 = vadd.f32 %v5049_v49, %v4953_v1  ;;  %v5529_v23 = vmul.f32 %v8018_v61, %v5468_v17  ;;  %v10902_v49 = vld [vmem:[#allocation21_spill] sm:$0xff]  ;;  %v10903_v61 = vld [vmem:[#allocation24_spill] sm:$0xff] }
 0x2f5   : > { %v4990_v62 = vpop.permute.xlu1 %4989  ;;  %v3256_v15 = vpop.f32.mrf.mxu0  ;;  %v3448_v8 = vadd.f32 %v3447_v35, %v3254_v39  ;;  %v5433_v17 = vmul.f32 %v8019_v46, %v10902_v49 }
 0x2f6   : > { %v7575_v0 = vpack.c.bf16 %v5560_v57, %v5559_v56  ;;  %v5050_v18 = vmul.f32 %v8021_v55, %v4990_v62  ;;  %v3449_v27 = vpop.f32.mrf.mxu1 }
 0x2f7   : > { %v3450_v26 = vadd.f32 %v3449_v27, %v3256_v15  ;;  %v4992_v25 = vpop.permute.xlu0 %4991  ;;  %5525 = vrot.lane.b32.xlu1 %v10106_v14, %s8322_s27  ;;  %v3258_v36 = vpop.f32.mrf.mxu0  ;;  %v5434_v15 = vmul.f32 %v8020_v31, %v10903_v61 }
 0x2f8   : > { %7825 = vst [vmem:[%s10103_s15 + $0x80] sm:$0xff] %v7575_v0   ;;  %v5082_v53 = vadd.f32 %v5050_v18, %v4954_v40  ;;  %v3451_v34 = vpop.f32.mrf.mxu1 }
 0x2f9   : > { %v7495_v10 = vpack.c.bf16 %v3450_v26, %v3446_v19  ;;  %v3452_v56 = vadd.f32 %v3451_v34, %v3258_v36  ;;  %v5470_v57 = vpop.permute.xlu1 %5469  ;;  %v3262_v62 = vpop.f32.mrf.mxu0 }
 0x2fa   : > { %v7420_v1 = vpack.c.bf16 %v5082_v53, %v5081_v13  ;;  %v5530_v5 = vmul.f32 %v8021_v55, %v5470_v57  ;;  %v3455_v40 = vpop.f32.mrf.mxu1 }
 0x2fb   : > { %8197 = shalt.err (!%p8194_p9)
}
 0x2fc   : > { %s8198_s17 = scalar_lea.hbm %s10117_s30, 8192  ;;  %s8202_s20 = scalar_lea.hbm %s10370_s4, 16384 }
 0x2fd   : > { %p8199_p1 = scmp.ne.s32.totalorder %s10117_s30, %s8198_s17  ;;  %p8203_p8 = scmp.lt.s32.totalorder %s10117_s30, %s10370_s4 }
 0x2fe   : > { %p8204_p3 = scmp.lt.s32.totalorder %s8202_s20, %s8198_s17 }
 0x2ff   : > { %p8200_p4 = pnand %p8199_p1, %p10904_p12 }
 0x300   : > { %p8205_p11 = por %p8204_p3, %p8203_p8 }
 0x301   : > { %p8201_p6 = pneg %p8200_p4 }
 0x303   : > { %p8206_p7 = pnand %p8205_p11, %p8201_p6 }
 0x305   : > { %8209 = shalt.err (!%p8206_p7)
}
 0x306   : > { %s8324_s13 = smov 4   ;;  %s10905_s10 = sshll.u32 %s8505_s12, 8  ;;  %v7655_v34 = vpack.c.bf16 %v3452_v56, %v3448_v8  ;;  %v5472_v39 = vpop.permute.xlu0 %5471  ;;  %v3264_v35 = vpop.f32.mrf.mxu0  ;;  %v5561_v46 = vadd.f32 %v5529_v23, %v5433_v17  ;;  %7795 = vst [vmem:[%s10103_s15 + $0x8] sm:$0xff] %v7420_v1   ;;  %v8022_v31 = vld [vmem:[#allocation8 + $0x20] sm:$0xff]  ;;  %v5562_v55 = vadd.f32 %v5530_v5, %v5434_v15  ;;  %v8024_v53 = vld [vmem:[#allocation7 + $0x28] sm:$0xff]  ;;  %v10907_v57 = vld [vmem:[#allocation26_spill] sm:$0xff]  ;;  %v3456_v23 = vadd.f32 %v3455_v40, %v3262_v62 }
 0x307   : > { %7871 = dma.vmem_to_hbm [thread:$0]  (%p10904_p12), %s10120_s26, 8192, %s10117_s30, %s5914_s14, %s8322_s27, %s8322_s27, %s8324_s13   ;;  %v5051_v0 = vmul.f32 %v8022_v31, %v4992_v25  ;;  %v3457_v18 = vpop.f32.mrf.mxu1  ;;  %v4994_v27 = vpop.permute.xlu1 %4993  ;;  %v8023_v26 = vld [vmem:[#allocation7 + $0x20] sm:$0xff]  ;;  %v4956_v49 = vmul.f32 %v8024_v53, %v10907_v57  ;;  %v8025_v8 = vld [vmem:[#allocation8 + $0x28] sm:$0xff]  ;;  %v5531_v5 = vmul.f32 %v8022_v31, %v5472_v39  ;;  %v5436_v62 = vmul.f32 %v8024_v53, %v9803_v30  ;;  %v8028_v53 = vld [vmem:[#allocation7 + $0x38] sm:$0xff] }
 0x308   : > { %s10152_s7 = scalar_lea.vmem [#allocation13], %s10905_s10  ;;  %v3266_v19 = vpop.f32.mrf.mxu0  ;;  %v10906_v36 = vld [vmem:[#allocation23_spill] sm:$0xff]  ;;  %v5052_v56 = vmul.f32 %v8025_v8, %v4994_v27  ;;  %v3458_v28 = vadd.f32 %v3457_v18, %v3264_v35  ;;  %s5918_s12 = sand.u32 1, %s8383_s25  }
 0x309   : > { %7496 = vst [vmem:[%s10152_s7] sm:$0xff] %v7495_v10   ;;  %7841 = vst [vmem:[%s10152_s7 + $0x80] sm:$0xff] %v7655_v34   ;;  %v4955_v13 = vmul.f32 %v8023_v26, %v10906_v36  ;;  %v7580_v10 = vpack.c.bf16 %v5562_v55, %v5561_v46  ;;  %v3459_v61 = vpop.f32.mrf.mxu1  ;;  %v10908_v46 = vld [vmem:[#allocation25_spill] sm:$0xff]  ;;  %s10562_s30 = sshll.u32 %s8383_s25, 12  ;;  %s5953_s26 = sshll.u32 %s10103_s15, 4  ;;  %s10279_s26 = int_to_ptr.vmem [resolvable:$true] %s5953_s26 }
 0x30a   : > { %v3460_v17 = vadd.f32 %v3459_v61, %v3266_v19  ;;  %v4996_v1 = vpop.permute.xlu0 %4995  ;;  %v3268_v25 = vpop.f32.mrf.mxu0  ;;  %v5084_v34 = vadd.f32 %v5052_v56, %v4956_v49  ;;  %v5435_v55 = vmul.f32 %v8023_v26, %v10908_v46  ;;  %v8026_v49 = vld [vmem:[#allocation8 + $0x30] sm:$0xff]  ;;  %v10909_v61 = vld [vmem:[#allocation27_spill] sm:$0xff]  ;;  %s10277_s17 = scalar_lea.hbm %s10371_s5, %s10562_s30  ;;  %s10283_s18 = scalar_lea.sflag [#allocation12], %s5918_s12 }
 0x30b   : > { %v5083_v15 = vadd.f32 %v5051_v0, %v4955_v13  ;;  %7826 = vst [vmem:[%s10103_s15 + $0x88] sm:$0xff] %v7580_v10   ;;  %v3461_v14 = vpop.f32.mrf.mxu1  ;;  %v5474_v12 = vpop.permute.xlu1 %5473  ;;  %v5053_v35 = vmul.f32 %v8026_v49, %v4996_v1  ;;  %v8027_v26 = vld [vmem:[#allocation7 + $0x30] sm:$0xff]  ;;  %s8210_s20 = scalar_lea.vmem %s10279_s26, 4096  ;;  %s8325_s11 = smov [#allocation11]  }
 0x30c   : > { %v7500_v36 = vpack.c.bf16 %v3460_v17, %v3456_v23  ;;  %v3462_v41 = vadd.f32 %v3461_v14, %v3268_v25  ;;  %v3272_v57 = vpop.f32.mrf.mxu0  ;;  %v5532_v27 = vmul.f32 %v8025_v8, %v5474_v12  ;;  %v5563_v31 = vadd.f32 %v5531_v5, %v5435_v55  ;;  %v10910_v12 = vld [vmem:[#allocation29_spill] sm:$0xff]  ;;  %p8211_p13 = scmp.ne.s32.totalorder %s10279_s26, %s8210_s20  ;;  %s8214_s10 = sshll.u32 %s8325_s11, 4  ;;  %s8215_s10 = int_to_ptr.vmem [resolvable:$false] %s8214_s10 }
 0x30d   : > { %v7425_v40 = vpack.c.bf16 %v5084_v34, %v5083_v15  ;;  %v3465_v19 = vpop.f32.mrf.mxu1  ;;  %v4957_v30 = vmul.f32 %v8027_v26, %v10909_v61  ;;  %v4958_v8 = vmul.f32 %v8028_v53, %v10910_v12  ;;  %v8030_v12 = vld [vmem:[#allocation8 + $0x40] sm:$0xff]  ;;  %s8216_s14 = scalar_lea.vmem %s8215_s10, 8192  ;;  %p8217_p10 = scmp.lt.s32.totalorder %s10279_s26, %s8215_s10 }
 0x30e   : > { %7810 = vst [vmem:[%s10152_s7 + $0x8] sm:$0xff] %v7500_v36   ;;  %v7660_v0 = vpack.c.bf16 %v3462_v41, %v3458_v28  ;;  %v5476_v13 = vpop.permute.xlu0 %5475  ;;  %v3274_v39 = vpop.f32.mrf.mxu0  ;;  %v5564_v18 = vadd.f32 %v5532_v27, %v5436_v62  ;;  %v8029_v41 = vld [vmem:[#allocation8 + $0x38] sm:$0xff]  ;;  %v3466_v25 = vadd.f32 %v3465_v19, %v3272_v57  ;;  %v5438_v57 = vmul.f32 %v8028_v53, %v9829_v58  ;;  %v8032_v53 = vld [vmem:[#allocation7 + $0x48] sm:$0xff]  ;;  %p8212_p0 = pnand %p8211_p13, %p10904_p12  ;;  %p8218_p2 = scmp.lt.s32.totalorder %s8216_s14, %s8210_s20 }
 0x30f   : > { %7796 = vst [vmem:[%s10103_s15 + $0x10] sm:$0xff] %v7425_v40   ;;  %v3467_v14 = vpop.f32.mrf.mxu1  ;;  %v4998_v10 = vpop.permute.xlu1 %4997  ;;  %v5085_v34 = vadd.f32 %v5053_v35, %v4957_v30  ;;  %v5533_v36 = vmul.f32 %v8026_v49, %v5476_v13 }
 0x310   : > { %7842 = vst [vmem:[%s10152_s7 + $0x88] sm:$0xff] %v7660_v0   ;;  %v3276_v56 = vpop.f32.mrf.mxu0  ;;  %v7585_v23 = vpack.c.bf16 %v5564_v18, %v5563_v31  ;;  %v5054_v28 = vmul.f32 %v8029_v41, %v4998_v10  ;;  %v3468_v62 = vadd.f32 %v3467_v14, %v3274_v39  ;;  %v10911_v31 = vld [vmem:[#allocation28_spill] sm:$0xff]  ;;  %p8213_p5 = pneg %p8212_p0  ;;  %p8219_p9 = por %p8218_p2, %p8217_p10 }
 0x311   : > { %v3469_v17 = vpop.f32.mrf.mxu1  ;;  %v5437_v18 = vmul.f32 %v8027_v26, %v10911_v31  ;;  %v8031_v26 = vld [vmem:[#allocation7 + $0x40] sm:$0xff] }
 0x312   : > { %v3470_v15 = vadd.f32 %v3469_v17, %v3276_v56  ;;  %v5000_v5 = vpop.permute.xlu0 %4999  ;;  %v3278_v1 = vpop.f32.mrf.mxu0  ;;  %7827 = vst [vmem:[%s10103_s15 + $0x90] sm:$0xff] %v7585_v23   ;;  %v5086_v46 = vadd.f32 %v5054_v28, %v4958_v8  ;;  %v10912_v17 = vld [vmem:[#allocation30_spill] sm:$0xff]  ;;  %p8220_p1 = pnand %p8219_p9, %p8213_p5 }
 0x313   : > { %v3471_v55 = vpop.f32.mrf.mxu1  ;;  %v5478_v0 = vpop.permute.xlu1 %5477  ;;  %v5565_v49 = vadd.f32 %v5533_v36, %v5437_v18  ;;  %v5055_v39 = vmul.f32 %v8030_v12, %v5000_v5  ;;  %v4959_v58 = vmul.f32 %v8031_v26, %v10912_v17 }
 0x314   : > { %v7505_v40 = vpack.c.bf16 %v3470_v15, %v3466_v25  ;;  %v3472_v27 = vadd.f32 %v3471_v55, %v3278_v1  ;;  %v3282_v61 = vpop.f32.mrf.mxu0  ;;  %v7430_v19 = vpack.c.bf16 %v5086_v46, %v5085_v34  ;;  %v5534_v10 = vmul.f32 %v8029_v41, %v5478_v0  ;;  %v8033_v15 = vld [vmem:[#allocation8 + $0x48] sm:$0xff] }
 0x315   : > { %v3475_v56 = vpop.f32.mrf.mxu1  ;;  %v4960_v41 = vmul.f32 %v8032_v53, %v9841_v20 }
 0x316   : > { %7811 = vst [vmem:[%s10152_s7 + $0x10] sm:$0xff] %v7505_v40   ;;  %v7665_v35 = vpack.c.bf16 %v3472_v27, %v3468_v62  ;;  %v5480_v30 = vpop.permute.xlu0 %5479  ;;  %v3284_v13 = vpop.f32.mrf.mxu0  ;;  %7797 = vst [vmem:[%s10103_s15 + $0x18] sm:$0xff] %v7430_v19   ;;  %v5566_v14 = vadd.f32 %v5534_v10, %v5438_v57  ;;  %v3476_v36 = vadd.f32 %v3475_v56, %v3282_v61  ;;  %v10913_v10 = vld [vmem:[#allocation31_spill] sm:$0xff] }
 0x317   : > { %v3477_v8 = vpop.f32.mrf.mxu1  ;;  %v5002_v23 = vpop.permute.xlu1 %5001  ;;  %v5087_v62 = vadd.f32 %v5055_v39, %v4959_v58  ;;  %v5535_v40 = vmul.f32 %v8030_v12, %v5480_v30  ;;  %v5440_v61 = vmul.f32 %v8032_v53, %v9855_v44  ;;  %v8036_v53 = vld [vmem:[#allocation7 + $0x58] sm:$0xff] }
 0x318   : > { %7843 = vst [vmem:[%s10152_s7 + $0x90] sm:$0xff] %v7665_v35   ;;  %v3286_v28 = vpop.f32.mrf.mxu0  ;;  %v7590_v25 = vpack.c.bf16 %v5566_v14, %v5565_v49  ;;  %v5056_v1 = vmul.f32 %v8033_v15, %v5002_v23  ;;  %v3478_v31 = vadd.f32 %v3477_v8, %v3284_v13  ;;  %v5439_v35 = vmul.f32 %v8031_v26, %v10913_v10  ;;  %v8035_v26 = vld [vmem:[#allocation7 + $0x50] sm:$0xff] }
 0x319   : > { %v3479_v34 = vpop.f32.mrf.mxu1 }
 0x31a   : > { %v3480_v46 = vadd.f32 %v3479_v34, %v3286_v28  ;;  %v5004_v55 = vpop.permute.xlu0 %5003  ;;  %v3288_v5 = vpop.f32.mrf.mxu0  ;;  %7828 = vst [vmem:[%s10103_s15 + $0x98] sm:$0xff] %v7590_v25   ;;  %v5088_v27 = vadd.f32 %v5056_v1, %v4960_v41  ;;  %v5567_v12 = vadd.f32 %v5535_v40, %v5439_v35  ;;  %v8034_v28 = vld [vmem:[#allocation8 + $0x50] sm:$0xff]  ;;  %v8037_v34 = vld [vmem:[#allocation8 + $0x58] sm:$0xff] }
 0x31b   : > { %v3481_v0 = vpop.f32.mrf.mxu1  ;;  %v5482_v19 = vpop.permute.xlu1 %5481  ;;  %v5057_v13 = vmul.f32 %v8034_v28, %v5004_v55  ;;  %v10914_v25 = vld [vmem:[#allocation105_spill] sm:$0xff] }
 0x31c   : > { %v7510_v18 = vpack.c.bf16 %v3480_v46, %v3476_v36  ;;  %v3482_v57 = vadd.f32 %v3481_v0, %v3288_v5  ;;  %v3292_v20 = vpop.f32.mrf.mxu0  ;;  %v7435_v56 = vpack.c.bf16 %v5088_v27, %v5087_v62  ;;  %v5536_v49 = vmul.f32 %v8033_v15, %v5482_v19 }
 0x31d   : > { %v3485_v14 = vpop.f32.mrf.mxu1  ;;  %v4961_v44 = vmul.f32 %v8035_v26, %v10914_v25  ;;  %v4962_v15 = vmul.f32 %v8036_v53, %v9867_v21 }
 0x31e   : > { %7812 = vst [vmem:[%s10152_s7 + $0x18] sm:$0xff] %v7510_v18   ;;  %v7670_v39 = vpack.c.bf16 %v3482_v57, %v3478_v31  ;;  %v5484_v23 = vpop.permute.xlu0 %5483  ;;  %v3294_v30 = vpop.f32.mrf.mxu0  ;;  %7798 = vst [vmem:[%s10103_s15 + $0x20] sm:$0xff] %v7435_v56   ;;  %v5568_v8 = vadd.f32 %v5536_v49, %v5440_v61  ;;  %v3486_v5 = vadd.f32 %v3485_v14, %v3292_v20 }
 0x31f   : > { %v3487_v17 = vpop.f32.mrf.mxu1  ;;  %v5006_v58 = vpop.permute.xlu1 %5005  ;;  %v5089_v27 = vadd.f32 %v5057_v13, %v4961_v44  ;;  %v5537_v0 = vmul.f32 %v8034_v28, %v5484_v23  ;;  %v5441_v61 = vmul.f32 %v8035_v26, %v9861_v54  ;;  %v5442_v20 = vmul.f32 %v8036_v53, %v9881_v33  ;;  %v8038_v13 = vld [vmem:[#allocation8 + $0x60] sm:$0xff]  ;;  %v8040_v26 = vld [vmem:[#allocation7 + $0x68] sm:$0xff] }
 0x320   : > { %7844 = vst [vmem:[%s10152_s7 + $0x98] sm:$0xff] %v7670_v39   ;;  %v3296_v41 = vpop.f32.mrf.mxu0  ;;  %v7595_v1 = vpack.c.bf16 %v5568_v8, %v5567_v12  ;;  %v5058_v36 = vmul.f32 %v8037_v34, %v5006_v58  ;;  %v3488_v57 = vadd.f32 %v3487_v17, %v3294_v30  ;;  %v8039_v54 = vld [vmem:[#allocation7 + $0x60] sm:$0xff]  ;;  %v4964_v25 = vmul.f32 %v8040_v26, %v9892_v51  ;;  %v8041_v53 = vld [vmem:[#allocation8 + $0x68] sm:$0xff] }
 0x321   : > { %v3489_v46 = vpop.f32.mrf.mxu1  ;;  %v5569_v28 = vadd.f32 %v5537_v0, %v5441_v61  ;;  %v4963_v33 = vmul.f32 %v8039_v54, %v9875_v4 }
 0x322   : > { %v3490_v62 = vadd.f32 %v3489_v46, %v3296_v41  ;;  %v5008_v40 = vpop.permute.xlu0 %5007  ;;  %v3298_v55 = vpop.f32.mrf.mxu0  ;;  %7829 = vst [vmem:[%s10103_s15 + $0xa0] sm:$0xff] %v7595_v1   ;;  %v5090_v31 = vadd.f32 %v5058_v36, %v4962_v15 }
 0x323   : > { %v3491_v18 = vpop.f32.mrf.mxu1  ;;  %v5486_v35 = vpop.permute.xlu1 %5485  ;;  %v5059_v30 = vmul.f32 %v8038_v13, %v5008_v40 }
 0x324   : > { %v7515_v19 = vpack.c.bf16 %v3490_v62, %v3486_v5  ;;  %v3492_v10 = vadd.f32 %v3491_v18, %v3298_v55  ;;  %v3302_v21 = vpop.f32.mrf.mxu0  ;;  %v7440_v56 = vpack.c.bf16 %v5090_v31, %v5089_v27  ;;  %v5538_v49 = vmul.f32 %v8037_v34, %v5486_v35 }
 0x325   : > { %v3495_v14 = vpop.f32.mrf.mxu1  ;;  %v5091_v62 = vadd.f32 %v5059_v30, %v4963_v33  ;;  %v8044_v30 = vld [vmem:[#allocation7 + $0x78] sm:$0xff] }
 0x326   : > { %7813 = vst [vmem:[%s10152_s7 + $0x20] sm:$0xff] %v7515_v19   ;;  %v7675_v39 = vpack.c.bf16 %v3492_v10, %v3488_v57  ;;  %v5488_v12 = vpop.permute.xlu0 %5487  ;;  %v3304_v23 = vpop.f32.mrf.mxu0  ;;  %7799 = vst [vmem:[%s10103_s15 + $0x28] sm:$0xff] %v7440_v56   ;;  %v5570_v8 = vadd.f32 %v5538_v49, %v5442_v20  ;;  %v3496_v34 = vadd.f32 %v3495_v14, %v3302_v21  ;;  %v8042_v14 = vld [vmem:[#allocation8 + $0x70] sm:$0xff] }
 0x327   : > { %v3497_v17 = vpop.f32.mrf.mxu1  ;;  %v5010_v58 = vpop.permute.xlu1 %5009  ;;  %v5539_v40 = vmul.f32 %v8038_v13, %v5488_v12  ;;  %v5443_v57 = vmul.f32 %v8039_v54, %v9887_v60  ;;  %v5444_v19 = vmul.f32 %v8040_v26, %v9905_v16  ;;  %v8043_v60 = vld [vmem:[#allocation7 + $0x70] sm:$0xff] }
 0x328   : > { %7845 = vst [vmem:[%s10152_s7 + $0xa0] sm:$0xff] %v7675_v39   ;;  %v3306_v41 = vpop.f32.mrf.mxu0  ;;  %v7600_v44 = vpack.c.bf16 %v5570_v8, %v5569_v28  ;;  %v5060_v15 = vmul.f32 %v8041_v53, %v5010_v58  ;;  %v3498_v0 = vadd.f32 %v3497_v17, %v3304_v23  ;;  %v4965_v16 = vmul.f32 %v8043_v60, %v9900_v6  ;;  %v8045_v58 = vld [vmem:[#allocation8 + $0x78] sm:$0xff] }
 0x329   : > { %v3499_v1 = vpop.f32.mrf.mxu1  ;;  %v5571_v49 = vadd.f32 %v5539_v40, %v5443_v57  ;;  %v4966_v8 = vmul.f32 %v8044_v30, %v9916_v59  ;;  %v5446_v40 = vmul.f32 %v8044_v30, %v9927_v43  ;;  %v8046_v57 = vld [vmem:[#allocation8 + $0x80] sm:$0xff] }
 0x32a   : > { %v3500_v36 = vadd.f32 %v3499_v1, %v3306_v41  ;;  %v5012_v46 = vpop.permute.xlu0 %5011  ;;  %v3308_v5 = vpop.f32.mrf.mxu0  ;;  %7830 = vst [vmem:[%s10103_s15 + $0xa8] sm:$0xff] %v7600_v44   ;;  %v5092_v55 = vadd.f32 %v5060_v15, %v4964_v25 }
 0x32b   : > { %v3501_v27 = vpop.f32.mrf.mxu1  ;;  %v5490_v18 = vpop.permute.xlu1 %5489  ;;  %v5061_v39 = vmul.f32 %v8042_v14, %v5012_v46 }
 0x32c   : > { %v7520_v4 = vpack.c.bf16 %v3500_v36, %v3496_v34  ;;  %v3502_v31 = vadd.f32 %v3501_v27, %v3308_v5  ;;  %v3312_v51 = vpop.f32.mrf.mxu0  ;;  %v7445_v10 = vpack.c.bf16 %v5092_v55, %v5091_v62  ;;  %v5540_v35 = vmul.f32 %v8041_v53, %v5490_v18 }
 0x32d   : > { %v3505_v21 = vpop.f32.mrf.mxu1  ;;  %v5093_v53 = vadd.f32 %v5061_v39, %v4965_v16  ;;  %v5445_v62 = vmul.f32 %v8043_v60, %v9911_v48  ;;  %v8047_v48 = vld [vmem:[#allocation7 + $0x80] sm:$0xff] }
 0x32e   : > { %7814 = vst [vmem:[%s10152_s7 + $0x28] sm:$0xff] %v7520_v4   ;;  %v7680_v61 = vpack.c.bf16 %v3502_v31, %v3498_v0  ;;  %v5492_v20 = vpop.permute.xlu0 %5491  ;;  %v3314_v56 = vpop.f32.mrf.mxu0  ;;  %7800 = vst [vmem:[%s10103_s15 + $0x30] sm:$0xff] %v7445_v10   ;;  %v5572_v12 = vadd.f32 %v5540_v35, %v5444_v19  ;;  %v3506_v33 = vadd.f32 %v3505_v21, %v3312_v51 }
 0x32f   : > { %v3507_v23 = vpop.f32.mrf.mxu1  ;;  %v5014_v28 = vpop.permute.xlu1 %5013  ;;  %v5541_v15 = vmul.f32 %v8042_v14, %v5492_v20  ;;  %v4967_v43 = vmul.f32 %v8047_v48, %v9922_v37  ;;  %v8048_v20 = vld [vmem:[#allocation7 + $0x88] sm:$0xff] }
 0x330   : > { %7846 = vst [vmem:[%s10152_s7 + $0xa8] sm:$0xff] %v7680_v61   ;;  %v3316_v13 = vpop.f32.mrf.mxu0  ;;  %v7605_v17 = vpack.c.bf16 %v5572_v12, %v5571_v49  ;;  %v5062_v41 = vmul.f32 %v8045_v58, %v5014_v28  ;;  %v3508_v36 = vadd.f32 %v3507_v23, %v3314_v56  ;;  %v4968_v56 = vmul.f32 %v8048_v20, %v9938_v2  ;;  %v8049_v14 = vld [vmem:[#allocation8 + $0x88] sm:$0xff] }
 0x331   : > { %v3509_v54 = vpop.f32.mrf.mxu1  ;;  %v5573_v51 = vadd.f32 %v5541_v15, %v5445_v62 }
 0x332   : > { %v3510_v26 = vadd.f32 %v3509_v54, %v3316_v13  ;;  %v5016_v25 = vpop.permute.xlu0 %5015  ;;  %v3318_v44 = vpop.f32.mrf.mxu0  ;;  %7831 = vst [vmem:[%s10103_s15 + $0xb0] sm:$0xff] %v7605_v17   ;;  %v5094_v1 = vadd.f32 %v5062_v41, %v4966_v8 }
 0x333   : > { %v3511_v34 = vpop.f32.mrf.mxu1  ;;  %v5494_v5 = vpop.permute.xlu1 %5493  ;;  %v5063_v19 = vmul.f32 %v8046_v57, %v5016_v25 }
 0x334   : > { %v7525_v6 = vpack.c.bf16 %v3510_v26, %v3506_v33  ;;  %v3512_v46 = vadd.f32 %v3511_v34, %v3318_v44  ;;  %v3322_v59 = vpop.f32.mrf.mxu0  ;;  %v7450_v55 = vpack.c.bf16 %v5094_v1, %v5093_v53  ;;  %v5542_v27 = vmul.f32 %v8045_v58, %v5494_v5 }
 0x335   : > { %v3515_v0 = vpop.f32.mrf.mxu1  ;;  %v5095_v16 = vadd.f32 %v5063_v19, %v4967_v43  ;;  %v5447_v33 = vmul.f32 %v8047_v48, %v9933_v29  ;;  %v5448_v26 = vmul.f32 %v8048_v20, %v9949_v38  ;;  %v8051_v29 = vld [vmem:[#allocation7 + $0x90] sm:$0xff] }
 0x336   : > { %7815 = vst [vmem:[%s10152_s7 + $0x30] sm:$0xff] %v7525_v6   ;;  %v7685_v4 = vpack.c.bf16 %v3512_v46, %v3508_v36  ;;  %v5496_v31 = vpop.permute.xlu0 %5495  ;;  %v3324_v18 = vpop.f32.mrf.mxu0  ;;  %7801 = vst [vmem:[%s10103_s15 + $0x38] sm:$0xff] %v7450_v55   ;;  %v5574_v10 = vadd.f32 %v5542_v27, %v5446_v40  ;;  %v3516_v23 = vadd.f32 %v3515_v0, %v3322_v59  ;;  %v8050_v6 = vld [vmem:[#allocation8 + $0x90] sm:$0xff]  ;;  %v8052_v55 = vld [vmem:[#allocation7 + $0x98] sm:$0xff] }
 0x337   : > { %v3517_v35 = vpop.f32.mrf.mxu1  ;;  %v5018_v21 = vpop.permute.xlu1 %5017  ;;  %v5543_v30 = vmul.f32 %v8046_v57, %v5496_v31  ;;  %v4969_v38 = vmul.f32 %v8051_v29, %v9944_v24  ;;  %v4970_v27 = vmul.f32 %v8052_v55, %v9960_v32 }
 0x338   : > { %7847 = vst [vmem:[%s10152_s7 + $0xb0] sm:$0xff] %v7685_v4   ;;  %v3326_v61 = vpop.f32.mrf.mxu0  ;;  %v7610_v49 = vpack.c.bf16 %v5574_v10, %v5573_v51  ;;  %v5064_v39 = vmul.f32 %v8049_v14, %v5018_v21  ;;  %v3518_v58 = vadd.f32 %v3517_v35, %v3324_v18  ;;  %v8053_v4 = vld [vmem:[#allocation8 + $0x98] sm:$0xff] }
 0x339   : > { %v3519_v12 = vpop.f32.mrf.mxu1  ;;  %v5575_v36 = vadd.f32 %v5543_v30, %v5447_v33  ;;  %v8054_v30 = vld [vmem:[#allocation8 + $0xa0] sm:$0xff] }
 0x33a   : > { %v3520_v28 = vadd.f32 %v3519_v12, %v3326_v61  ;;  %v5020_v13 = vpop.permute.xlu0 %5019  ;;  %v3328_v60 = vpop.f32.mrf.mxu0  ;;  %7832 = vst [vmem:[%s10103_s15 + $0xb8] sm:$0xff] %v7610_v49   ;;  %v5096_v8 = vadd.f32 %v5064_v39, %v4968_v56  ;;  %v5449_v49 = vmul.f32 %v8051_v29, %v9955_v42  ;;  %v8055_v42 = vld [vmem:[#allocation7 + $0xa0] sm:$0xff]  ;;  %v10915_v29 = vld [vmem:[#allocation32_spill] sm:$0xff] }
 0x33b   : > { %v3521_v17 = vpop.f32.mrf.mxu1  ;;  %v5498_v54 = vpop.permute.xlu1 %5497  ;;  %v5065_v46 = vmul.f32 %v8050_v6, %v5020_v13 }
 0x33c   : > { %v7530_v37 = vpack.c.bf16 %v3520_v28, %v3516_v23  ;;  %v3522_v41 = vadd.f32 %v3521_v17, %v3328_v60  ;;  %v3332_v2 = vpop.f32.mrf.mxu0  ;;  %v7455_v25 = vpack.c.bf16 %v5096_v8, %v5095_v16  ;;  %v5544_v44 = vmul.f32 %v8049_v14, %v5498_v54  ;;  %v8056_v54 = vld [vmem:[#allocation7 + $0xa8] sm:$0xff] }
 0x33d   : > { %v3525_v53 = vpop.f32.mrf.mxu1  ;;  %v5097_v35 = vadd.f32 %v5065_v46, %v4969_v38  ;;  %v5450_v14 = vmul.f32 %v8052_v55, %v9971_v47  ;;  %v4971_v47 = vmul.f32 %v8055_v42, %v9966_v45  ;;  %v5451_v38 = vmul.f32 %v8055_v42, %v10915_v29  ;;  %v10916_v55 = vld [vmem:[#allocation34_spill] sm:$0xff] }
 0x33e   : > { %7816 = vst [vmem:[%s10152_s7 + $0x38] sm:$0xff] %v7530_v37   ;;  %v7690_v15 = vpack.c.bf16 %v3522_v41, %v3518_v58  ;;  %v5500_v1 = vpop.permute.xlu0 %5499  ;;  %v3334_v34 = vpop.f32.mrf.mxu0  ;;  %7802 = vst [vmem:[%s10103_s15 + $0x40] sm:$0xff] %v7455_v25   ;;  %v5576_v5 = vadd.f32 %v5544_v44, %v5448_v26  ;;  %v3526_v51 = vadd.f32 %v3525_v53, %v3332_v2  ;;  %v8057_v26 = vld [vmem:[#allocation8 + $0xa8] sm:$0xff] }
 0x33f   : > { %v3527_v59 = vpop.f32.mrf.mxu1  ;;  %v5022_v62 = vpop.permute.xlu1 %5021  ;;  %v5545_v21 = vmul.f32 %v8050_v6, %v5500_v1  ;;  %v4972_v2 = vmul.f32 %v8056_v54, %v9982_v63 }
 0x340   : > { %7848 = vst [vmem:[%s10152_s7 + $0xb8] sm:$0xff] %v7690_v15   ;;  %v3336_v40 = vpop.f32.mrf.mxu0  ;;  %v7615_v0 = vpack.c.bf16 %v5576_v5, %v5575_v36  ;;  %v5066_v31 = vmul.f32 %v8053_v4, %v5022_v62  ;;  %v3528_v43 = vadd.f32 %v3527_v59, %v3334_v34 }
 0x341   : > { %v3529_v18 = vpop.f32.mrf.mxu1  ;;  %v5577_v16 = vadd.f32 %v5545_v21, %v5449_v49 }
 0x342   : > { %v3530_v57 = vadd.f32 %v3529_v18, %v3336_v40  ;;  %v5024_v19 = vpop.permute.xlu0 %5023  ;;  %v3338_v10 = vpop.f32.mrf.mxu0  ;;  %7833 = vst [vmem:[%s10103_s15 + $0xc0] sm:$0xff] %v7615_v0   ;;  %v5098_v61 = vadd.f32 %v5066_v31, %v4970_v27  ;;  %v5452_v27 = vmul.f32 %v8056_v54, %v10916_v55  ;;  %v10918_v54 = vld [vmem:[#allocation35_spill] sm:$0xff] }
 0x343   : > { %v3531_v48 = vpop.f32.mrf.mxu1  ;;  %v5502_v56 = vpop.permute.xlu1 %5501  ;;  %v5067_v8 = vmul.f32 %v8054_v30, %v5024_v19 }
 0x344   : > { %v7535_v24 = vpack.c.bf16 %v3530_v57, %v3526_v51  ;;  %v3532_v20 = vadd.f32 %v3531_v48, %v3338_v10  ;;  %v3342_v32 = vpop.f32.mrf.mxu0  ;;  %v7460_v39 = vpack.c.bf16 %v5098_v61, %v5097_v35  ;;  %v5546_v12 = vmul.f32 %v8053_v4, %v5502_v56  ;;  %v8058_v10 = vld [vmem:[#allocation8 + $0xb0] sm:$0xff] }
 0x345   : > { %v3535_v23 = vpop.f32.mrf.mxu1  ;;  %v5099_v36 = vadd.f32 %v5067_v8, %v4971_v47 }
 0x346   : > { %7817 = vst [vmem:[%s10152_s7 + $0x40] sm:$0xff] %v7535_v24   ;;  %v7695_v28 = vpack.c.bf16 %v3532_v20, %v3528_v43  ;;  %v5504_v13 = vpop.permute.xlu0 %5503  ;;  %v3344_v60 = vpop.f32.mrf.mxu0  ;;  %7803 = vst [vmem:[%s10103_s15 + $0x48] sm:$0xff] %v7460_v39   ;;  %v5578_v17 = vadd.f32 %v5546_v12, %v5450_v14  ;;  %v3536_v53 = vadd.f32 %v3535_v23, %v3342_v32  ;;  %v8059_v24 = vld [vmem:[#allocation7 + $0xb0] sm:$0xff]  ;;  %v8060_v32 = vld [vmem:[#allocation7 + $0xb8] sm:$0xff] }
 0x347   : > { %v3537_v58 = vpop.f32.mrf.mxu1  ;;  %v5026_v37 = vpop.permute.xlu1 %5025  ;;  %v5547_v6 = vmul.f32 %v8054_v30, %v5504_v13  ;;  %v10917_v20 = vld [vmem:[#allocation33_spill] sm:$0xff]  ;;  %v4974_v49 = vmul.f32 %v8060_v32, %v10004_v7  ;;  %v8061_v39 = vld [vmem:[#allocation8 + $0xb8] sm:$0xff] }
 0x348   : > { %7849 = vst [vmem:[%s10152_s7 + $0xc0] sm:$0xff] %v7695_v28   ;;  %v3346_v41 = vpop.f32.mrf.mxu0  ;;  %v7620_v33 = vpack.c.bf16 %v5578_v17, %v5577_v16  ;;  %v5068_v25 = vmul.f32 %v8057_v26, %v5026_v37  ;;  %v3538_v59 = vadd.f32 %v3537_v58, %v3344_v60  ;;  %v4973_v56 = vmul.f32 %v8059_v24, %v10917_v20 }
 0x349   : > { %v3539_v44 = vpop.f32.mrf.mxu1  ;;  %v5579_v19 = vadd.f32 %v5547_v6, %v5451_v38  ;;  %v8062_v6 = vld [vmem:[#allocation8 + $0xc0] sm:$0xff]  ;;  %v8064_v38 = vld [vmem:[#allocation7 + $0xc8] sm:$0xff] }
 0x34a   : > { %v3540_v15 = vadd.f32 %v3539_v44, %v3346_v41  ;;  %v5028_v1 = vpop.permute.xlu0 %5027  ;;  %v3348_v34 = vpop.f32.mrf.mxu0  ;;  %7834 = vst [vmem:[%s10103_s15 + $0xc8] sm:$0xff] %v7620_v33   ;;  %v5100_v46 = vadd.f32 %v5068_v25, %v4972_v2  ;;  %v5453_v2 = vmul.f32 %v8059_v24, %v10918_v54  ;;  %v10919_v33 = vld [vmem:[#allocation37_spill] sm:$0xff]  ;;  %v4976_v55 = vmul.f32 %v8064_v38, %v10026_v50 }
 0x34b   : > { %v3541_v5 = vpop.f32.mrf.mxu1  ;;  %v5506_v40 = vpop.permute.xlu1 %5505  ;;  %v5069_v35 = vmul.f32 %v8058_v10, %v5028_v1 }
 0x34c   : > { %v7540_v45 = vpack.c.bf16 %v3540_v15, %v3536_v53  ;;  %v3542_v62 = vadd.f32 %v3541_v5, %v3348_v34  ;;  %v3352_v63 = vpop.f32.mrf.mxu0  ;;  %v7465_v0 = vpack.c.bf16 %v5100_v46, %v5099_v36  ;;  %v5548_v4 = vmul.f32 %v8057_v26, %v5506_v40  ;;  %v8063_v40 = vld [vmem:[#allocation7 + $0xc0] sm:$0xff] }
 0x34d   : > { %v3545_v31 = vpop.f32.mrf.mxu1  ;;  %v5101_v30 = vadd.f32 %v5069_v35, %v4973_v56  ;;  %v5454_v26 = vmul.f32 %v8060_v32, %v10919_v33  ;;  %v5455_v56 = vmul.f32 %v8063_v40, %v10021_v22  ;;  %v5456_v32 = vmul.f32 %v8064_v38, %v10037_v11  ;;  %v8067_v22 = vld [vmem:[#allocation7 + $0xd0] sm:$0xff] }
 0x34e   : > { %7818 = vst [vmem:[%s10152_s7 + $0x48] sm:$0xff] %v7540_v45   ;;  %v7700_v18 = vpack.c.bf16 %v3542_v62, %v3538_v59  ;;  %v5508_v51 = vpop.permute.xlu0 %5507  ;;  %v3354_v57 = vpop.f32.mrf.mxu0  ;;  %7804 = vst [vmem:[%s10103_s15 + $0x50] sm:$0xff] %v7465_v0   ;;  %v5580_v21 = vadd.f32 %v5548_v4, %v5452_v27  ;;  %v3546_v28 = vadd.f32 %v3545_v31, %v3352_v63  ;;  %v10920_v63 = vld [vmem:[#allocation36_spill] sm:$0xff] }
 0x34f   : > { %v3547_v61 = vpop.f32.mrf.mxu1  ;;  %v5030_v48 = vpop.permute.xlu1 %5029  ;;  %v5549_v8 = vmul.f32 %v8058_v10, %v5508_v51  ;;  %v4975_v29 = vmul.f32 %v8063_v40, %v10920_v63  ;;  %v8065_v0 = vld [vmem:[#allocation8 + $0xc8] sm:$0xff]  ;;  %v4977_v11 = vmul.f32 %v8067_v22, %v10032_v3 }
 0x350   : > { %7850 = vst [vmem:[%s10152_s7 + $0xc8] sm:$0xff] %v7700_v18   ;;  %v3356_v43 = vpop.f32.mrf.mxu0  ;;  %v7625_v14 = vpack.c.bf16 %v5580_v21, %v5579_v19  ;;  %v5070_v12 = vmul.f32 %v8061_v39, %v5030_v48  ;;  %v3548_v37 = vadd.f32 %v3547_v61, %v3354_v57 }
 0x351   : > { %v3549_v23 = vpop.f32.mrf.mxu1  ;;  %v5581_v36 = vadd.f32 %v5549_v8, %v5453_v2 }
 0x352   : > { %v3550_v13 = vadd.f32 %v3549_v23, %v3356_v43  ;;  %v5032_v60 = vpop.permute.xlu0 %5031  ;;  %v3358_v16 = vpop.f32.mrf.mxu0  ;;  %7835 = vst [vmem:[%s10103_s15 + $0xd0] sm:$0xff] %v7625_v14   ;;  %v5102_v17 = vadd.f32 %v5070_v12, %v4974_v49 }
 0x353   : > { %v3551_v58 = vpop.f32.mrf.mxu1  ;;  %v5510_v47 = vpop.permute.xlu1 %5509  ;;  %v5071_v46 = vmul.f32 %v8062_v6, %v5032_v60  ;;  %v8066_v60 = vld [vmem:[#allocation8 + $0xd0] sm:$0xff] }
 0x354   : > { %v7545_v41 = vpack.c.bf16 %v3550_v13, %v3546_v28  ;;  %v3552_v42 = vadd.f32 %v3551_v58, %v3358_v16  ;;  %v3362_v7 = vpop.f32.mrf.mxu0  ;;  %v7470_v25 = vpack.c.bf16 %v5102_v17, %v5101_v30  ;;  %v5550_v44 = vmul.f32 %v8061_v39, %v5510_v47  ;;  %v8069_v47 = vld [vmem:[#allocation8 + $0xd8] sm:$0xff] }
 0x355   : > { %v3555_v53 = vpop.f32.mrf.mxu1  ;;  %v5103_v10 = vadd.f32 %v5071_v46, %v4975_v29  ;;  %v5457_v46 = vmul.f32 %v8067_v22, %v10043_v9  ;;  %v8071_v9 = vld [vmem:[#allocation7 + $0xe0] sm:$0xff] }
 0x356   : > { %7819 = vst [vmem:[%s10152_s7 + $0x50] sm:$0xff] %v7545_v41   ;;  %v7705_v15 = vpack.c.bf16 %v3552_v42, %v3548_v37  ;;  %v5512_v1 = vpop.permute.xlu0 %5511  ;;  %v3364_v34 = vpop.f32.mrf.mxu0  ;;  %7805 = vst [vmem:[%s10103_s15 + $0x58] sm:$0xff] %v7470_v25   ;;  %v5582_v5 = vadd.f32 %v5550_v44, %v5454_v26  ;;  %v3556_v18 = vadd.f32 %v3555_v53, %v3362_v7  ;;  %v8068_v37 = vld [vmem:[#allocation7 + $0xd8] sm:$0xff] }
 0x357   : > { %v3557_v59 = vpop.f32.mrf.mxu1  ;;  %v5034_v45 = vpop.permute.xlu1 %5033  ;;  %v5551_v35 = vmul.f32 %v8062_v6, %v5512_v1  ;;  %v4978_v41 = vmul.f32 %v8068_v37, %v10048_v52 }
 0x358   : > { %7851 = vst [vmem:[%s10152_s7 + $0xd0] sm:$0xff] %v7705_v15   ;;  %v3366_v62 = vpop.f32.mrf.mxu0  ;;  %v7630_v27 = vpack.c.bf16 %v5582_v5, %v5581_v36  ;;  %v5072_v4 = vmul.f32 %v8065_v0, %v5034_v45  ;;  %v3558_v48 = vadd.f32 %v3557_v59, %v3364_v34  ;;  %v10921_v5 = vld [vmem:[#allocation106_spill] sm:$0xff] }
 0x359   : > { %v3559_v31 = vpop.f32.mrf.mxu1  ;;  %v5583_v13 = vadd.f32 %v5551_v35, %v5455_v56  ;;  %v5458_v59 = vmul.f32 %v8068_v37, %v10921_v5  ;;  %v10923_v35 = vld [vmem:[#allocation108_spill] sm:$0xff] }
 0x35a   : > { %v3560_v51 = vadd.f32 %v3559_v31, %v3366_v62  ;;  %v5036_v57 = vpop.permute.xlu0 %5035  ;;  %v3368_v19 = vpop.f32.mrf.mxu0  ;;  %7836 = vst [vmem:[%s10103_s15 + $0xd8] sm:$0xff] %v7630_v27   ;;  %v5104_v21 = vadd.f32 %v5072_v4, %v4976_v55  ;;  %v8070_v27 = vld [vmem:[#allocation8 + $0xe0] sm:$0xff] }
 0x35b   : > { %v3561_v61 = vpop.f32.mrf.mxu1  ;;  %v5514_v20 = vpop.permute.xlu1 %5513  ;;  %v5073_v16 = vmul.f32 %v8066_v60, %v5036_v57  ;;  %v10922_v57 = vld [vmem:[#allocation38_spill] sm:$0xff] }
 0x35c   : > { %v7550_v43 = vpack.c.bf16 %v3560_v51, %v3556_v18  ;;  %v3562_v24 = vadd.f32 %v3561_v61, %v3368_v19  ;;  %v3372_v50 = vpop.f32.mrf.mxu0  ;;  %v7475_v49 = vpack.c.bf16 %v5104_v21, %v5103_v10  ;;  %v5552_v14 = vmul.f32 %v8065_v0, %v5514_v20  ;;  %v8072_v10 = vld [vmem:[#allocation7 + $0xe8] sm:$0xff] }
 0x35d   : > { %v3565_v39 = vpop.f32.mrf.mxu1  ;;  %v5105_v44 = vadd.f32 %v5073_v16, %v4977_v11  ;;  %v4979_v19 = vmul.f32 %v8071_v9, %v10922_v57  ;;  %v4980_v21 = vmul.f32 %v8072_v10, %v10923_v35 }
 0x35e   : > { %7820 = vst [vmem:[%s10152_s7 + $0x58] sm:$0xff] %v7550_v43   ;;  %v7710_v12 = vpack.c.bf16 %v3562_v24, %v3558_v48  ;;  %v5516_v23 = vpop.permute.xlu0 %5515  ;;  %v3374_v28 = vpop.f32.mrf.mxu0  ;;  %7806 = vst [vmem:[%s10103_s15 + $0x60] sm:$0xff] %v7475_v49   ;;  %v5584_v30 = vadd.f32 %v5552_v14, %v5456_v32  ;;  %v3566_v2 = vadd.f32 %v3565_v39, %v3372_v50  ;;  %v8073_v48 = vld [vmem:[#allocation8 + $0xe8] sm:$0xff] }
 0x35f   : > { %v3567_v8 = vpop.f32.mrf.mxu1  ;;  %v5038_v17 = vpop.permute.xlu1 %5037  ;;  %v5553_v53 = vmul.f32 %v8066_v60, %v5516_v23 }
 0x360   : > { %7852 = vst [vmem:[%s10152_s7 + $0xd8] sm:$0xff] %v7710_v12   ;;  %v3376_v58 = vpop.f32.mrf.mxu0  ;;  %v7635_v42 = vpack.c.bf16 %v5584_v30, %v5583_v13  ;;  %v5074_v7 = vmul.f32 %v8069_v47, %v5038_v17  ;;  %v3568_v34 = vadd.f32 %v3567_v8, %v3374_v28  ;;  %v10924_v30 = vld [vmem:[#allocation39_spill] sm:$0xff]  ;;  %v10925_v17 = vld [vmem:[#allocation41_spill] sm:$0xff] }
 0x361   : > { %v3569_v54 = vpop.f32.mrf.mxu1  ;;  %v5585_v55 = vadd.f32 %v5553_v53, %v5457_v46  ;;  %v5459_v8 = vmul.f32 %v8071_v9, %v10924_v30  ;;  %v8075_v53 = vld [vmem:[#allocation7 + $0xf0] sm:$0xff]  ;;  %v10929_v9 = vld [vmem:[#allocation110_spill] sm:$0xff] }
 0x362   : > { %v3570_v33 = vadd.f32 %v3569_v54, %v3376_v58  ;;  %v5040_v26 = vpop.permute.xlu0 %5039  ;;  %v3378_v25 = vpop.f32.mrf.mxu0  ;;  %7837 = vst [vmem:[%s10103_s15 + $0xe0] sm:$0xff] %v7635_v42   ;;  %v5106_v15 = vadd.f32 %v5074_v7, %v4978_v41  ;;  %v5460_v58 = vmul.f32 %v8072_v10, %v10925_v17  ;;  %v8074_v7 = vld [vmem:[#allocation8 + $0xf0] sm:$0xff] }
 0x363   : > { %v3571_v1 = vpop.f32.mrf.mxu1  ;;  %v5518_v6 = vpop.permute.xlu1 %5517  ;;  %v5075_v0 = vmul.f32 %v8070_v27, %v5040_v26 }
 0x364   : > { %v7555_v3 = vpack.c.bf16 %v3570_v33, %v3566_v2  ;;  %v3572_v36 = vadd.f32 %v3571_v1, %v3378_v25  ;;  %v3382_v52 = vpop.f32.mrf.mxu0  ;;  %v7480_v45 = vpack.c.bf16 %v5106_v15, %v5105_v44  ;;  %v5554_v62 = vmul.f32 %v8069_v47, %v5518_v6  ;;  %v10926_v15 = vld [vmem:[#allocation40_spill] sm:$0xff] }
 0x365   : > { %v3575_v40 = vpop.f32.mrf.mxu1  ;;  %v5107_v49 = vadd.f32 %v5075_v0, %v4979_v19  ;;  %v4981_v1 = vmul.f32 %v8075_v53, %v10926_v15 }
 0x366   : > { %7821 = vst [vmem:[%s10152_s7 + $0x60] sm:$0xff] %v7555_v3   ;;  %v7715_v63 = vpack.c.bf16 %v3572_v36, %v3568_v34  ;;  %v5520_v29 = vpop.permute.xlu0 %5519  ;;  %v3384_v38 = vpop.f32.mrf.mxu0  ;;  %7807 = vst [vmem:[%s10103_s15 + $0x68] sm:$0xff] %v7480_v45   ;;  %v5586_v4 = vadd.f32 %v5554_v62, %v5458_v59  ;;  %v3576_v20 = vadd.f32 %v3575_v40, %v3382_v52  ;;  %v8076_v34 = vld [vmem:[#allocation7 + $0xf8] sm:$0xff]  ;;  %v10927_v3 = vld [vmem:[#allocation107_spill] sm:$0xff] }
 0x367   : > { %v3577_v31 = vpop.f32.mrf.mxu1  ;;  %v5042_v18 = vpop.permute.xlu1 %5041  ;;  %v5555_v14 = vmul.f32 %v8070_v27, %v5520_v29  ;;  %v4982_v36 = vmul.f32 %v8076_v34, %v10927_v3  ;;  %v8077_v52 = vld [vmem:[#allocation8 + $0xf8] sm:$0xff]  ;;  %v5462_v57 = vmul.f32 %v8076_v34, %v10929_v9 }
 0x368   : > { %7853 = vst [vmem:[%s10152_s7 + $0xe0] sm:$0xff] %v7715_v63   ;;  %v3386_v51 = vpop.f32.mrf.mxu0  ;;  %v7640_v61 = vpack.c.bf16 %v5586_v4, %v5585_v55  ;;  %v5076_v43 = vmul.f32 %v8073_v48, %v5042_v18  ;;  %v3578_v23 = vadd.f32 %v3577_v31, %v3384_v38  ;;  %v10928_v18 = vld [vmem:[#allocation42_spill] sm:$0xff] }
 0x369   : > { %v3579_v24 = vpop.f32.mrf.mxu1  ;;  %v5587_v47 = vadd.f32 %v5555_v14, %v5459_v8 }
 0x36a   : > { %v3580_v50 = vadd.f32 %v3579_v24, %v3386_v51  ;;  %v5044_v56 = vpop.permute.xlu0 %5043  ;;  %v3388_v32 = vpop.f32.mrf.mxu0  ;;  %7838 = vst [vmem:[%s10103_s15 + $0xe8] sm:$0xff] %v7640_v61   ;;  %v5108_v39 = vadd.f32 %v5076_v43, %v4980_v21  ;;  %v5461_v51 = vmul.f32 %v8075_v53, %v10928_v18 }
 0x36b   : > { %v3581_v12 = vpop.f32.mrf.mxu1  ;;  %v5522_v60 = vpop.permute.xlu1 %5521  ;;  %v5077_v54 = vmul.f32 %v8074_v7, %v5044_v56 }
 0x36c   : > { %v7560_v28 = vpack.c.bf16 %v3580_v50, %v3576_v20  ;;  %v3582_v13 = vadd.f32 %v3581_v12, %v3388_v32  ;;  %v3392_v16 = vpop.f32.mrf.mxu0  ;;  %v7485_v22 = vpack.c.bf16 %v5108_v39, %v5107_v49  ;;  %v5556_v11 = vmul.f32 %v8073_v48, %v5522_v60 }
 0x36d   : > { %v3585_v37 = vpop.f32.mrf.mxu1  ;;  %v5109_v40 = vadd.f32 %v5077_v54, %v4981_v1 }
 0x36e   : > { %7822 = vst [vmem:[%s10152_s7 + $0x68] sm:$0xff] %v7560_v28   ;;  %v7720_v41 = vpack.c.bf16 %v3582_v13, %v3578_v23  ;;  %v3394_v42 = vpop.f32.mrf.mxu0  ;;  %7808 = vst [vmem:[%s10103_s15 + $0x70] sm:$0xff] %v7485_v22   ;;  %v5588_v2 = vadd.f32 %v5556_v11, %v5460_v58  ;;  %v5524_v33 = vpop.permute.xlu0 %5523  ;;  %v3586_v59 = vadd.f32 %v3585_v37, %v3392_v16 }
 0x36f   : > { %v3587_v26 = vpop.f32.mrf.mxu1  ;;  %v5046_v25 = vpop.permute.xlu1 %5045  ;;  %v5557_v63 = vmul.f32 %v8074_v7, %v5524_v33 }
 0x370   : > { %7854 = vst [vmem:[%s10152_s7 + $0xe8] sm:$0xff] %v7720_v41   ;;  %v3396_v44 = vpop.f32.mrf.mxu0  ;;  %v7645_v6 = vpack.c.bf16 %v5588_v2, %v5587_v47  ;;  %v5078_v46 = vmul.f32 %v8077_v52, %v5046_v25  ;;  %v3588_v55 = vadd.f32 %v3587_v26, %v3394_v42 }
 0x371   : > { %v3589_v5 = vpop.f32.mrf.mxu1  ;;  %v5589_v48 = vadd.f32 %v5557_v63, %v5461_v51 }
 0x372   : > { %v3590_v45 = vadd.f32 %v3589_v5, %v3396_v44  ;;  %v3398_v62 = vpop.f32.mrf.mxu0  ;;  %7839 = vst [vmem:[%s10103_s15 + $0xf0] sm:$0xff] %v7645_v6   ;;  %v5110_v29 = vadd.f32 %v5078_v46, %v4982_v36 }
 0x373   : > { %v3591_v38 = vpop.f32.mrf.mxu1  ;;  %v5526_v4 = vpop.permute.xlu1 %5525 }
 0x374   : > { %v7565_v27 = vpack.c.bf16 %v3590_v45, %v3586_v59  ;;  %v3592_v0 = vadd.f32 %v3591_v38, %v3398_v62  ;;  %v3402_v31 = vpop.f32.mrf.mxu0  ;;  %v7490_v19 = vpack.c.bf16 %v5110_v29, %v5109_v40  ;;  %v5558_v10 = vmul.f32 %v8077_v52, %v5526_v4 }
 0x375   : > { %v3595_v35 = vpop.f32.mrf.mxu1 }
 0x376   : > { %7823 = vst [vmem:[%s10152_s7 + $0x70] sm:$0xff] %v7565_v27   ;;  %v7725_v21 = vpack.c.bf16 %v3592_v0, %v3588_v55  ;;  %v3404_v61 = vpop.f32.mrf.mxu0  ;;  %7809 = vst [vmem:[%s10103_s15 + $0x78] sm:$0xff] %v7490_v19   ;;  %v5590_v43 = vadd.f32 %v5558_v10, %v5462_v57  ;;  %v3596_v32 = vadd.f32 %v3595_v35, %v3402_v31 }
 0x377   : > { %v3597_v24 = vpop.f32.mrf.mxu1 }
 0x378   : > { %7855 = vst [vmem:[%s10152_s7 + $0xf0] sm:$0xff] %v7725_v21   ;;  %v3406_v20 = vpop.f32.mrf.mxu0  ;;  %v7650_v50 = vpack.c.bf16 %v5590_v43, %v5589_v48  ;;  %v3598_v12 = vadd.f32 %v3597_v24, %v3404_v61 }
 0x379   : > { %v3599_v56 = vpop.f32.mrf.mxu1 }
 0x37a   : > { %v3600_v49 = vadd.f32 %v3599_v56, %v3406_v20  ;;  %v3408_v14 = vpop.f32.mrf.mxu0  ;;  %7840 = vst [vmem:[%s10103_s15 + $0xf8] sm:$0xff] %v7650_v50  }
 0x37b   : > { %v3601_v39 = vpop.f32.mrf.mxu1 }
 0x37c   : > { %v7570_v23 = vpack.c.bf16 %v3600_v49, %v3596_v32  ;;  %v3602_v28 = vadd.f32 %v3601_v39, %v3408_v14 }
 0x37d   : > { %8223 = shalt.err (!%p8220_p1)
}
 0x37e   : > { %s8224_s15 = scalar_lea.hbm %s10277_s17, 4096  ;;  %s8228_s11 = scalar_lea.hbm %s10371_s5, 8192 }
 0x37f   : > { %p8225_p4 = scmp.ne.s32.totalorder %s10277_s17, %s8224_s15  ;;  %p8229_p3 = scmp.lt.s32.totalorder %s10277_s17, %s10371_s5 }
 0x380   : > { %p8230_p11 = scmp.lt.s32.totalorder %s8228_s11, %s8224_s15 }
 0x381   : > { %p8226_p6 = pnand %p8225_p4, %p10904_p12 }
 0x382   : > { %p8231_p7 = por %p8230_p11, %p8229_p3 }
 0x383   : > { %p8227_p8 = pneg %p8226_p6 }
 0x385   : > { %p8232_p13 = pnand %p8231_p7, %p8227_p8 }
 0x387   : > { %8235 = shalt.err (!%p8232_p13)
}
 0x388   : > { %7872 = dma.vmem_to_hbm [thread:$0]  (%p10904_p12), %s10279_s26, 4096, %s10277_s17, %s10283_s18, %s8322_s27, %s8322_s27, %s8324_s13   ;;  %v7730_v13 = vpack.c.bf16 %v3602_v28, %v3598_v12 }
 0x389   : > { %7824 = vst [vmem:[%s10152_s7 + $0x78] sm:$0xff] %v7570_v23   ;;  %s10930_s30 = sshll.u32 %s8383_s25, 12  ;;  %s10931_s14 = sshll.u32 %s10152_s7, 4  ;;  %s10319_s14 = int_to_ptr.vmem [resolvable:$true] %s10931_s14 }
 0x38a   : > { %s10315_s10 = scalar_lea.hbm %s10372_s6, %s10930_s30  ;;  %7856 = vst [vmem:[%s10152_s7 + $0xf8] sm:$0xff] %v7730_v13   ;;  %s8236_s15 = scalar_lea.vmem %s10319_s14, 4096 }
 0x38b   : > { %p8237_p0 = scmp.ne.s32.totalorder %s10319_s14, %s8236_s15  ;;  %s8326_s26 = smov [#allocation13]  }
 0x38c   : > { %s8240_s17 = sshll.u32 %s8326_s26, 4  ;;  %s8241_s17 = int_to_ptr.vmem [resolvable:$false] %s8240_s17 }
 0x38d   : > { %p8238_p5 = pnand %p8237_p0, %p10904_p12  ;;  %s8242_s25 = scalar_lea.vmem %s8241_s17, 8192 }
 0x38e   : > { %p8243_p2 = scmp.lt.s32.totalorder %s10319_s14, %s8241_s17  ;;  %p8244_p9 = scmp.lt.s32.totalorder %s8242_s25, %s8236_s15 }
 0x38f   : > { %p8239_p10 = pneg %p8238_p5 }
 0x390   : > { %p8245_p1 = por %p8244_p9, %p8243_p2 }
 0x392   : > { %p8246_p4 = pnand %p8245_p1, %p8239_p10 }
 0x394   : > { %8249 = shalt.err (!%p8246_p4)
}
 0x395   : > { %s8250_s12 = scalar_lea.hbm %s10315_s10, 4096  ;;  %s8254_s11 = scalar_lea.hbm %s10372_s6, 8192 }
 0x396   : > { %p8251_p6 = scmp.ne.s32.totalorder %s10315_s10, %s8250_s12  ;;  %p8255_p11 = scmp.lt.s32.totalorder %s10315_s10, %s10372_s6 }
 0x397   : > { %p8256_p7 = scmp.lt.s32.totalorder %s8254_s11, %s8250_s12 }
 0x398   : > { %p8252_p8 = pnand %p8251_p6, %p10904_p12 }
 0x399   : > { %p8257_p13 = por %p8256_p7, %p8255_p11 }
 0x39a   : > { %p8253_p3 = pneg %p8252_p8 }
 0x39c   : > { %p8258_p0 = pnand %p8257_p13, %p8253_p3 }
 0x39e   : > { %8261 = shalt.err (!%p8258_p0)
}
 0x39f   : > { %7873 = dma.vmem_to_hbm [thread:$0]  (%p10904_p12), %s10319_s14, 4096, %s10315_s10, %s10283_s18, %s8322_s27, %s8322_s27, %s8324_s13  }
 0x3a0 PF: > { %s5984_s20 = sand.u32 1, %s8300_s21   ;;  %p10932_p5 = scmp.ne.s32.totalorder %s10564_s28, 0 }
 0x3a1   : > { %p10933_p10 = scmp.ge.s32.totalorder %s8312_s24, 2  ;;  %s5985_s15 = scalar_lea.sflag [#allocation4], %s5984_s20 }
 0x3a3   : > { %p7892_p2 = pnand %p10933_p10, %p10932_p5 }
 0x3a5   : > { %p7893_p9 = pneg %p7892_p2 }
 0x3a7   : > { %8291 = dma.done.wait (%p7893_p9), %s5985_s15, 8192  }
 0x3a8   : > { %8293 = vsyncadd (%p7893_p9), %s5985_s15, 4294959104  ;;  %s10934_s19 = sadd.s32 4294967294, %s8312_s24  }
 0x3a9   : > { %s5993_s26 = sand.u32 1, %s10934_s19  }
 0x3aa   : > { %s5994_s17 = scalar_lea.sflag [#allocation12], %s5993_s26 }
 0x3ab   : > { %8295 = dma.done.wait (%p7893_p9), %s5994_s17, 8192  }
 0x3ac   : > { %8297 = vsyncadd (%p7893_p9), %s5994_s17, 4294959104  ;;  %p25_p12 = scmp.ge.s32.totalorder %s8439_s9, 4   ;;  %s10935_s21 = smov %s8304_s22 }
 0x3ad   : > { %s10936_s22 = smov %s8308_s23  ;;  %s10937_s23 = smov %s8457_s8 }
 0x3ae   : > { %s10938_s24 = smov %s8439_s9  ;;  %27 = sbr.rel (!%p25_p12) target bundleno = 9 (0x9), region = 130 }
 0x3b3   :  { %6008 = vsyncpa [#allocation3], 1 }
 0x3b4   :  { %6010 = vsyncpa [#allocation3 + $0x1], 1 }
 0x3b5   :  { %6011 = vsyncpa [#allocation6], 1 }
 0x3b6   :  { %6012 = vsyncpa [#allocation9], 1 }
 0x3b7   :  { %6013 = vsyncpa [#allocation4], 1 }
 0x3b8   :  { %6015 = vsyncpa [#allocation4 + $0x1], 1 }
 0x3b9   :  { %6016 = vsyncpa [#allocation12], 1 }
 0x3ba   :  { %6018 = vsyncpa [#allocation12 + $0x1], 1 }

</bundles_post_ra>
